<compile_context>
chip_gen: v6e
topology: v6e:2x2x1
jax: 0.10.0
libtpu: 0.0.40
codegen_flags: <defaults>
</compile_context>

<pallas_src>
import functools

import jax
import jax.numpy as jnp
from jax import lax
from jax.experimental import pallas as pl
from jax.experimental.pallas import tpu as pltpu


ALPHA = 0.25
K1 = 3 * 5 * 5            # 75   conv1 contraction (in_c * kh * kw)
K1PAD = 80                # multiple of 16 (bf16 sublane pack), not 128
K2 = 6 * 5 * 5            # 150  conv2 contraction
K2PAD = 160
NB_ALIGN = 16             # batch rows padded so bf16 sublane slices stay aligned
LOSS_W = 8                # packed loss row width
LANE = 128
VMEM_LIMIT = 32 * 1024 * 1024

_VMEM = pl.BlockSpec(memory_space=pltpu.MemorySpace.VMEM)


def _round_up(n, m):
    return ((n + m - 1) // m) * m


# ---------------------------------------------------------------------------
# Pallas kernels
# ---------------------------------------------------------------------------
def _conv1_pool_kernel(p_ref, w_ref, b_ref, o_ref, *, npixpad):
    """Fused conv1 + bias + ReLU + 2x2 max-pool.

    p_ref: (K1PAD, 4*npixpad) bf16 phase-im2col patches, phases concatenated on
           the lane axis (each phase block 128-aligned).
    w_ref: (6, K1PAD) bf16.  b_ref: (6, 1) f32.  o_ref: (6, npixpad) bf16.
    """
    y = jnp.dot(w_ref[...], p_ref[...], preferred_element_type=jnp.float32)
    y = jnp.maximum(y + b_ref[...], 0.0)
    out = jnp.maximum(jnp.maximum(y[:, 0 * npixpad:1 * npixpad],
                                  y[:, 1 * npixpad:2 * npixpad]),
                      jnp.maximum(y[:, 2 * npixpad:3 * npixpad],
                                  y[:, 3 * npixpad:4 * npixpad]))
    o_ref[...] = out.astype(o_ref.dtype)


def _sum_all_11(v):
    """Reduce a 2D array to shape (1, 1)."""
    return jnp.sum(jnp.sum(v, axis=1, keepdims=True), axis=0, keepdims=True)


def _masked_ce_11(logits, labels, row_lo, row_hi):
    """Mean cross-entropy over rows [row_lo, row_hi); fully vectorized.

    logits: (nbp, 10) f32.  labels: (nbp, 1) int32 (padded rows ignored).
    """
    m = jnp.max(logits, axis=-1, keepdims=True)
    z = logits - m
    lse = jnp.log(jnp.sum(jnp.exp(z), axis=-1, keepdims=True))
    logp = z - lse
    col = lax.broadcasted_iota(jnp.int32, logits.shape, 1)
    onehot = (col == labels).astype(jnp.float32)                  # (nbp, 10)
    picked = jnp.sum(logp * onehot, axis=-1, keepdims=True)       # (nbp, 1)
    row = lax.broadcasted_iota(jnp.int32, picked.shape, 0)
    valid = jnp.logical_and(row >= row_lo, row < row_hi).astype(jnp.float32)
    return -_sum_all_11(picked * valid) / float(row_hi - row_lo)


def _pack_losses(vals):
    """Pack a list of (1,1) scalars into one (1, LOSS_W) row."""
    li = lax.broadcasted_iota(jnp.int32, (1, LOSS_W), 1)
    row = jnp.zeros((1, LOSS_W), jnp.float32)
    for idx, v in enumerate(vals):
        row = jnp.where(li == idx, v, row)
    return row


def _head_forward(p2_ref, w2_ref, b2_ref, w1r_ref, bf1_ref, wf2_ref, bf2_ref,
                  wc_ref, bc_ref, nbp):
    """conv2+pool2 (phase trick) -> fc1 -> fc2 -> classifier, all in VMEM."""
    pooled = None                                 # (25*nbp, 16) f32, rows (p, b)
    for ph in range(4):
        y = jnp.dot(p2_ref[ph], w2_ref[...], preferred_element_type=jnp.float32)
        y = jnp.maximum(y + b2_ref[...], 0.0)
        pooled = y if pooled is None else jnp.maximum(pooled, y)
    pooled = pooled.astype(jnp.bfloat16)
    # fc1 as a sum over the 25 spatial positions; slices are sublane-aligned
    # because nbp is a multiple of 16 (bf16 pack).
    # TODO(synk): fold the 25 taps into one (nbp, 400) @ (400, 120) matmul once
    # the (p, b)-row -> (b, p*16)-lane relayout lowers cleanly in Mosaic.
    h1 = jnp.zeros((nbp, 120), jnp.float32) + bf1_ref[...]
    for p in range(25):
        h1 = h1 + jnp.dot(pooled[p * nbp:(p + 1) * nbp, :], w1r_ref[p],
                          preferred_element_type=jnp.float32)
    h1 = jnp.maximum(h1, 0.0)
    h2 = jnp.dot(h1.astype(jnp.bfloat16), wf2_ref[...],
                 preferred_element_type=jnp.float32) + bf2_ref[...]
    h2 = jnp.maximum(h2, 0.0)                     # features (nbp, 84)
    logits = jnp.dot(h2.astype(jnp.bfloat16), wc_ref[...],
                     preferred_element_type=jnp.float32) + bc_ref[...]
    return h2, logits


def _head_train_kernel(p2_ref, w2_ref, b2_ref, w1r_ref, bf1_ref, wf2_ref,
                       bf2_ref, wc_ref, bc_ref, lab_ref, eq_ref, dsel_ref,
                       logits_ref, loss_ref, *, nbp, b):
    feats, logits = _head_forward(p2_ref, w2_ref, b2_ref, w1r_ref, bf1_ref,
                                  wf2_ref, bf2_ref, wc_ref, bc_ref, nbp)
    logits_ref[...] = logits
    labels = lab_ref[...]
    src_ce = _masked_ce_11(logits, labels, 0, b)
    tgt_ce = _masked_ce_11(logits, labels, b, 2 * b)
    # CCSA loss (matches F.pairwise_distance eps=1e-6): dsel is a (b, nbp)
    # +1/-1 selection matrix so the src-tgt pairing is one tiny MXU matmul
    # instead of unaligned row slices.
    diff = jnp.dot(dsel_ref[...], feats, preferred_element_type=jnp.float32) + 1e-6
    sq = jnp.sum(diff * diff, axis=-1, keepdims=True)             # (b, 1)
    dist = jnp.sqrt(sq)
    mt = jnp.square(jnp.maximum(1.0 - dist, 0.0))
    eq = eq_ref[...]
    csa = _sum_all_11(eq * sq + (1.0 - eq) * mt) / float(b)
    loss = (1.0 - ALPHA) * src_ce + ALPHA * csa
    loss_ref[...] = _pack_losses([loss, src_ce, tgt_ce, csa])


def _head_eval_kernel(p2_ref, w2_ref, b2_ref, w1r_ref, bf1_ref, wf2_ref,
                      bf2_ref, wc_ref, bc_ref, lab_ref,
                      feat_ref, logits_ref, loss_ref, *, nbp, nb):
    feats, logits = _head_forward(p2_ref, w2_ref, b2_ref, w1r_ref, bf1_ref,
                                  wf2_ref, bf2_ref, wc_ref, bc_ref, nbp)
    feat_ref[...] = feats
    logits_ref[...] = logits
    ce = _masked_ce_11(logits, lab_ref[...], 0, nb)
    loss_ref[...] = _pack_losses([ce])


# ---------------------------------------------------------------------------
# JAX glue: phase-im2col, weight prep, pallas_call wrappers
# ---------------------------------------------------------------------------
def _conv1_phase_patches(x, npix, npixpad):
    """(nb,3,32,32) f32 -> (K1PAD, 4*npixpad) bf16, phases concatenated on lanes."""
    for_phases = []
    for dh in range(2):
        for dw in range(2):
            cols = []
            for i in range(5):
                for j in range(5):
                    cols.append(x[:, :, dh + i:dh + i + 28:2, dw + j:dw + j + 28:2])
            p = jnp.stack(cols, axis=0)                   # (25, nb, 3, 14, 14)
            p = p.transpose(2, 0, 1, 3, 4).reshape(K1, npix)
            for_phases.append(jnp.pad(p, ((0, K1PAD - K1), (0, npixpad - npix))))
    return jnp.concatenate(for_phases, axis=1).astype(jnp.bfloat16)


def conv1_pool(x, w1, b1):
    nb = x.shape[0]
    npix = nb * 14 * 14
    npixpad = _round_up(npix, LANE)
    patches = _conv1_phase_patches(x, npix, npixpad)
    w = jnp.pad(w1.reshape(6, K1), ((0, 0), (0, K1PAD - K1))).astype(jnp.bfloat16)
    b = b1.reshape(6, 1).astype(jnp.float32)
    out = pl.pallas_call(
        functools.partial(_conv1_pool_kernel, npixpad=npixpad),
        out_shape=jax.ShapeDtypeStruct((6, npixpad), jnp.bfloat16),
        in_specs=[_VMEM, _VMEM, _VMEM],
        out_specs=_VMEM,
        compiler_params=pltpu.CompilerParams(vmem_limit_bytes=VMEM_LIMIT),
    )(patches, w, b)
    return out[:, :npix].reshape(6, nb, 14, 14)           # bf16 pooled conv1


def _conv2_phase_patches(a1, nbp):
    """(6,nb,14,14) bf16 -> (4, 25*nbp, K2PAD) bf16; rows ordered (pos, batch)."""
    nb = a1.shape[1]
    a1 = jnp.pad(a1, ((0, 0), (0, nbp - nb), (0, 0), (0, 0)))
    phases = []
    for dh in range(2):
        for dw in range(2):
            cols = []
            for i in range(5):
                for j in range(5):
                    cols.append(a1[:, :, dh + i:dh + i + 10:2, dw + j:dw + j + 10:2])
            p = jnp.stack(cols, axis=0)                   # (25, 6, nbp, 5, 5)
            p = p.transpose(3, 4, 2, 1, 0).reshape(25 * nbp, K2)
            phases.append(jnp.pad(p, ((0, 0), (0, K2PAD - K2))))
    return jnp.stack(phases, axis=0).astype(jnp.bfloat16)


def _head_weights(p):
    w2 = jnp.pad(p["conv2_w"].reshape(16, K2).T,
                 ((0, K2PAD - K2), (0, 0))).astype(jnp.bfloat16)        # (K2PAD,16)
    b2 = p["conv2_b"].reshape(1, 16).astype(jnp.float32)
    # fc1 weights rearranged to (25, 16, 120): W1r[p, c, f] = fc1_w[f, c*25 + p]
    w1r = p["fc1_w"].reshape(120, 16, 25).transpose(2, 1, 0).astype(jnp.bfloat16)
    bf1 = p["fc1_b"].reshape(1, 120).astype(jnp.float32)
    wf2 = p["fc2_w"].T.astype(jnp.bfloat16)                              # (120, 84)
    bf2 = p["fc2_b"].reshape(1, 84).astype(jnp.float32)
    wc = p["clf_w"].T.astype(jnp.bfloat16)                               # (84, 10)
    bc = p["clf_b"].reshape(1, 10).astype(jnp.float32)
    return w2, b2, w1r, bf1, wf2, bf2, wc, bc


@jax.jit
def forward_train(p, src_inputs, tgt_inputs, src_labels, tgt_labels):
    b = src_inputs.shape[0]
    nb = 2 * b
    nbp = _round_up(nb, NB_ALIGN)
    x = jnp.concatenate([src_inputs, tgt_inputs], axis=0).astype(jnp.float32)
    a1 = conv1_pool(x, p["conv1_w"], p["conv1_b"])        # (6, 2B, 14, 14) bf16
    p2 = _conv2_phase_patches(a1, nbp)                    # (4, 25*nbp, K2PAD) bf16
    weights = _head_weights(p)
    labels = jnp.concatenate(
        [src_labels.astype(jnp.int32), tgt_labels.astype(jnp.int32),
         jnp.zeros((nbp - nb,), jnp.int32)]).reshape(nbp, 1)
    class_eq = (src_labels == tgt_labels).astype(jnp.float32).reshape(b, 1)
    dsel = (jnp.eye(b, nbp, dtype=jnp.float32)
            - jnp.eye(b, nbp, k=b, dtype=jnp.float32))    # src - tgt pairing
    logits_p, losses = pl.pallas_call(
        functools.partial(_head_train_kernel, nbp=nbp, b=b),
        out_shape=(jax.ShapeDtypeStruct((nbp, 10), jnp.float32),
                   jax.ShapeDtypeStruct((1, LOSS_W), jnp.float32)),
        in_specs=[_VMEM] * 12,
        out_specs=(_VMEM, _VMEM),
        compiler_params=pltpu.CompilerParams(vmem_limit_bytes=VMEM_LIMIT),
    )(p2, *weights, labels, class_eq, dsel)
    src_logits, tgt_logits = logits_p[:b], logits_p[b:nb]
    loss, src_ce, tgt_ce, csa = (losses[0, 0], losses[0, 1],
                                 losses[0, 2], losses[0, 3])
    return (None, [src_logits, tgt_logits], [loss, src_ce, tgt_ce, csa])


@jax.jit
def forward_eval(p, inputs, labels):
    nb = inputs.shape[0]
    nbp = _round_up(nb, NB_ALIGN)
    a1 = conv1_pool(inputs.astype(jnp.float32), p["conv1_w"], p["conv1_b"])
    p2 = _conv2_phase_patches(a1, nbp)
    weights = _head_weights(p)
    lab = jnp.concatenate([labels.astype(jnp.int32),
                           jnp.zeros((nbp - nb,), jnp.int32)]).reshape(nbp, 1)
    feats_p, logits_p, losses = pl.pallas_call(
        functools.partial(_head_eval_kernel, nbp=nbp, nb=nb),
        out_shape=(jax.ShapeDtypeStruct((nbp, 84), jnp.float32),
                   jax.ShapeDtypeStruct((nbp, 10), jnp.float32),
                   jax.ShapeDtypeStruct((1, LOSS_W), jnp.float32)),
        in_specs=[_VMEM] * 10,
        out_specs=(_VMEM, _VMEM, _VMEM),
        compiler_params=pltpu.CompilerParams(vmem_limit_bytes=VMEM_LIMIT),
    )(p2, *weights, lab)
    return ([feats_p[:nb]], logits_p[:nb], [losses[0, 0]])


# ---------------------------------------------------------------------------
# Deterministic synthetic parameters (shapes from the module's __init__)
# ---------------------------------------------------------------------------
def init_params(key):
    ks = jax.random.split(key, 10)
    n = lambda k, s, sc=0.1: jax.random.normal(k, s, jnp.float32) * sc
    return {
        "conv1_w": n(ks[0], (6, 3, 5, 5)),
        "conv1_b": n(ks[1], (6,)),
        "conv2_w": n(ks[2], (16, 6, 5, 5)),
        "conv2_b": n(ks[3], (16,)),
        "fc1_w":   n(ks[4], (120, 16 * 5 * 5)),
        "fc1_b":   n(ks[5], (120,)),
        "fc2_w":   n(ks[6], (84, 120)),
        "fc2_b":   n(ks[7], (84,)),
        "clf_w":   n(ks[8], (10, 84)),
        "clf_b":   n(ks[9], (10,)),
    }


if __name__ == "__main__":
    key = jax.random.PRNGKey(0)
    kp, ks, kt, ksl, ktl = jax.random.split(key, 5)
    params = init_params(kp)

    # Spatial size 32 is forced by the 16*5*5 flatten in the module.
    src_inputs = jax.random.normal(ks, (2, 3, 32, 32), jnp.float32)
    tgt_inputs = jax.random.normal(kt, (2, 3, 32, 32), jnp.float32)
    src_labels = jax.random.randint(ksl, (2,), 0, 10, jnp.int32)
    tgt_labels = jax.random.randint(ktl, (2,), 0, 10, jnp.int32)

    # training-mode forward
    _, logits, losses = forward_train(params, src_inputs, tgt_inputs,
                                      src_labels, tgt_labels)
    jax.block_until_ready(logits)
    jax.block_until_ready(losses)

    # eval-mode forward
    feats, eval_logits, eval_losses = forward_eval(params, src_inputs, src_labels)
    jax.block_until_ready(feats)
    jax.block_until_ready(eval_logits)
    jax.block_until_ready(eval_losses)

    print("KERNEL_OK")
</pallas_src>

<mosaic_0001>
module attributes {stable_mosaic.version = 11 : i64} {
  func.func @_conv1_pool_kernel(%arg0: memref<80x3584xbf16, #tpu.memory_space<vmem>>, %arg1: memref<6x80xbf16, #tpu.memory_space<vmem>>, %arg2: memref<6x1xf32, #tpu.memory_space<vmem>>, %arg3: memref<6x896xbf16, #tpu.memory_space<vmem>>) attributes {dimension_semantics = [], scalar_prefetch = 0 : i64, scratch_operands = 0 : i64, tpu.core_type = #tpu.core_type<tc>} {
    %c0 = arith.constant 0 : index
    %c0_0 = arith.constant 0 : index
    %0 = vector.load %arg1[%c0, %c0_0] : memref<6x80xbf16, #tpu.memory_space<vmem>>, vector<6x80xbf16>
    %c0_1 = arith.constant 0 : index
    %c0_2 = arith.constant 0 : index
    %1 = vector.load %arg0[%c0_1, %c0_2] : memref<80x3584xbf16, #tpu.memory_space<vmem>>, vector<80x3584xbf16>
    %cst = arith.constant dense<0.000000e+00> : vector<6x3584xf32>
    %2 = tpu.matmul %0, %1, %cst {dimension_numbers = #tpu.dot_dimension_numbers<[1], [0], [0], [1], [0, 0, 1, 1], [], []>} : vector<6x80xbf16>, vector<80x3584xbf16>, vector<6x3584xf32> -> vector<6x3584xf32>
    %c0_3 = arith.constant 0 : index
    %c0_4 = arith.constant 0 : index
    %3 = vector.load %arg2[%c0_3, %c0_4] : memref<6x1xf32, #tpu.memory_space<vmem>>, vector<6x1xf32>
    %4 = vector.broadcast %3 : vector<6x1xf32> to vector<6x3584xf32>
    %5 = arith.addf %2, %4 : vector<6x3584xf32>
    %cst_5 = arith.constant 0.000000e+00 : f32
    %6 = vector.broadcast %cst_5 : f32 to vector<6x3584xf32>
    %7 = arith.maximumf %5, %6 : vector<6x3584xf32>
    %8 = vector.extract_strided_slice %7 {offsets = [0, 0], sizes = [6, 896], strides = [1, 1]} : vector<6x3584xf32> to vector<6x896xf32>
    %9 = vector.extract_strided_slice %7 {offsets = [0, 896], sizes = [6, 896], strides = [1, 1]} : vector<6x3584xf32> to vector<6x896xf32>
    %10 = arith.maximumf %8, %9 : vector<6x896xf32>
    %11 = vector.extract_strided_slice %7 {offsets = [0, 1792], sizes = [6, 896], strides = [1, 1]} : vector<6x3584xf32> to vector<6x896xf32>
    %12 = vector.extract_strided_slice %7 {offsets = [0, 2688], sizes = [6, 896], strides = [1, 1]} : vector<6x3584xf32> to vector<6x896xf32>
    %13 = arith.maximumf %11, %12 : vector<6x896xf32>
    %14 = arith.maximumf %10, %13 : vector<6x896xf32>
    %15 = arith.truncf %14 : vector<6x896xf32> to vector<6x896xbf16>
    %c0_6 = arith.constant 0 : index
    %c0_7 = arith.constant 0 : index
    %16 = vector.load %arg3[%c0_6, %c0_7] : memref<6x896xbf16, #tpu.memory_space<vmem>>, vector<6x896xbf16>
    tpu.vector_store %arg3[%c0_6, %c0_7], %15 {strides = array<i32>} : memref<6x896xbf16, #tpu.memory_space<vmem>>, vector<6x896xbf16>,
    return
  }
}

module attributes {stable_mosaic.version = 11 : i64} {
  func.func @_head_train_kernel(%arg0: memref<4x400x160xbf16, #tpu.memory_space<vmem>>, %arg1: memref<160x16xbf16, #tpu.memory_space<vmem>>, %arg2: memref<1x16xf32, #tpu.memory_space<vmem>>, %arg3: memref<25x16x120xbf16, #tpu.memory_space<vmem>>, %arg4: memref<1x120xf32, #tpu.memory_space<vmem>>, %arg5: memref<120x84xbf16, #tpu.memory_space<vmem>>, %arg6: memref<1x84xf32, #tpu.memory_space<vmem>>, %arg7: memref<84x10xbf16, #tpu.memory_space<vmem>>, %arg8: memref<1x10xf32, #tpu.memory_space<vmem>>, %arg9: memref<16x1xi32, #tpu.memory_space<vmem>>, %arg10: memref<2x1xf32, #tpu.memory_space<vmem>>, %arg11: memref<2x16xf32, #tpu.memory_space<vmem>>, %arg12: memref<16x10xf32, #tpu.memory_space<vmem>>, %arg13: memref<1x8xf32, #tpu.memory_space<vmem>>) attributes {dimension_semantics = [], scalar_prefetch = 0 : i64, scratch_operands = 0 : i64, tpu.core_type = #tpu.core_type<tc>} {
    %c0 = arith.constant 0 : index
    %c0_0 = arith.constant 0 : index
    %c0_1 = arith.constant 0 : index
    %0 = vector.load %arg0[%c0, %c0_0, %c0_1] : memref<4x400x160xbf16, #tpu.memory_space<vmem>>, vector<1x400x160xbf16>
    %1 = vector.shape_cast %0 : vector<1x400x160xbf16> to vector<400x160xbf16>
    %c0_2 = arith.constant 0 : index
    %c0_3 = arith.constant 0 : index
    %2 = vector.load %arg1[%c0_2, %c0_3] : memref<160x16xbf16, #tpu.memory_space<vmem>>, vector<160x16xbf16>
    %cst = arith.constant dense<0.000000e+00> : vector<400x16xf32>
    %3 = tpu.matmul %1, %2, %cst {dimension_numbers = #tpu.dot_dimension_numbers<[1], [0], [0], [1], [0, 0, 1, 1], [], []>} : vector<400x160xbf16>, vector<160x16xbf16>, vector<400x16xf32> -> vector<400x16xf32>
    %c0_4 = arith.constant 0 : index
    %c0_5 = arith.constant 0 : index
    %4 = vector.load %arg2[%c0_4, %c0_5] : memref<1x16xf32, #tpu.memory_space<vmem>>, vector<1x16xf32>
    %5 = vector.broadcast %4 : vector<1x16xf32> to vector<400x16xf32>
    %6 = arith.addf %3, %5 : vector<400x16xf32>
    %cst_6 = arith.constant 0.000000e+00 : f32
    %7 = vector.broadcast %cst_6 : f32 to vector<400x16xf32>
    %8 = arith.maximumf %6, %7 : vector<400x16xf32>
    %c1 = arith.constant 1 : index
    %c0_7 = arith.constant 0 : index
    %c0_8 = arith.constant 0 : index
    %9 = vector.load %arg0[%c1, %c0_7, %c0_8] : memref<4x400x160xbf16, #tpu.memory_space<vmem>>, vector<1x400x160xbf16>
    %10 = vector.shape_cast %9 : vector<1x400x160xbf16> to vector<400x160xbf16>
    %c0_9 = arith.constant 0 : index
    %c0_10 = arith.constant 0 : index
    %11 = vector.load %arg1[%c0_9, %c0_10] : memref<160x16xbf16, #tpu.memory_space<vmem>>, vector<160x16xbf16>
    %cst_11 = arith.constant dense<0.000000e+00> : vector<400x16xf32>
    %12 = tpu.matmul %10, %11, %cst_11 {dimension_numbers = #tpu.dot_dimension_numbers<[1], [0], [0], [1], [0, 0, 1, 1], [], []>} : vector<400x160xbf16>, vector<160x16xbf16>, vector<400x16xf32> -> vector<400x16xf32>
    %c0_12 = arith.constant 0 : index
    %c0_13 = arith.constant 0 : index
    %13 = vector.load %arg2[%c0_12, %c0_13] : memref<1x16xf32, #tpu.memory_space<vmem>>, vector<1x16xf32>
    %14 = vector.broadcast %13 : vector<1x16xf32> to vector<400x16xf32>
    %15 = arith.addf %12, %14 : vector<400x16xf32>
    %cst_14 = arith.constant 0.000000e+00 : f32
    %16 = vector.broadcast %cst_14 : f32 to vector<400x16xf32>
    %17 = arith.maximumf %15, %16 : vector<400x16xf32>
    %18 = arith.maximumf %8, %17 : vector<400x16xf32>
    %c2 = arith.constant 2 : index
    %c0_15 = arith.constant 0 : index
    %c0_16 = arith.constant 0 : index
    %19 = vector.load %arg0[%c2, %c0_15, %c0_16] : memref<4x400x160xbf16, #tpu.memory_space<vmem>>, vector<1x400x160xbf16>
    %20 = vector.shape_cast %19 : vector<1x400x160xbf16> to vector<400x160xbf16>
    %c0_17 = arith.constant 0 : index
    %c0_18 = arith.constant 0 : index
    %21 = vector.load %arg1[%c0_17, %c0_18] : memref<160x16xbf16, #tpu.memory_space<vmem>>, vector<160x16xbf16>
    %cst_19 = arith.constant dense<0.000000e+00> : vector<400x16xf32>
    %22 = tpu.matmul %20, %21, %cst_19 {dimension_numbers = #tpu.dot_dimension_numbers<[1], [0], [0], [1], [0, 0, 1, 1], [], []>} : vector<400x160xbf16>, vector<160x16xbf16>, vector<400x16xf32> -> vector<400x16xf32>
    %c0_20 = arith.constant 0 : index
    %c0_21 = arith.constant 0 : index
    %23 = vector.load %arg2[%c0_20, %c0_21] : memref<1x16xf32, #tpu.memory_space<vmem>>, vector<1x16xf32>
    %24 = vector.broadcast %23 : vector<1x16xf32> to vector<400x16xf32>
    %25 = arith.addf %22, %24 : vector<400x16xf32>
    %cst_22 = arith.constant 0.000000e+00 : f32
    %26 = vector.broadcast %cst_22 : f32 to vector<400x16xf32>
    %27 = arith.maximumf %25, %26 : vector<400x16xf32>
    %28 = arith.maximumf %18, %27 : vector<400x16xf32>
    %c3 = arith.constant 3 : index
    %c0_23 = arith.constant 0 : index
    %c0_24 = arith.constant 0 : index
    %29 = vector.load %arg0[%c3, %c0_23, %c0_24] : memref<4x400x160xbf16, #tpu.memory_space<vmem>>, vector<1x400x160xbf16>
    %30 = vector.shape_cast %29 : vector<1x400x160xbf16> to vector<400x160xbf16>
    %c0_25 = arith.constant 0 : index
    %c0_26 = arith.constant 0 : index
    %31 = vector.load %arg1[%c0_25, %c0_26] : memref<160x16xbf16, #tpu.memory_space<vmem>>, vector<160x16xbf16>
    %cst_27 = arith.constant dense<0.000000e+00> : vector<400x16xf32>
    %32 = tpu.matmul %30, %31, %cst_27 {dimension_numbers = #tpu.dot_dimension_numbers<[1], [0], [0], [1], [0, 0, 1, 1], [], []>} : vector<400x160xbf16>, vector<160x16xbf16>, vector<400x16xf32> -> vector<400x16xf32>
    %c0_28 = arith.constant 0 : index
    %c0_29 = arith.constant 0 : index
    %33 = vector.load %arg2[%c0_28, %c0_29] : memref<1x16xf32, #tpu.memory_space<vmem>>, vector<1x16xf32>
    %34 = vector.broadcast %33 : vector<1x16xf32> to vector<400x16xf32>
    %35 = arith.addf %32, %34 : vector<400x16xf32>
    %cst_30 = arith.constant 0.000000e+00 : f32
    %36 = vector.broadcast %cst_30 : f32 to vector<400x16xf32>
    %37 = arith.maximumf %35, %36 : vector<400x16xf32>
    %38 = arith.maximumf %28, %37 : vector<400x16xf32>
    %39 = arith.truncf %38 : vector<400x16xf32> to vector<400x16xbf16>
    %cst_31 = arith.constant 0.000000e+00 : f32
    %40 = vector.broadcast %cst_31 : f32 to vector<16x120xf32>
    %c0_32 = arith.constant 0 : index
    %c0_33 = arith.constant 0 : index
    %41 = vector.load %arg4[%c0_32, %c0_33] : memref<1x120xf32, #tpu.memory_space<vmem>>, vector<1x120xf32>
    %42 = vector.broadcast %41 : vector<1x120xf32> to vector<16x120xf32>
    %43 = arith.addf %40, %42 : vector<16x120xf32>
    %44 = vector.extract_strided_slice %39 {offsets = [0, 0], sizes = [16, 16], strides = [1, 1]} : vector<400x16xbf16> to vector<16x16xbf16>
    %c0_34 = arith.constant 0 : index
    %c0_35 = arith.constant 0 : index
    %c0_36 = arith.constant 0 : index
    %45 = vector.load %arg3[%c0_34, %c0_35, %c0_36] : memref<25x16x120xbf16, #tpu.memory_space<vmem>>, vector<1x16x120xbf16>
    %46 = vector.shape_cast %45 : vector<1x16x120xbf16> to vector<16x120xbf16>
    %cst_37 = arith.constant dense<0.000000e+00> : vector<16x120xf32>
    %47 = tpu.matmul %44, %46, %cst_37 {dimension_numbers = #tpu.dot_dimension_numbers<[1], [0], [0], [1], [0, 0, 1, 1], [], []>} : vector<16x16xbf16>, vector<16x120xbf16>, vector<16x120xf32> -> vector<16x120xf32>
    %48 = arith.addf %43, %47 : vector<16x120xf32>
    %49 = vector.extract_strided_slice %39 {offsets = [16, 0], sizes = [16, 16], strides = [1, 1]} : vector<400x16xbf16> to vector<16x16xbf16>
    %c1_38 = arith.constant 1 : index
    %c0_39 = arith.constant 0 : index
    %c0_40 = arith.constant 0 : index
    %50 = vector.load %arg3[%c1_38, %c0_39, %c0_40] : memref<25x16x120xbf16, #tpu.memory_space<vmem>>, vector<1x16x120xbf16>
    %51 = vector.shape_cast %50 : vector<1x16x120xbf16> to vector<16x120xbf16>
    %cst_41 = arith.constant dense<0.000000e+00> : vector<16x120xf32>
    %52 = tpu.matmul %49, %51, %cst_41 {dimension_numbers = #tpu.dot_dimension_numbers<[1], [0], [0], [1], [0, 0, 1, 1], [], []>} : vector<16x16xbf16>, vector<16x120xbf16>, vector<16x120xf32> -> vector<16x120xf32>
    %53 = arith.addf %48, %52 : vector<16x120xf32>
    %54 = vector.extract_strided_slice %39 {offsets = [32, 0], sizes = [16, 16], strides = [1, 1]} : vector<400x16xbf16> to vector<16x16xbf16>
    %c2_42 = arith.constant 2 : index
    %c0_43 = arith.constant 0 : index
    %c0_44 = arith.constant 0 : index
    %55 = vector.load %arg3[%c2_42, %c0_43, %c0_44] : memref<25x16x120xbf16, #tpu.memory_space<vmem>>, vector<1x16x120xbf16>
    %56 = vector.shape_cast %55 : vector<1x16x120xbf16> to vector<16x120xbf16>
    %cst_45 = arith.constant dense<0.000000e+00> : vector<16x120xf32>
    %57 = tpu.matmul %54, %56, %cst_45 {dimension_numbers = #tpu.dot_dimension_numbers<[1], [0], [0], [1], [0, 0, 1, 1], [], []>} : vector<16x16xbf16>, vector<16x120xbf16>, vector<16x120xf32> -> vector<16x120xf32>
    %58 = arith.addf %53, %57 : vector<16x120xf32>
    %59 = vector.extract_strided_slice %39 {offsets = [48, 0], sizes = [16, 16], strides = [1, 1]} : vector<400x16xbf16> to vector<16x16xbf16>
    %c3_46 = arith.constant 3 : index
    %c0_47 = arith.constant 0 : index
    %c0_48 = arith.constant 0 : index
    %60 = vector.load %arg3[%c3_46, %c0_47, %c0_48] : memref<25x16x120xbf16, #tpu.memory_space<vmem>>, vector<1x16x120xbf16>
    %61 = vector.shape_cast %60 : vector<1x16x120xbf16> to vector<16x120xbf16>
    %cst_49 = arith.constant dense<0.000000e+00> : vector<16x120xf32>
    %62 = tpu.matmul %59, %61, %cst_49 {dimension_numbers = #tpu.dot_dimension_numbers<[1], [0], [0], [1], [0, 0, 1, 1], [], []>} : vector<16x16xbf16>, vector<16x120xbf16>, vector<16x120xf32> -> vector<16x120xf32>
    %63 = arith.addf %58, %62 : vector<16x120xf32>
    %64 = vector.extract_strided_slice %39 {offsets = [64, 0], sizes = [16, 16], strides = [1, 1]} : vector<400x16xbf16> to vector<16x16xbf16>
    %c4 = arith.constant 4 : index
    %c0_50 = arith.constant 0 : index
    %c0_51 = arith.constant 0 : index
    %65 = vector.load %arg3[%c4, %c0_50, %c0_51] : memref<25x16x120xbf16, #tpu.memory_space<vmem>>, vector<1x16x120xbf16>
    %66 = vector.shape_cast %65 : vector<1x16x120xbf16> to vector<16x120xbf16>
    %cst_52 = arith.constant dense<0.000000e+00> : vector<16x120xf32>
    %67 = tpu.matmul %64, %66, %cst_52 {dimension_numbers = #tpu.dot_dimension_numbers<[1], [0], [0], [1], [0, 0, 1, 1], [], []>} : vector<16x16xbf16>, vector<16x120xbf16>, vector<16x120xf32> -> vector<16x120xf32>
    %68 = arith.addf %63, %67 : vector<16x120xf32>
    %69 = vector.extract_strided_slice %39 {offsets = [80, 0], sizes = [16, 16], strides = [1, 1]} : vector<400x16xbf16> to vector<16x16xbf16>
    %c5 = arith.constant 5 : index
    %c0_53 = arith.constant 0 : index
    %c0_54 = arith.constant 0 : index
    %70 = vector.load %arg3[%c5, %c0_53, %c0_54] : memref<25x16x120xbf16, #tpu.memory_space<vmem>>, vector<1x16x120xbf16>
    %71 = vector.shape_cast %70 : vector<1x16x120xbf16> to vector<16x120xbf16>
    %cst_55 = arith.constant dense<0.000000e+00> : vector<16x120xf32>
    %72 = tpu.matmul %69, %71, %cst_55 {dimension_numbers = #tpu.dot_dimension_numbers<[1], [0], [0], [1], [0, 0, 1, 1], [], []>} : vector<16x16xbf16>, vector<16x120xbf16>, vector<16x120xf32> -> vector<16x120xf32>
    %73 = arith.addf %68, %72 : vector<16x120xf32>
    %74 = vector.extract_strided_slice %39 {offsets = [96, 0], sizes = [16, 16], strides = [1, 1]} : vector<400x16xbf16> to vector<16x16xbf16>
    %c6 = arith.constant 6 : index
    %c0_56 = arith.constant 0 : index
    %c0_57 = arith.constant 0 : index
    %75 = vector.load %arg3[%c6, %c0_56, %c0_57] : memref<25x16x120xbf16, #tpu.memory_space<vmem>>, vector<1x16x120xbf16>
    %76 = vector.shape_cast %75 : vector<1x16x120xbf16> to vector<16x120xbf16>
    %cst_58 = arith.constant dense<0.000000e+00> : vector<16x120xf32>
    %77 = tpu.matmul %74, %76, %cst_58 {dimension_numbers = #tpu.dot_dimension_numbers<[1], [0], [0], [1], [0, 0, 1, 1], [], []>} : vector<16x16xbf16>, vector<16x120xbf16>, vector<16x120xf32> -> vector<16x120xf32>
    %78 = arith.addf %73, %77 : vector<16x120xf32>
    %79 = vector.extract_strided_slice %39 {offsets = [112, 0], sizes = [16, 16], strides = [1, 1]} : vector<400x16xbf16> to vector<16x16xbf16>
    %c7 = arith.constant 7 : index
    %c0_59 = arith.constant 0 : index
    %c0_60 = arith.constant 0 : index
    %80 = vector.load %arg3[%c7, %c0_59, %c0_60] : memref<25x16x120xbf16, #tpu.memory_space<vmem>>, vector<1x16x120xbf16>
    %81 = vector.shape_cast %80 : vector<1x16x120xbf16> to vector<16x120xbf16>
    %cst_61 = arith.constant dense<0.000000e+00> : vector<16x120xf32>
    %82 = tpu.matmul %79, %81, %cst_61 {dimension_numbers = #tpu.dot_dimension_numbers<[1], [0], [0], [1], [0, 0, 1, 1], [], []>} : vector<16x16xbf16>, vector<16x120xbf16>, vector<16x120xf32> -> vector<16x120xf32>
    %83 = arith.addf %78, %82 : vector<16x120xf32>
    %84 = vector.extract_strided_slice %39 {offsets = [128, 0], sizes = [16, 16], strides = [1, 1]} : vector<400x16xbf16> to vector<16x16xbf16>
    %c8 = arith.constant 8 : index
    %c0_62 = arith.constant 0 : index
    %c0_63 = arith.constant 0 : index
    %85 = vector.load %arg3[%c8, %c0_62, %c0_63] : memref<25x16x120xbf16, #tpu.memory_space<vmem>>, vector<1x16x120xbf16>
    %86 = vector.shape_cast %85 : vector<1x16x120xbf16> to vector<16x120xbf16>
    %cst_64 = arith.constant dense<0.000000e+00> : vector<16x120xf32>
    %87 = tpu.matmul %84, %86, %cst_64 {dimension_numbers = #tpu.dot_dimension_numbers<[1], [0], [0], [1], [0, 0, 1, 1], [], []>} : vector<16x16xbf16>, vector<16x120xbf16>, vector<16x120xf32> -> vector<16x120xf32>
    %88 = arith.addf %83, %87 : vector<16x120xf32>
    %89 = vector.extract_strided_slice %39 {offsets = [144, 0], sizes = [16, 16], strides = [1, 1]} : vector<400x16xbf16> to vector<16x16xbf16>
    %c9 = arith.constant 9 : index
    %c0_65 = arith.constant 0 : index
    %c0_66 = arith.constant 0 : index
    %90 = vector.load %arg3[%c9, %c0_65, %c0_66] : memref<25x16x120xbf16, #tpu.memory_space<vmem>>, vector<1x16x120xbf16>
    %91 = vector.shape_cast %90 : vector<1x16x120xbf16> to vector<16x120xbf16>
    %cst_67 = arith.constant dense<0.000000e+00> : vector<16x120xf32>
    %92 = tpu.matmul %89, %91, %cst_67 {dimension_numbers = #tpu.dot_dimension_numbers<[1], [0], [0], [1], [0, 0, 1, 1], [], []>} : vector<16x16xbf16>, vector<16x120xbf16>, vector<16x120xf32> -> vector<16x120xf32>
    %93 = arith.addf %88, %92 : vector<16x120xf32>
    %94 = vector.extract_strided_slice %39 {offsets = [160, 0], sizes = [16, 16], strides = [1, 1]} : vector<400x16xbf16> to vector<16x16xbf16>
    %c10 = arith.constant 10 : index
    %c0_68 = arith.constant 0 : index
    %c0_69 = arith.constant 0 : index
    %95 = vector.load %arg3[%c10, %c0_68, %c0_69] : memref<25x16x120xbf16, #tpu.memory_space<vmem>>, vector<1x16x120xbf16>
    %96 = vector.shape_cast %95 : vector<1x16x120xbf16> to vector<16x120xbf16>
    %cst_70 = arith.constant dense<0.000000e+00> : vector<16x120xf32>
    %97 = tpu.matmul %94, %96, %cst_70 {dimension_numbers = #tpu.dot_dimension_numbers<[1], [0], [0], [1], [0, 0, 1, 1], [], []>} : vector<16x16xbf16>, vector<16x120xbf16>, vector<16x120xf32> -> vector<16x120xf32>
    %98 = arith.addf %93, %97 : vector<16x120xf32>
    %99 = vector.extract_strided_slice %39 {offsets = [176, 0], sizes = [16, 16], strides = [1, 1]} : vector<400x16xbf16> to vector<16x16xbf16>
    %c11 = arith.constant 11 : index
    %c0_71 = arith.constant 0 : index
    %c0_72 = arith.constant 0 : index
    %100 = vector.load %arg3[%c11, %c0_71, %c0_72] : memref<25x16x120xbf16, #tpu.memory_space<vmem>>, vector<1x16x120xbf16>
    %101 = vector.shape_cast %100 : vector<1x16x120xbf16> to vector<16x120xbf16>
    %cst_73 = arith.constant dense<0.000000e+00> : vector<16x120xf32>
    %102 = tpu.matmul %99, %101, %cst_73 {dimension_numbers = #tpu.dot_dimension_numbers<[1], [0], [0], [1], [0, 0, 1, 1], [], []>} : vector<16x16xbf16>, vector<16x120xbf16>, vector<16x120xf32> -> vector<16x120xf32>
    %103 = arith.addf %98, %102 : vector<16x120xf32>
    %104 = vector.extract_strided_slice %39 {offsets = [192, 0], sizes = [16, 16], strides = [1, 1]} : vector<400x16xbf16> to vector<16x16xbf16>
    %c12 = arith.constant 12 : index
    %c0_74 = arith.constant 0 : index
    %c0_75 = arith.constant 0 : index
    %105 = vector.load %arg3[%c12, %c0_74, %c0_75] : memref<25x16x120xbf16, #tpu.memory_space<vmem>>, vector<1x16x120xbf16>
    %106 = vector.shape_cast %105 : vector<1x16x120xbf16> to vector<16x120xbf16>
    %cst_76 = arith.constant dense<0.000000e+00> : vector<16x120xf32>
    %107 = tpu.matmul %104, %106, %cst_76 {dimension_numbers = #tpu.dot_dimension_numbers<[1], [0], [0], [1], [0, 0, 1, 1], [], []>} : vector<16x16xbf16>, vector<16x120xbf16>, vector<16x120xf32> -> vector<16x120xf32>
    %108 = arith.addf %103, %107 : vector<16x120xf32>
    %109 = vector.extract_strided_slice %39 {offsets = [208, 0], sizes = [16, 16], strides = [1, 1]} : vector<400x16xbf16> to vector<16x16xbf16>
    %c13 = arith.constant 13 : index
    %c0_77 = arith.constant 0 : index
    %c0_78 = arith.constant 0 : index
    %110 = vector.load %arg3[%c13, %c0_77, %c0_78] : memref<25x16x120xbf16, #tpu.memory_space<vmem>>, vector<1x16x120xbf16>
    %111 = vector.shape_cast %110 : vector<1x16x120xbf16> to vector<16x120xbf16>
    %cst_79 = arith.constant dense<0.000000e+00> : vector<16x120xf32>
    %112 = tpu.matmul %109, %111, %cst_79 {dimension_numbers = #tpu.dot_dimension_numbers<[1], [0], [0], [1], [0, 0, 1, 1], [], []>} : vector<16x16xbf16>, vector<16x120xbf16>, vector<16x120xf32> -> vector<16x120xf32>
    %113 = arith.addf %108, %112 : vector<16x120xf32>
    %114 = vector.extract_strided_slice %39 {offsets = [224, 0], sizes = [16, 16], strides = [1, 1]} : vector<400x16xbf16> to vector<16x16xbf16>
    %c14 = arith.constant 14 : index
    %c0_80 = arith.constant 0 : index
    %c0_81 = arith.constant 0 : index
    %115 = vector.load %arg3[%c14, %c0_80, %c0_81] : memref<25x16x120xbf16, #tpu.memory_space<vmem>>, vector<1x16x120xbf16>
    %116 = vector.shape_cast %115 : vector<1x16x120xbf16> to vector<16x120xbf16>
    %cst_82 = arith.constant dense<0.000000e+00> : vector<16x120xf32>
    %117 = tpu.matmul %114, %116, %cst_82 {dimension_numbers = #tpu.dot_dimension_numbers<[1], [0], [0], [1], [0, 0, 1, 1], [], []>} : vector<16x16xbf16>, vector<16x120xbf16>, vector<16x120xf32> -> vector<16x120xf32>
    %118 = arith.addf %113, %117 : vector<16x120xf32>
    %119 = vector.extract_strided_slice %39 {offsets = [240, 0], sizes = [16, 16], strides = [1, 1]} : vector<400x16xbf16> to vector<16x16xbf16>
    %c15 = arith.constant 15 : index
    %c0_83 = arith.constant 0 : index
    %c0_84 = arith.constant 0 : index
    %120 = vector.load %arg3[%c15, %c0_83, %c0_84] : memref<25x16x120xbf16, #tpu.memory_space<vmem>>, vector<1x16x120xbf16>
    %121 = vector.shape_cast %120 : vector<1x16x120xbf16> to vector<16x120xbf16>
    %cst_85 = arith.constant dense<0.000000e+00> : vector<16x120xf32>
    %122 = tpu.matmul %119, %121, %cst_85 {dimension_numbers = #tpu.dot_dimension_numbers<[1], [0], [0], [1], [0, 0, 1, 1], [], []>} : vector<16x16xbf16>, vector<16x120xbf16>, vector<16x120xf32> -> vector<16x120xf32>
    %123 = arith.addf %118, %122 : vector<16x120xf32>
    %124 = vector.extract_strided_slice %39 {offsets = [256, 0], sizes = [16, 16], strides = [1, 1]} : vector<400x16xbf16> to vector<16x16xbf16>
    %c16 = arith.constant 16 : index
    %c0_86 = arith.constant 0 : index
    %c0_87 = arith.constant 0 : index
    %125 = vector.load %arg3[%c16, %c0_86, %c0_87] : memref<25x16x120xbf16, #tpu.memory_space<vmem>>, vector<1x16x120xbf16>
    %126 = vector.shape_cast %125 : vector<1x16x120xbf16> to vector<16x120xbf16>
    %cst_88 = arith.constant dense<0.000000e+00> : vector<16x120xf32>
    %127 = tpu.matmul %124, %126, %cst_88 {dimension_numbers = #tpu.dot_dimension_numbers<[1], [0], [0], [1], [0, 0, 1, 1], [], []>} : vector<16x16xbf16>, vector<16x120xbf16>, vector<16x120xf32> -> vector<16x120xf32>
    %128 = arith.addf %123, %127 : vector<16x120xf32>
    %129 = vector.extract_strided_slice %39 {offsets = [272, 0], sizes = [16, 16], strides = [1, 1]} : vector<400x16xbf16> to vector<16x16xbf16>
    %c17 = arith.constant 17 : index
    %c0_89 = arith.constant 0 : index
    %c0_90 = arith.constant 0 : index
    %130 = vector.load %arg3[%c17, %c0_89, %c0_90] : memref<25x16x120xbf16, #tpu.memory_space<vmem>>, vector<1x16x120xbf16>
    %131 = vector.shape_cast %130 : vector<1x16x120xbf16> to vector<16x120xbf16>
    %cst_91 = arith.constant dense<0.000000e+00> : vector<16x120xf32>
    %132 = tpu.matmul %129, %131, %cst_91 {dimension_numbers = #tpu.dot_dimension_numbers<[1], [0], [0], [1], [0, 0, 1, 1], [], []>} : vector<16x16xbf16>, vector<16x120xbf16>, vector<16x120xf32> -> vector<16x120xf32>
    %133 = arith.addf %128, %132 : vector<16x120xf32>
    %134 = vector.extract_strided_slice %39 {offsets = [288, 0], sizes = [16, 16], strides = [1, 1]} : vector<400x16xbf16> to vector<16x16xbf16>
    %c18 = arith.constant 18 : index
    %c0_92 = arith.constant 0 : index
    %c0_93 = arith.constant 0 : index
    %135 = vector.load %arg3[%c18, %c0_92, %c0_93] : memref<25x16x120xbf16, #tpu.memory_space<vmem>>, vector<1x16x120xbf16>
    %136 = vector.shape_cast %135 : vector<1x16x120xbf16> to vector<16x120xbf16>
    %cst_94 = arith.constant dense<0.000000e+00> : vector<16x120xf32>
    %137 = tpu.matmul %134, %136, %cst_94 {dimension_numbers = #tpu.dot_dimension_numbers<[1], [0], [0], [1], [0, 0, 1, 1], [], []>} : vector<16x16xbf16>, vector<16x120xbf16>, vector<16x120xf32> -> vector<16x120xf32>
    %138 = arith.addf %133, %137 : vector<16x120xf32>
    %139 = vector.extract_strided_slice %39 {offsets = [304, 0], sizes = [16, 16], strides = [1, 1]} : vector<400x16xbf16> to vector<16x16xbf16>
    %c19 = arith.constant 19 : index
    %c0_95 = arith.constant 0 : index
    %c0_96 = arith.constant 0 : index
    %140 = vector.load %arg3[%c19, %c0_95, %c0_96] : memref<25x16x120xbf16, #tpu.memory_space<vmem>>, vector<1x16x120xbf16>
    %141 = vector.shape_cast %140 : vector<1x16x120xbf16> to vector<16x120xbf16>
    %cst_97 = arith.constant dense<0.000000e+00> : vector<16x120xf32>
    %142 = tpu.matmul %139, %141, %cst_97 {dimension_numbers = #tpu.dot_dimension_numbers<[1], [0], [0], [1], [0, 0, 1, 1], [], []>} : vector<16x16xbf16>, vector<16x120xbf16>, vector<16x120xf32> -> vector<16x120xf32>
    %143 = arith.addf %138, %142 : vector<16x120xf32>
    %144 = vector.extract_strided_slice %39 {offsets = [320, 0], sizes = [16, 16], strides = [1, 1]} : vector<400x16xbf16> to vector<16x16xbf16>
    %c20 = arith.constant 20 : index
    %c0_98 = arith.constant 0 : index
    %c0_99 = arith.constant 0 : index
    %145 = vector.load %arg3[%c20, %c0_98, %c0_99] : memref<25x16x120xbf16, #tpu.memory_space<vmem>>, vector<1x16x120xbf16>
    %146 = vector.shape_cast %145 : vector<1x16x120xbf16> to vector<16x120xbf16>
    %cst_100 = arith.constant dense<0.000000e+00> : vector<16x120xf32>
    %147 = tpu.matmul %144, %146, %cst_100 {dimension_numbers = #tpu.dot_dimension_numbers<[1], [0], [0], [1], [0, 0, 1, 1], [], []>} : vector<16x16xbf16>, vector<16x120xbf16>, vector<16x120xf32> -> vector<16x120xf32>
    %148 = arith.addf %143, %147 : vector<16x120xf32>
    %149 = vector.extract_strided_slice %39 {offsets = [336, 0], sizes = [16, 16], strides = [1, 1]} : vector<400x16xbf16> to vector<16x16xbf16>
    %c21 = arith.constant 21 : index
    %c0_101 = arith.constant 0 : index
    %c0_102 = arith.constant 0 : index
    %150 = vector.load %arg3[%c21, %c0_101, %c0_102] : memref<25x16x120xbf16, #tpu.memory_space<vmem>>, vector<1x16x120xbf16>
    %151 = vector.shape_cast %150 : vector<1x16x120xbf16> to vector<16x120xbf16>
    %cst_103 = arith.constant dense<0.000000e+00> : vector<16x120xf32>
    %152 = tpu.matmul %149, %151, %cst_103 {dimension_numbers = #tpu.dot_dimension_numbers<[1], [0], [0], [1], [0, 0, 1, 1], [], []>} : vector<16x16xbf16>, vector<16x120xbf16>, vector<16x120xf32> -> vector<16x120xf32>
    %153 = arith.addf %148, %152 : vector<16x120xf32>
    %154 = vector.extract_strided_slice %39 {offsets = [352, 0], sizes = [16, 16], strides = [1, 1]} : vector<400x16xbf16> to vector<16x16xbf16>
    %c22 = arith.constant 22 : index
    %c0_104 = arith.constant 0 : index
    %c0_105 = arith.constant 0 : index
    %155 = vector.load %arg3[%c22, %c0_104, %c0_105] : memref<25x16x120xbf16, #tpu.memory_space<vmem>>, vector<1x16x120xbf16>
    %156 = vector.shape_cast %155 : vector<1x16x120xbf16> to vector<16x120xbf16>
    %cst_106 = arith.constant dense<0.000000e+00> : vector<16x120xf32>
    %157 = tpu.matmul %154, %156, %cst_106 {dimension_numbers = #tpu.dot_dimension_numbers<[1], [0], [0], [1], [0, 0, 1, 1], [], []>} : vector<16x16xbf16>, vector<16x120xbf16>, vector<16x120xf32> -> vector<16x120xf32>
    %158 = arith.addf %153, %157 : vector<16x120xf32>
    %159 = vector.extract_strided_slice %39 {offsets = [368, 0], sizes = [16, 16], strides = [1, 1]} : vector<400x16xbf16> to vector<16x16xbf16>
    %c23 = arith.constant 23 : index
    %c0_107 = arith.constant 0 : index
    %c0_108 = arith.constant 0 : index
    %160 = vector.load %arg3[%c23, %c0_107, %c0_108] : memref<25x16x120xbf16, #tpu.memory_space<vmem>>, vector<1x16x120xbf16>
    %161 = vector.shape_cast %160 : vector<1x16x120xbf16> to vector<16x120xbf16>
    %cst_109 = arith.constant dense<0.000000e+00> : vector<16x120xf32>
    %162 = tpu.matmul %159, %161, %cst_109 {dimension_numbers = #tpu.dot_dimension_numbers<[1], [0], [0], [1], [0, 0, 1, 1], [], []>} : vector<16x16xbf16>, vector<16x120xbf16>, vector<16x120xf32> -> vector<16x120xf32>
    %163 = arith.addf %158, %162 : vector<16x120xf32>
    %164 = vector.extract_strided_slice %39 {offsets = [384, 0], sizes = [16, 16], strides = [1, 1]} : vector<400x16xbf16> to vector<16x16xbf16>
    %c24 = arith.constant 24 : index
    %c0_110 = arith.constant 0 : index
    %c0_111 = arith.constant 0 : index
    %165 = vector.load %arg3[%c24, %c0_110, %c0_111] : memref<25x16x120xbf16, #tpu.memory_space<vmem>>, vector<1x16x120xbf16>
    %166 = vector.shape_cast %165 : vector<1x16x120xbf16> to vector<16x120xbf16>
    %cst_112 = arith.constant dense<0.000000e+00> : vector<16x120xf32>
    %167 = tpu.matmul %164, %166, %cst_112 {dimension_numbers = #tpu.dot_dimension_numbers<[1], [0], [0], [1], [0, 0, 1, 1], [], []>} : vector<16x16xbf16>, vector<16x120xbf16>, vector<16x120xf32> -> vector<16x120xf32>
    %168 = arith.addf %163, %167 : vector<16x120xf32>
    %cst_113 = arith.constant 0.000000e+00 : f32
    %169 = vector.broadcast %cst_113 : f32 to vector<16x120xf32>
    %170 = arith.maximumf %168, %169 : vector<16x120xf32>
    %171 = arith.truncf %170 : vector<16x120xf32> to vector<16x120xbf16>
    %c0_114 = arith.constant 0 : index
    %c0_115 = arith.constant 0 : index
    %172 = vector.load %arg5[%c0_114, %c0_115] : memref<120x84xbf16, #tpu.memory_space<vmem>>, vector<120x84xbf16>
    %cst_116 = arith.constant dense<0.000000e+00> : vector<16x84xf32>
    %173 = tpu.matmul %171, %172, %cst_116 {dimension_numbers = #tpu.dot_dimension_numbers<[1], [0], [0], [1], [0, 0, 1, 1], [], []>} : vector<16x120xbf16>, vector<120x84xbf16>, vector<16x84xf32> -> vector<16x84xf32>
    %c0_117 = arith.constant 0 : index
    %c0_118 = arith.constant 0 : index
    %174 = vector.load %arg6[%c0_117, %c0_118] : memref<1x84xf32, #tpu.memory_space<vmem>>, vector<1x84xf32>
    %175 = vector.broadcast %174 : vector<1x84xf32> to vector<16x84xf32>
    %176 = arith.addf %173, %175 : vector<16x84xf32>
    %cst_119 = arith.constant 0.000000e+00 : f32
    %177 = vector.broadcast %cst_119 : f32 to vector<16x84xf32>
    %178 = arith.maximumf %176, %177 : vector<16x84xf32>
    %179 = arith.truncf %178 : vector<16x84xf32> to vector<16x84xbf16>
    %c0_120 = arith.constant 0 : index
    %c0_121 = arith.constant 0 : index
    %180 = vector.load %arg7[%c0_120, %c0_121] : memref<84x10xbf16, #tpu.memory_space<vmem>>, vector<84x10xbf16>
    %cst_122 = arith.constant dense<0.000000e+00> : vector<16x10xf32>
    %181 = tpu.matmul %179, %180, %cst_122 {dimension_numbers = #tpu.dot_dimension_numbers<[1], [0], [0], [1], [0, 0, 1, 1], [], []>} : vector<16x84xbf16>, vector<84x10xbf16>, vector<16x10xf32> -> vector<16x10xf32>
    %c0_123 = arith.constant 0 : index
    %c0_124 = arith.constant 0 : index
    %182 = vector.load %arg8[%c0_123, %c0_124] : memref<1x10xf32, #tpu.memory_space<vmem>>, vector<1x10xf32>
    %183 = vector.broadcast %182 : vector<1x10xf32> to vector<16x10xf32>
    %184 = arith.addf %181, %183 : vector<16x10xf32>
    %c0_125 = arith.constant 0 : index
    %c0_126 = arith.constant 0 : index
    %185 = vector.load %arg12[%c0_125, %c0_126] : memref<16x10xf32, #tpu.memory_space<vmem>>, vector<16x10xf32>
    tpu.vector_store %arg12[%c0_125, %c0_126], %184 {strides = array<i32>} : memref<16x10xf32, #tpu.memory_space<vmem>>, vector<16x10xf32>,
    %c0_127 = arith.constant 0 : index
    %c0_128 = arith.constant 0 : index
    %186 = vector.load %arg9[%c0_127, %c0_128] : memref<16x1xi32, #tpu.memory_space<vmem>>, vector<16x1xi32>
    %cst_129 = arith.constant dense<0xFF800000> : vector<16xf32>
    %187 = vector.multi_reduction <maximumf>, %184, %cst_129 [1] : vector<16x10xf32> to vector<16xf32>
    %188 = vector.shape_cast %187 : vector<16xf32> to vector<16x1xf32>
    %189 = vector.broadcast %188 : vector<16x1xf32> to vector<16x10xf32>
    %190 = arith.subf %184, %189 : vector<16x10xf32>
    %191 = math.exp %190 : vector<16x10xf32>
    %cst_130 = arith.constant dense<0.000000e+00> : vector<16xf32>
    %192 = vector.multi_reduction <add>, %191, %cst_130 [1] : vector<16x10xf32> to vector<16xf32>
    %193 = vector.shape_cast %192 : vector<16xf32> to vector<16x1xf32>
    %194 = math.log %193 : vector<16x1xf32>
    %195 = vector.broadcast %194 : vector<16x1xf32> to vector<16x10xf32>
    %196 = arith.subf %190, %195 : vector<16x10xf32>
    %197 = tpu.iota {dimensions = array<i32: 1>} : vector<16x10xi32>
    %198 = vector.broadcast %186 : vector<16x1xi32> to vector<16x10xi32>
    %199 = arith.cmpi eq, %197, %198 : vector<16x10xi32>
    %200 = arith.extui %199 : vector<16x10xi1> to vector<16x10xi32>
    %201 = arith.sitofp %200 : vector<16x10xi32> to vector<16x10xf32>
    %202 = arith.mulf %196, %201 : vector<16x10xf32>
    %cst_131 = arith.constant dense<0.000000e+00> : vector<16xf32>
    %203 = vector.multi_reduction <add>, %202, %cst_131 [1] : vector<16x10xf32> to vector<16xf32>
    %204 = vector.shape_cast %203 : vector<16xf32> to vector<16x1xf32>
    %205 = tpu.iota {dimensions = array<i32: 0>} : vector<16x1xi32>
    %c0_i32 = arith.constant 0 : i32
    %206 = vector.broadcast %c0_i32 : i32 to vector<16x1xi32>
    %207 = arith.cmpi sge, %205, %206 : vector<16x1xi32>
    %c2_i32 = arith.constant 2 : i32
    %208 = vector.broadcast %c2_i32 : i32 to vector<16x1xi32>
    %209 = arith.cmpi slt, %205, %208 : vector<16x1xi32>
    %210 = arith.andi %207, %209 : vector<16x1xi1>
    %211 = arith.extui %210 : vector<16x1xi1> to vector<16x1xi32>
    %212 = arith.sitofp %211 : vector<16x1xi32> to vector<16x1xf32>
    %213 = arith.mulf %204, %212 : vector<16x1xf32>
    %cst_132 = arith.constant dense<0.000000e+00> : vector<16xf32>
    %214 = vector.multi_reduction <add>, %213, %cst_132 [1] : vector<16x1xf32> to vector<16xf32>
    %215 = vector.shape_cast %214 : vector<16xf32> to vector<16x1xf32>
    %cst_133 = arith.constant dense<0.000000e+00> : vector<1xf32>
    %216 = vector.multi_reduction <add>, %215, %cst_133 [0] : vector<16x1xf32> to vector<1xf32>
    %217 = vector.shape_cast %216 : vector<1xf32> to vector<1x1xf32>
    %cst_134 = arith.constant 0.000000e+00 : f32
    %218 = vector.broadcast %cst_134 : f32 to vector<1x1xf32>
    %219 = arith.subf %218, %217 : vector<1x1xf32>
    %cst_135 = arith.constant 2.000000e+00 : f32
    %220 = vector.broadcast %cst_135 : f32 to vector<1x1xf32>
    %221 = arith.divf %219, %220 : vector<1x1xf32>
    %cst_136 = arith.constant dense<0xFF800000> : vector<16xf32>
    %222 = vector.multi_reduction <maximumf>, %184, %cst_136 [1] : vector<16x10xf32> to vector<16xf32>
    %223 = vector.shape_cast %222 : vector<16xf32> to vector<16x1xf32>
    %224 = vector.broadcast %223 : vector<16x1xf32> to vector<16x10xf32>
    %225 = arith.subf %184, %224 : vector<16x10xf32>
    %226 = math.exp %225 : vector<16x10xf32>
    %cst_137 = arith.constant dense<0.000000e+00> : vector<16xf32>
    %227 = vector.multi_reduction <add>, %226, %cst_137 [1] : vector<16x10xf32> to vector<16xf32>
    %228 = vector.shape_cast %227 : vector<16xf32> to vector<16x1xf32>
    %229 = math.log %228 : vector<16x1xf32>
    %230 = vector.broadcast %229 : vector<16x1xf32> to vector<16x10xf32>
    %231 = arith.subf %225, %230 : vector<16x10xf32>
    %232 = tpu.iota {dimensions = array<i32: 1>} : vector<16x10xi32>
    %233 = vector.broadcast %186 : vector<16x1xi32> to vector<16x10xi32>
    %234 = arith.cmpi eq, %232, %233 : vector<16x10xi32>
    %235 = arith.extui %234 : vector<16x10xi1> to vector<16x10xi32>
    %236 = arith.sitofp %235 : vector<16x10xi32> to vector<16x10xf32>
    %237 = arith.mulf %231, %236 : vector<16x10xf32>
    %cst_138 = arith.constant dense<0.000000e+00> : vector<16xf32>
    %238 = vector.multi_reduction <add>, %237, %cst_138 [1] : vector<16x10xf32> to vector<16xf32>
    %239 = vector.shape_cast %238 : vector<16xf32> to vector<16x1xf32>
    %240 = tpu.iota {dimensions = array<i32: 0>} : vector<16x1xi32>
    %c2_i32_139 = arith.constant 2 : i32
    %241 = vector.broadcast %c2_i32_139 : i32 to vector<16x1xi32>
    %242 = arith.cmpi sge, %240, %241 : vector<16x1xi32>
    %c4_i32 = arith.constant 4 : i32
    %243 = vector.broadcast %c4_i32 : i32 to vector<16x1xi32>
    %244 = arith.cmpi slt, %240, %243 : vector<16x1xi32>
    %245 = arith.andi %242, %244 : vector<16x1xi1>
    %246 = arith.extui %245 : vector<16x1xi1> to vector<16x1xi32>
    %247 = arith.sitofp %246 : vector<16x1xi32> to vector<16x1xf32>
    %248 = arith.mulf %239, %247 : vector<16x1xf32>
    %cst_140 = arith.constant dense<0.000000e+00> : vector<16xf32>
    %249 = vector.multi_reduction <add>, %248, %cst_140 [1] : vector<16x1xf32> to vector<16xf32>
    %250 = vector.shape_cast %249 : vector<16xf32> to vector<16x1xf32>
    %cst_141 = arith.constant dense<0.000000e+00> : vector<1xf32>
    %251 = vector.multi_reduction <add>, %250, %cst_141 [0] : vector<16x1xf32> to vector<1xf32>
    %252 = vector.shape_cast %251 : vector<1xf32> to vector<1x1xf32>
    %cst_142 = arith.constant 0.000000e+00 : f32
    %253 = vector.broadcast %cst_142 : f32 to vector<1x1xf32>
    %254 = arith.subf %253, %252 : vector<1x1xf32>
    %cst_143 = arith.constant 2.000000e+00 : f32
    %255 = vector.broadcast %cst_143 : f32 to vector<1x1xf32>
    %256 = arith.divf %254, %255 : vector<1x1xf32>
    %c0_144 = arith.constant 0 : index
    %c0_145 = arith.constant 0 : index
    %257 = vector.load %arg11[%c0_144, %c0_145] : memref<2x16xf32, #tpu.memory_space<vmem>>, vector<2x16xf32>
    %cst_146 = arith.constant dense<0.000000e+00> : vector<2x84xf32>
    %258 = tpu.matmul %257, %178, %cst_146 {dimension_numbers = #tpu.dot_dimension_numbers<[1], [0], [0], [1], [0, 0, 1, 1], [], []>} : vector<2x16xf32>, vector<16x84xf32>, vector<2x84xf32> -> vector<2x84xf32>
    %cst_147 = arith.constant 9.99999997E-7 : f32
    %259 = vector.broadcast %cst_147 : f32 to vector<2x84xf32>
    %260 = arith.addf %258, %259 : vector<2x84xf32>
    %261 = arith.mulf %260, %260 : vector<2x84xf32>
    %cst_148 = arith.constant dense<0.000000e+00> : vector<2xf32>
    %262 = vector.multi_reduction <add>, %261, %cst_148 [1] : vector<2x84xf32> to vector<2xf32>
    %263 = vector.shape_cast %262 : vector<2xf32> to vector<2x1xf32>
    %264 = math.sqrt %263 : vector<2x1xf32>
    %cst_149 = arith.constant 1.000000e+00 : f32
    %265 = vector.broadcast %cst_149 : f32 to vector<2x1xf32>
    %266 = arith.subf %265, %264 : vector<2x1xf32>
    %cst_150 = arith.constant 0.000000e+00 : f32
    %267 = vector.broadcast %cst_150 : f32 to vector<2x1xf32>
    %268 = arith.maximumf %266, %267 : vector<2x1xf32>
    %269 = arith.mulf %268, %268 : vector<2x1xf32>
    %c0_151 = arith.constant 0 : index
    %c0_152 = arith.constant 0 : index
    %270 = vector.load %arg10[%c0_151, %c0_152] : memref<2x1xf32, #tpu.memory_space<vmem>>, vector<2x1xf32>
    %271 = arith.mulf %270, %263 : vector<2x1xf32>
    %cst_153 = arith.constant 1.000000e+00 : f32
    %272 = vector.broadcast %cst_153 : f32 to vector<2x1xf32>
    %273 = arith.subf %272, %270 : vector<2x1xf32>
    %274 = arith.mulf %273, %269 : vector<2x1xf32>
    %275 = arith.addf %271, %274 : vector<2x1xf32>
    %cst_154 = arith.constant dense<0.000000e+00> : vector<2xf32>
    %276 = vector.multi_reduction <add>, %275, %cst_154 [1] : vector<2x1xf32> to vector<2xf32>
    %277 = vector.shape_cast %276 : vector<2xf32> to vector<2x1xf32>
    %cst_155 = arith.constant dense<0.000000e+00> : vector<1xf32>
    %278 = vector.multi_reduction <add>, %277, %cst_155 [0] : vector<2x1xf32> to vector<1xf32>
    %279 = vector.shape_cast %278 : vector<1xf32> to vector<1x1xf32>
    %cst_156 = arith.constant 2.000000e+00 : f32
    %280 = vector.broadcast %cst_156 : f32 to vector<1x1xf32>
    %281 = arith.divf %279, %280 : vector<1x1xf32>
    %cst_157 = arith.constant 7.500000e-01 : f32
    %282 = vector.broadcast %cst_157 : f32 to vector<1x1xf32>
    %283 = arith.mulf %282, %221 : vector<1x1xf32>
    %cst_158 = arith.constant 2.500000e-01 : f32
    %284 = vector.broadcast %cst_158 : f32 to vector<1x1xf32>
    %285 = arith.mulf %284, %281 : vector<1x1xf32>
    %286 = arith.addf %283, %285 : vector<1x1xf32>
    %287 = tpu.iota {dimensions = array<i32: 1>} : vector<1x8xi32>
    %cst_159 = arith.constant 0.000000e+00 : f32
    %288 = vector.broadcast %cst_159 : f32 to vector<1x8xf32>
    %c0_i32_160 = arith.constant 0 : i32
    %289 = vector.broadcast %c0_i32_160 : i32 to vector<1x8xi32>
    %290 = arith.cmpi eq, %287, %289 : vector<1x8xi32>
    %291 = vector.shape_cast %286 : vector<1x1xf32> to vector<1x1xf32>
    %292 = vector.broadcast %291 : vector<1x1xf32> to vector<1x8xf32>
    %293 = arith.select %290, %292, %288 : vector<1x8xi1>, vector<1x8xf32>
    %c1_i32 = arith.constant 1 : i32
    %294 = vector.broadcast %c1_i32 : i32 to vector<1x8xi32>
    %295 = arith.cmpi eq, %287, %294 : vector<1x8xi32>
    %296 = vector.shape_cast %221 : vector<1x1xf32> to vector<1x1xf32>
    %297 = vector.broadcast %296 : vector<1x1xf32> to vector<1x8xf32>
    %298 = arith.select %295, %297, %293 : vector<1x8xi1>, vector<1x8xf32>
    %c2_i32_161 = arith.constant 2 : i32
    %299 = vector.broadcast %c2_i32_161 : i32 to vector<1x8xi32>
    %300 = arith.cmpi eq, %287, %299 : vector<1x8xi32>
    %301 = vector.shape_cast %256 : vector<1x1xf32> to vector<1x1xf32>
    %302 = vector.broadcast %301 : vector<1x1xf32> to vector<1x8xf32>
    %303 = arith.select %300, %302, %298 : vector<1x8xi1>, vector<1x8xf32>
    %c3_i32 = arith.constant 3 : i32
    %304 = vector.broadcast %c3_i32 : i32 to vector<1x8xi32>
    %305 = arith.cmpi eq, %287, %304 : vector<1x8xi32>
    %306 = vector.shape_cast %281 : vector<1x1xf32> to vector<1x1xf32>
    %307 = vector.broadcast %306 : vector<1x1xf32> to vector<1x8xf32>
    %308 = arith.select %305, %307, %303 : vector<1x8xi1>, vector<1x8xf32>
    %c0_162 = arith.constant 0 : index
    %c0_163 = arith.constant 0 : index
    %309 = vector.load %arg13[%c0_162, %c0_163] : memref<1x8xf32, #tpu.memory_space<vmem>>, vector<1x8xf32>
    tpu.vector_store %arg13[%c0_162, %c0_163], %308 {strides = array<i32>} : memref<1x8xf32, #tpu.memory_space<vmem>>, vector<1x8xf32>,
    return
  }
}

</mosaic_0001>

<bundles_post_ra>
// kernel: forward_train.2
= control target key start
LH: loop header
LB: loop body
LE: loop exit
PB: predicated region body
PF: predicated region fallthrough
CT: control target
= control target key end

     0   :  { %v1900_v1 = vmov 0   ;;  %vm862_vm0 = vcmask 654336   ;;  %s2455_s0 = inlined_call_operand.vmem [shape: bf16[80,3584], index: 0, kind: input, shape index: {}]   ;;  %s2456_s1 = inlined_call_operand.vmem [shape: bf16[6,80], index: 1, kind: input, shape index: {}]   ;;  %s2457_s2 = inlined_call_operand.vmem [shape: f32[6,1], index: 2, kind: input, shape index: {}]   ;;  %s2458_s3 = inlined_call_operand.vmem [shape: bf16[6,896], index: 3, kind: output, shape index: {}]  }
   0x1   :  { %v1690_v0 = vld [vmem:[%s2455_s0 + $0x384] ss:$112 sps:$4 sm:$0xff]   ;;  %898 = vmatprep.mubr.bf16.mxu0 %v1900_v1  ;;  %939 = vmatprep.mubr.bf16.mxu1 %v1900_v1  ;;  %v1692_v2 = vld [vmem:[%s2455_s0 + $0x38c] ss:$112 sps:$4 sm:$0xff]   ;;  %v1694_v3 = vld [vmem:[%s2455_s0 + $0x380] ss:$112 sps:$4 sm:$0xff]  }
   0x2   :  { %1689 = vset.pattern.permute.xlu0 %v1900_v1  ;;  %872 = vmatprep.subr.bf16.mxu0 %v1690_v0  ;;  %v1695_v4 = vld [vmem:[%s2455_s0 + $0x388] ss:$112 sps:$4 sm:$0xff]   ;;  %v1696_v5 = vld [vmem:[%s2455_s0 + $0x2a4] ss:$112 sps:$4 sm:$0xff]   ;;  %v1698_v6 = vld [vmem:[%s2455_s0 + $0x2ac] ss:$112 sps:$4 sm:$0xff]  }
   0x3   :  { %913 = vmatprep.subr.bf16.mxu1 %v1692_v2  ;;  %873 = vmatpush1.bf16.msra.mxu0 %v1694_v3  ;;  %v1700_v7 = vld [vmem:[%s2455_s0 + $0x2a0] ss:$112 sps:$4 sm:$0xff]   ;;  %v1701_v8 = vld [vmem:[%s2455_s0 + $0x2a8] ss:$112 sps:$4 sm:$0xff]   ;;  %v1702_v9 = vld [vmem:[%s2455_s0 + $0x1c4] ss:$112 sps:$4 sm:$0xff]  }
   0x4   :  { %914 = vmatpush1.bf16.msra.mxu1 %v1695_v4  ;;  %874 = vmatprep.subr.bf16.mxu0 %v1696_v5  ;;  %v1704_v10 = vld [vmem:[%s2455_s0 + $0x1cc] ss:$112 sps:$4 sm:$0xff]   ;;  %v1706_v11 = vld [vmem:[%s2455_s0 + $0x1c0] ss:$112 sps:$4 sm:$0xff]   ;;  %v1707_v12 = vld [vmem:[%s2455_s0 + $0x1c8] ss:$112 sps:$4 sm:$0xff]  }
   0x5   :  { %915 = vmatprep.subr.bf16.mxu1 %v1698_v6  ;;  %v1708_v13 = vld [vmem:[%s2455_s0 + $0xe4] ss:$112 sps:$4 sm:$0xff]   ;;  %v1710_v14 = vld [vmem:[%s2455_s0 + $0xec] ss:$112 sps:$4 sm:$0xff]   ;;  %v1712_v15 = vld [vmem:[%s2455_s0 + $0xe0] ss:$112 sps:$4 sm:$0xff]  }
   0x6   :  { %v1713_v16 = vld [vmem:[%s2455_s0 + $0xe8] ss:$112 sps:$4 sm:$0xff]   ;;  %v1714_v17 = vld [vmem:[%s2455_s0 + $0x4] ss:$112 sps:$4 sm:$0xff]   ;;  %v1716_v18 = vld [vmem:[%s2455_s0 + $0xc] ss:$112 sps:$4 sm:$0xff]  }
   0x7   :  { %875 = vmatpush1.bf16.msra.mxu0 %v1700_v7  ;;  %v1718_v19 = vld [vmem:[%s2455_s0] ss:$112 sps:$4 sm:$0xff]   ;;  %v1719_v20 = vld [vmem:[%s2455_s0 + $0x8] ss:$112 sps:$4 sm:$0xff]   ;;  %v1722_v21 = vld [vmem:[%s2455_s0 + $0x394] ss:$112 sps:$4 sm:$0xff]  }
   0x8   :  { %916 = vmatpush1.bf16.msra.mxu1 %v1701_v8  ;;  %876 = vmatprep.subr.bf16.mxu0 %v1702_v9  ;;  %v1725_v22 = vld [vmem:[%s2455_s0 + $0x39c] ss:$112 sps:$4 sm:$0xff]   ;;  %v1993_v23 = vld [vmem:[%s2456_s1] sm:$0x7]  ;;  %v1723_v25 = vld [vmem:[%s2455_s0 + $0x398] ss:$112 sps:$4 sm:$0xff]  }
   0x9   :  { %917 = vmatprep.subr.bf16.mxu1 %v1704_v10  ;;  %v1720_v24 = vld [vmem:[%s2455_s0 + $0x390] ss:$112 sps:$4 sm:$0xff]   ;;  %v1728_v26 = vld [vmem:[%s2455_s0 + $0x2b4] ss:$112 sps:$4 sm:$0xff]   ;;  %v1731_v27 = vld [vmem:[%s2455_s0 + $0x2bc] ss:$112 sps:$4 sm:$0xff]  }
   0xa   :  { %v1726_v28 = vld [vmem:[%s2455_s0 + $0x2b0] ss:$112 sps:$4 sm:$0xff]   ;;  %v1729_v29 = vld [vmem:[%s2455_s0 + $0x2b8] ss:$112 sps:$4 sm:$0xff]   ;;  %v1734_v30 = vld [vmem:[%s2455_s0 + $0x1d4] ss:$112 sps:$4 sm:$0xff]  }
   0xb   :  { %877 = vmatpush1.bf16.msra.mxu0 %v1706_v11  ;;  %v1737_v31 = vld [vmem:[%s2455_s0 + $0x1dc] ss:$112 sps:$4 sm:$0xff]   ;;  %v1732_v32 = vld [vmem:[%s2455_s0 + $0x1d0] ss:$112 sps:$4 sm:$0xff]   ;;  %v1735_v33 = vld [vmem:[%s2455_s0 + $0x1d8] ss:$112 sps:$4 sm:$0xff]  }
   0xc   :  { %918 = vmatpush1.bf16.msra.mxu1 %v1707_v12  ;;  %878 = vmatprep.subr.bf16.mxu0 %v1708_v13  ;;  %v1740_v34 = vld [vmem:[%s2455_s0 + $0xf4] ss:$112 sps:$4 sm:$0xff]   ;;  %v1743_v35 = vld [vmem:[%s2455_s0 + $0xfc] ss:$112 sps:$4 sm:$0xff]   ;;  %v1738_v36 = vld [vmem:[%s2455_s0 + $0xf0] ss:$112 sps:$4 sm:$0xff]  }
   0xd   :  { %919 = vmatprep.subr.bf16.mxu1 %v1710_v14  ;;  %v1741_v37 = vld [vmem:[%s2455_s0 + $0xf8] ss:$112 sps:$4 sm:$0xff]   ;;  %v1746_v38 = vld [vmem:[%s2455_s0 + $0x14] ss:$112 sps:$4 sm:$0xff]   ;;  %v1749_v39 = vld [vmem:[%s2455_s0 + $0x1c] ss:$112 sps:$4 sm:$0xff]  }
   0xe   :  { %v1744_v40 = vld [vmem:[%s2455_s0 + $0x10] ss:$112 sps:$4 sm:$0xff]   ;;  %v1747_v41 = vld [vmem:[%s2455_s0 + $0x18] ss:$112 sps:$4 sm:$0xff]   ;;  %v1752_v42 = vld [vmem:[%s2455_s0 + $0x3a4] ss:$112 sps:$4 sm:$0xff]  }
   0xf   :  { %879 = vmatpush1.bf16.msra.mxu0 %v1712_v15  ;;  %v1755_v43 = vld [vmem:[%s2455_s0 + $0x3ac] ss:$112 sps:$4 sm:$0xff]   ;;  %v1750_v44 = vld [vmem:[%s2455_s0 + $0x3a0] ss:$112 sps:$4 sm:$0xff]   ;;  %v1753_v45 = vld [vmem:[%s2455_s0 + $0x3a8] ss:$112 sps:$4 sm:$0xff]  }
  0x10   :  { %920 = vmatpush1.bf16.msra.mxu1 %v1713_v16  ;;  %880 = vmatprep.subr.bf16.mxu0 %v1714_v17  ;;  %v1758_v46 = vld [vmem:[%s2455_s0 + $0x2c4] ss:$112 sps:$4 sm:$0xff]   ;;  %v1761_v47 = vld [vmem:[%s2455_s0 + $0x2cc] ss:$112 sps:$4 sm:$0xff]   ;;  %v1756_v48 = vld [vmem:[%s2455_s0 + $0x2c0] ss:$112 sps:$4 sm:$0xff]  }
  0x11   :  { %921 = vmatprep.subr.bf16.mxu1 %v1716_v18  ;;  %v1759_v49 = vld [vmem:[%s2455_s0 + $0x2c8] ss:$112 sps:$4 sm:$0xff]   ;;  %v1764_v50 = vld [vmem:[%s2455_s0 + $0x1e4] ss:$112 sps:$4 sm:$0xff]   ;;  %v1767_v51 = vld [vmem:[%s2455_s0 + $0x1ec] ss:$112 sps:$4 sm:$0xff]  }
  0x12   :  { %v1762_v52 = vld [vmem:[%s2455_s0 + $0x1e0] ss:$112 sps:$4 sm:$0xff]   ;;  %v1765_v53 = vld [vmem:[%s2455_s0 + $0x1e8] ss:$112 sps:$4 sm:$0xff]   ;;  %v1770_v54 = vld [vmem:[%s2455_s0 + $0x104] ss:$112 sps:$4 sm:$0xff]  }
  0x13   :  { %881 = vmatpush1.bf16.msra.mxu0 %v1718_v19  ;;  %v1773_v55 = vld [vmem:[%s2455_s0 + $0x10c] ss:$112 sps:$4 sm:$0xff]   ;;  %v1768_v56 = vld [vmem:[%s2455_s0 + $0x100] ss:$112 sps:$4 sm:$0xff]   ;;  %v1771_v57 = vld [vmem:[%s2455_s0 + $0x108] ss:$112 sps:$4 sm:$0xff]  }
  0x14   :  { %922 = vmatpush1.bf16.msra.mxu1 %v1719_v20  ;;  %954 = vmatprep.subr.bf16.mxu0 %v1722_v21  ;;  %v1776_v58 = vld [vmem:[%s2455_s0 + $0x24] ss:$112 sps:$4 sm:$0xff]   ;;  %v1779_v59 = vld [vmem:[%s2455_s0 + $0x2c] ss:$112 sps:$4 sm:$0xff]   ;;  %v1774_v60 = vld [vmem:[%s2455_s0 + $0x20] ss:$112 sps:$4 sm:$0xff]  }
  0x15   :  { %995 = vmatprep.subr.bf16.mxu1 %v1725_v22  ;;  %v1777_v61 = vld [vmem:[%s2455_s0 + $0x28] ss:$112 sps:$4 sm:$0xff]   ;;  %v1782_v62 = vld [vmem:[%s2455_s0 + $0x3b4] ss:$112 sps:$4 sm:$0xff]   ;;  %v1785_v63 = vld [vmem:[%s2455_s0 + $0x3bc] ss:$112 sps:$4 sm:$0xff]  }
  0x16   :  { %1666 = vmatmul.mubr.msk.bf16.vlgmr.msra.gmra.mxu0 %vm862_vm0, %v1993_v23  ;;  %v1780_v0 = vld [vmem:[%s2455_s0 + $0x3b0] ss:$112 sps:$4 sm:$0xff]   ;;  %v1783_v2 = vld [vmem:[%s2455_s0 + $0x3b8] ss:$112 sps:$4 sm:$0xff]   ;;  %v1788_v3 = vld [vmem:[%s2455_s0 + $0x2d4] ss:$112 sps:$4 sm:$0xff]  }
  0x17   :  { %1667 = vmatmul.mubr.msk.bf16.vlgmr.msra.gmra.mxu1 %vm862_vm0, %v1993_v23  ;;  %955 = vmatpush1.bf16.msra.mxu0 %v1720_v24  ;;  %v1791_v4 = vld [vmem:[%s2455_s0 + $0x2dc] ss:$112 sps:$4 sm:$0xff]   ;;  %v156_v5 = vld [vmem:[%s2457_s2] sm:$0x3f]  ;;  %v1789_v7 = vld [vmem:[%s2455_s0 + $0x2d8] ss:$112 sps:$4 sm:$0xff]  }
  0x18   :  { %996 = vmatpush1.bf16.msra.mxu1 %v1723_v25  ;;  %956 = vmatprep.subr.bf16.mxu0 %v1728_v26  ;;  %v1786_v6 = vld [vmem:[%s2455_s0 + $0x2d0] ss:$112 sps:$4 sm:$0xff]   ;;  %v1794_v8 = vld [vmem:[%s2455_s0 + $0x1f4] ss:$112 sps:$4 sm:$0xff]   ;;  %v1797_v9 = vld [vmem:[%s2455_s0 + $0x1fc] ss:$112 sps:$4 sm:$0xff]  }
  0x19   :  { %997 = vmatprep.subr.bf16.mxu1 %v1731_v27  ;;  %980 = vmatprep.mubr.bf16.mxu0 %v1900_v1  ;;  %v1792_v10 = vld [vmem:[%s2455_s0 + $0x1f0] ss:$112 sps:$4 sm:$0xff]   ;;  %v1795_v11 = vld [vmem:[%s2455_s0 + $0x1f8] ss:$112 sps:$4 sm:$0xff]   ;;  %v1800_v12 = vld [vmem:[%s2455_s0 + $0x114] ss:$112 sps:$4 sm:$0xff]  }
  0x1a   :  { %1021 = vmatprep.mubr.bf16.mxu1 %v1900_v1  ;;  %159 = vperm.xlu0 %1689, %v156_v5   ;;  %v1803_v13 = vld [vmem:[%s2455_s0 + $0x11c] ss:$112 sps:$4 sm:$0xff]   ;;  %v1798_v14 = vld [vmem:[%s2455_s0 + $0x110] ss:$112 sps:$4 sm:$0xff]   ;;  %v1801_v15 = vld [vmem:[%s2455_s0 + $0x118] ss:$112 sps:$4 sm:$0xff]  }
  0x1b   :  { %957 = vmatpush1.bf16.msra.mxu0 %v1726_v28  ;;  %v1806_v16 = vld [vmem:[%s2455_s0 + $0x34] ss:$112 sps:$4 sm:$0xff]   ;;  %v1809_v17 = vld [vmem:[%s2455_s0 + $0x3c] ss:$112 sps:$4 sm:$0xff]   ;;  %v1804_v18 = vld [vmem:[%s2455_s0 + $0x30] ss:$112 sps:$4 sm:$0xff]  }
  0x1c   :  { %998 = vmatpush1.bf16.msra.mxu1 %v1729_v29  ;;  %958 = vmatprep.subr.bf16.mxu0 %v1734_v30  ;;  %v1807_v19 = vld [vmem:[%s2455_s0 + $0x38] ss:$112 sps:$4 sm:$0xff]   ;;  %v1812_v20 = vld [vmem:[%s2455_s0 + $0x3c4] ss:$112 sps:$4 sm:$0xff]   ;;  %v1815_v21 = vld [vmem:[%s2455_s0 + $0x3cc] ss:$112 sps:$4 sm:$0xff]  }
  0x1d   :  { %999 = vmatprep.subr.bf16.mxu1 %v1737_v31  ;;  %v1810_v22 = vld [vmem:[%s2455_s0 + $0x3c0] ss:$112 sps:$4 sm:$0xff]   ;;  %v1813_v24 = vld [vmem:[%s2455_s0 + $0x3c8] ss:$112 sps:$4 sm:$0xff]   ;;  %v1818_v25 = vld [vmem:[%s2455_s0 + $0x2e4] ss:$112 sps:$4 sm:$0xff]  }
  0x1e   :  { %v1821_v26 = vld [vmem:[%s2455_s0 + $0x2ec] ss:$112 sps:$4 sm:$0xff]   ;;  %v1816_v27 = vld [vmem:[%s2455_s0 + $0x2e0] ss:$112 sps:$4 sm:$0xff]   ;;  %v1819_v28 = vld [vmem:[%s2455_s0 + $0x2e8] ss:$112 sps:$4 sm:$0xff]  }
  0x1f   :  { %959 = vmatpush1.bf16.msra.mxu0 %v1732_v32  ;;  %v1824_v29 = vld [vmem:[%s2455_s0 + $0x204] ss:$112 sps:$4 sm:$0xff]   ;;  %v1827_v30 = vld [vmem:[%s2455_s0 + $0x20c] ss:$112 sps:$4 sm:$0xff]   ;;  %v1822_v31 = vld [vmem:[%s2455_s0 + $0x200] ss:$112 sps:$4 sm:$0xff]  }
  0x20   :  { %1000 = vmatpush1.bf16.msra.mxu1 %v1735_v33  ;;  %960 = vmatprep.subr.bf16.mxu0 %v1740_v34  ;;  %v1825_v32 = vld [vmem:[%s2455_s0 + $0x208] ss:$112 sps:$4 sm:$0xff]   ;;  %v1830_v33 = vld [vmem:[%s2455_s0 + $0x124] ss:$112 sps:$4 sm:$0xff]   ;;  %v1833_v34 = vld [vmem:[%s2455_s0 + $0x12c] ss:$112 sps:$4 sm:$0xff]  }
  0x21   :  { %1001 = vmatprep.subr.bf16.mxu1 %v1743_v35  ;;  %v1828_v35 = vld [vmem:[%s2455_s0 + $0x120] ss:$112 sps:$4 sm:$0xff]   ;;  %v1879_v5 = vld [vmem:[%s2455_s0 + $0x308] ss:$112 sps:$4 sm:$0xff]  }
  0x23   :  { %961 = vmatpush1.bf16.msra.mxu0 %v1738_v36  ;;  %v1831_v36 = vld [vmem:[%s2455_s0 + $0x128] ss:$112 sps:$4 sm:$0xff]  }
  0x24   :  { %1002 = vmatpush1.bf16.msra.mxu1 %v1741_v37  ;;  %962 = vmatprep.subr.bf16.mxu0 %v1746_v38  ;;  %v1836_v37 = vld [vmem:[%s2455_s0 + $0x44] ss:$112 sps:$4 sm:$0xff]   ;;  %v1839_v38 = vld [vmem:[%s2455_s0 + $0x4c] ss:$112 sps:$4 sm:$0xff]  }
  0x25   :  { %1003 = vmatprep.subr.bf16.mxu1 %v1749_v39  ;;  %v1834_v39 = vld [vmem:[%s2455_s0 + $0x40] ss:$112 sps:$4 sm:$0xff]  }
  0x27   :  { %963 = vmatpush1.bf16.msra.mxu0 %v1744_v40  ;;  %v1837_v40 = vld [vmem:[%s2455_s0 + $0x48] ss:$112 sps:$4 sm:$0xff]  }
  0x28   :  { %1004 = vmatpush1.bf16.msra.mxu1 %v1747_v41  ;;  %1036 = vmatprep.subr.bf16.mxu0 %v1752_v42  ;;  %v1842_v41 = vld [vmem:[%s2455_s0 + $0x3d4] ss:$112 sps:$4 sm:$0xff]   ;;  %v1845_v42 = vld [vmem:[%s2455_s0 + $0x3dc] ss:$112 sps:$4 sm:$0xff]  }
  0x29   :  { %1077 = vmatprep.subr.bf16.mxu1 %v1755_v43  ;;  %v1840_v43 = vld [vmem:[%s2455_s0 + $0x3d0] ss:$112 sps:$4 sm:$0xff]  }
  0x2a   :  { %1668 = vmatmul.mubr.msk.bf16.vlgmr.msra.gmra.mxu0 %vm862_vm0, %v1993_v23 }
  0x2b   :  { %1669 = vmatmul.mubr.msk.bf16.vlgmr.msra.gmra.mxu1 %vm862_vm0, %v1993_v23  ;;  %1037 = vmatpush1.bf16.msra.mxu0 %v1750_v44  ;;  %v1843_v44 = vld [vmem:[%s2455_s0 + $0x3d8] ss:$112 sps:$4 sm:$0xff]  }
  0x2c   :  { %1078 = vmatpush1.bf16.msra.mxu1 %v1753_v45  ;;  %1038 = vmatprep.subr.bf16.mxu0 %v1758_v46  ;;  %v1848_v45 = vld [vmem:[%s2455_s0 + $0x2f4] ss:$112 sps:$4 sm:$0xff]   ;;  %v1851_v46 = vld [vmem:[%s2455_s0 + $0x2fc] ss:$112 sps:$4 sm:$0xff]  }
  0x2d   :  { %1079 = vmatprep.subr.bf16.mxu1 %v1761_v47  ;;  %1062 = vmatprep.mubr.bf16.mxu0 %v1900_v1  ;;  %v1846_v47 = vld [vmem:[%s2455_s0 + $0x2f0] ss:$112 sps:$4 sm:$0xff]  }
  0x2e   :  { %1103 = vmatprep.mubr.bf16.mxu1 %v1900_v1 }
  0x2f   :  { %1039 = vmatpush1.bf16.msra.mxu0 %v1756_v48  ;;  %v1849_v48 = vld [vmem:[%s2455_s0 + $0x2f8] ss:$112 sps:$4 sm:$0xff]  }
  0x30   :  { %1080 = vmatpush1.bf16.msra.mxu1 %v1759_v49  ;;  %1040 = vmatprep.subr.bf16.mxu0 %v1764_v50  ;;  %v1854_v49 = vld [vmem:[%s2455_s0 + $0x214] ss:$112 sps:$4 sm:$0xff]   ;;  %v1857_v50 = vld [vmem:[%s2455_s0 + $0x21c] ss:$112 sps:$4 sm:$0xff]  }
  0x31   :  { %1081 = vmatprep.subr.bf16.mxu1 %v1767_v51  ;;  %v1852_v51 = vld [vmem:[%s2455_s0 + $0x210] ss:$112 sps:$4 sm:$0xff]  }
  0x33   :  { %1041 = vmatpush1.bf16.msra.mxu0 %v1762_v52  ;;  %v1855_v52 = vld [vmem:[%s2455_s0 + $0x218] ss:$112 sps:$4 sm:$0xff]  }
  0x34   :  { %1082 = vmatpush1.bf16.msra.mxu1 %v1765_v53  ;;  %1042 = vmatprep.subr.bf16.mxu0 %v1770_v54  ;;  %v1860_v53 = vld [vmem:[%s2455_s0 + $0x134] ss:$112 sps:$4 sm:$0xff]   ;;  %v1863_v54 = vld [vmem:[%s2455_s0 + $0x13c] ss:$112 sps:$4 sm:$0xff]  }
  0x35   :  { %1083 = vmatprep.subr.bf16.mxu1 %v1773_v55  ;;  %v1858_v55 = vld [vmem:[%s2455_s0 + $0x130] ss:$112 sps:$4 sm:$0xff]  }
  0x37   :  { %1043 = vmatpush1.bf16.msra.mxu0 %v1768_v56  ;;  %v1861_v56 = vld [vmem:[%s2455_s0 + $0x138] ss:$112 sps:$4 sm:$0xff]  }
  0x38   :  { %1084 = vmatpush1.bf16.msra.mxu1 %v1771_v57  ;;  %1044 = vmatprep.subr.bf16.mxu0 %v1776_v58  ;;  %v1866_v57 = vld [vmem:[%s2455_s0 + $0x54] ss:$112 sps:$4 sm:$0xff]   ;;  %v1869_v58 = vld [vmem:[%s2455_s0 + $0x5c] ss:$112 sps:$4 sm:$0xff]  }
  0x39   :  { %1085 = vmatprep.subr.bf16.mxu1 %v1779_v59  ;;  %v1864_v59 = vld [vmem:[%s2455_s0 + $0x50] ss:$112 sps:$4 sm:$0xff]  }
  0x3b   :  { %1045 = vmatpush1.bf16.msra.mxu0 %v1774_v60  ;;  %v1867_v60 = vld [vmem:[%s2455_s0 + $0x58] ss:$112 sps:$4 sm:$0xff]  }
  0x3c   :  { %1086 = vmatpush1.bf16.msra.mxu1 %v1777_v61  ;;  %1118 = vmatprep.subr.bf16.mxu0 %v1782_v62  ;;  %v1872_v61 = vld [vmem:[%s2455_s0 + $0x3e4] ss:$112 sps:$4 sm:$0xff]   ;;  %v1875_v62 = vld [vmem:[%s2455_s0 + $0x3ec] ss:$112 sps:$4 sm:$0xff]  }
  0x3d   :  { %1159 = vmatprep.subr.bf16.mxu1 %v1785_v63  ;;  %v1870_v63 = vld [vmem:[%s2455_s0 + $0x3e0] ss:$112 sps:$4 sm:$0xff]  }
  0x3e   :  { %1670 = vmatmul.mubr.msk.bf16.vlgmr.msra.gmra.mxu0 %vm862_vm0, %v1993_v23 }
  0x3f   :  { %1671 = vmatmul.mubr.msk.bf16.vlgmr.msra.gmra.mxu1 %vm862_vm0, %v1993_v23  ;;  %1119 = vmatpush1.bf16.msra.mxu0 %v1780_v0  ;;  %v1873_v0 = vld [vmem:[%s2455_s0 + $0x3e8] ss:$112 sps:$4 sm:$0xff]  }
  0x40   :  { %1160 = vmatpush1.bf16.msra.mxu1 %v1783_v2  ;;  %1120 = vmatprep.subr.bf16.mxu0 %v1788_v3  ;;  %v1878_v2 = vld [vmem:[%s2455_s0 + $0x304] ss:$112 sps:$4 sm:$0xff]   ;;  %v1881_v3 = vld [vmem:[%s2455_s0 + $0x30c] ss:$112 sps:$4 sm:$0xff]  }
  0x41   :  { %1161 = vmatprep.subr.bf16.mxu1 %v1791_v4  ;;  %1144 = vmatprep.mubr.bf16.mxu0 %v1900_v1  ;;  %v1876_v4 = vld [vmem:[%s2455_s0 + $0x300] ss:$112 sps:$4 sm:$0xff]  }
  0x42   :  { %1185 = vmatprep.mubr.bf16.mxu1 %v1900_v1 }
  0x43   :  { %1121 = vmatpush1.bf16.msra.mxu0 %v1786_v6  ;;  %v1884_v6 = vld [vmem:[%s2455_s0 + $0x224] ss:$112 sps:$4 sm:$0xff]  }
  0x44   :  { %1162 = vmatpush1.bf16.msra.mxu1 %v1789_v7  ;;  %1122 = vmatprep.subr.bf16.mxu0 %v1794_v8  ;;  %v1887_v7 = vld [vmem:[%s2455_s0 + $0x22c] ss:$112 sps:$4 sm:$0xff]   ;;  %v1882_v8 = vld [vmem:[%s2455_s0 + $0x220] ss:$112 sps:$4 sm:$0xff]  }
  0x45   :  { %1163 = vmatprep.subr.bf16.mxu1 %v1797_v9  ;;  %v1885_v9 = vld [vmem:[%s2455_s0 + $0x228] ss:$112 sps:$4 sm:$0xff]  }
  0x47   :  { %1123 = vmatpush1.bf16.msra.mxu0 %v1792_v10  ;;  %v1890_v10 = vld [vmem:[%s2455_s0 + $0x144] ss:$112 sps:$4 sm:$0xff]  }
  0x48   :  { %1164 = vmatpush1.bf16.msra.mxu1 %v1795_v11  ;;  %1124 = vmatprep.subr.bf16.mxu0 %v1800_v12  ;;  %v1888_v11 = vld [vmem:[%s2455_s0 + $0x140] ss:$112 sps:$4 sm:$0xff]   ;;  %v1891_v12 = vld [vmem:[%s2455_s0 + $0x148] ss:$112 sps:$4 sm:$0xff]  }
  0x49   :  { %1165 = vmatprep.subr.bf16.mxu1 %v1803_v13  ;;  %v1896_v13 = vld [vmem:[%s2455_s0 + $0x64] ss:$112 sps:$4 sm:$0xff]  }
  0x4b   :  { %1125 = vmatpush1.bf16.msra.mxu0 %v1798_v14  ;;  %v1899_v14 = vld [vmem:[%s2455_s0 + $0x6c] ss:$112 sps:$4 sm:$0xff]  }
  0x4c   :  { %1166 = vmatpush1.bf16.msra.mxu1 %v1801_v15  ;;  %1126 = vmatprep.subr.bf16.mxu0 %v1806_v16  ;;  %v1894_v15 = vld [vmem:[%s2455_s0 + $0x60] ss:$112 sps:$4 sm:$0xff]   ;;  %v1897_v16 = vld [vmem:[%s2455_s0 + $0x68] ss:$112 sps:$4 sm:$0xff]  }
  0x4d   :  { %1167 = vmatprep.subr.bf16.mxu1 %v1809_v17 }
  0x4f   :  { %1127 = vmatpush1.bf16.msra.mxu0 %v1804_v18 }
  0x50   :  { %1168 = vmatpush1.bf16.msra.mxu1 %v1807_v19  ;;  %1200 = vmatprep.subr.bf16.mxu0 %v1812_v20 }
  0x51   :  { %1241 = vmatprep.subr.bf16.mxu1 %v1815_v21 }
  0x52   :  { %1672 = vmatmul.mubr.msk.bf16.vlgmr.msra.gmra.mxu0 %vm862_vm0, %v1993_v23 }
  0x53   :  { %1673 = vmatmul.mubr.msk.bf16.vlgmr.msra.gmra.mxu1 %vm862_vm0, %v1993_v23  ;;  %1201 = vmatpush1.bf16.msra.mxu0 %v1810_v22 }
  0x54   :  { %1242 = vmatpush1.bf16.msra.mxu1 %v1813_v24  ;;  %1202 = vmatprep.subr.bf16.mxu0 %v1818_v25 }
  0x55   :  { %1243 = vmatprep.subr.bf16.mxu1 %v1821_v26  ;;  %1226 = vmatprep.mubr.bf16.mxu0 %v1900_v1 }
  0x56   :  { %1267 = vmatprep.mubr.bf16.mxu1 %v1900_v1 }
  0x57   :  { %1203 = vmatpush1.bf16.msra.mxu0 %v1816_v27 }
  0x58   :  { %1244 = vmatpush1.bf16.msra.mxu1 %v1819_v28  ;;  %1204 = vmatprep.subr.bf16.mxu0 %v1824_v29 }
  0x59   :  { %1245 = vmatprep.subr.bf16.mxu1 %v1827_v30 }
  0x5b   :  { %1205 = vmatpush1.bf16.msra.mxu0 %v1822_v31 }
  0x5c   :  { %1246 = vmatpush1.bf16.msra.mxu1 %v1825_v32  ;;  %1206 = vmatprep.subr.bf16.mxu0 %v1830_v33 }
  0x5d   :  { %1247 = vmatprep.subr.bf16.mxu1 %v1833_v34 }
  0x5f   :  { %1207 = vmatpush1.bf16.msra.mxu0 %v1828_v35 }
  0x60   :  { %1248 = vmatpush1.bf16.msra.mxu1 %v1831_v36  ;;  %1208 = vmatprep.subr.bf16.mxu0 %v1836_v37 }
  0x61   :  { %1249 = vmatprep.subr.bf16.mxu1 %v1839_v38 }
  0x63   :  { %1209 = vmatpush1.bf16.msra.mxu0 %v1834_v39 }
  0x64   :  { %1250 = vmatpush1.bf16.msra.mxu1 %v1837_v40  ;;  %1282 = vmatprep.subr.bf16.mxu0 %v1842_v41 }
  0x65   :  { %1323 = vmatprep.subr.bf16.mxu1 %v1845_v42 }
  0x66   :  { %1674 = vmatmul.mubr.msk.bf16.vlgmr.msra.gmra.mxu0 %vm862_vm0, %v1993_v23 }
  0x67   :  { %1675 = vmatmul.mubr.msk.bf16.vlgmr.msra.gmra.mxu1 %vm862_vm0, %v1993_v23  ;;  %1283 = vmatpush1.bf16.msra.mxu0 %v1840_v43 }
  0x68   :  { %1324 = vmatpush1.bf16.msra.mxu1 %v1843_v44  ;;  %1284 = vmatprep.subr.bf16.mxu0 %v1848_v45 }
  0x69   :  { %1325 = vmatprep.subr.bf16.mxu1 %v1851_v46  ;;  %1308 = vmatprep.mubr.bf16.mxu0 %v1900_v1 }
  0x6a   :  { %1349 = vmatprep.mubr.bf16.mxu1 %v1900_v1 }
  0x6b   :  { %1285 = vmatpush1.bf16.msra.mxu0 %v1846_v47 }
  0x6c   :  { %1326 = vmatpush1.bf16.msra.mxu1 %v1849_v48  ;;  %1286 = vmatprep.subr.bf16.mxu0 %v1854_v49 }
  0x6d   :  { %1327 = vmatprep.subr.bf16.mxu1 %v1857_v50 }
  0x6f   :  { %1287 = vmatpush1.bf16.msra.mxu0 %v1852_v51 }
  0x70   :  { %1328 = vmatpush1.bf16.msra.mxu1 %v1855_v52  ;;  %1288 = vmatprep.subr.bf16.mxu0 %v1860_v53 }
  0x71   :  { %1329 = vmatprep.subr.bf16.mxu1 %v1863_v54 }
  0x73   :  { %1289 = vmatpush1.bf16.msra.mxu0 %v1858_v55 }
  0x74   :  { %1330 = vmatpush1.bf16.msra.mxu1 %v1861_v56  ;;  %1290 = vmatprep.subr.bf16.mxu0 %v1866_v57 }
  0x75   :  { %1331 = vmatprep.subr.bf16.mxu1 %v1869_v58 }
  0x77   :  { %1291 = vmatpush1.bf16.msra.mxu0 %v1864_v59 }
  0x78   :  { %1332 = vmatpush1.bf16.msra.mxu1 %v1867_v60  ;;  %1364 = vmatprep.subr.bf16.mxu0 %v1872_v61 }
  0x79   :  { %1405 = vmatprep.subr.bf16.mxu1 %v1875_v62 }
  0x7a   :  { %1676 = vmatmul.mubr.msk.bf16.vlgmr.msra.gmra.mxu0 %vm862_vm0, %v1993_v23 }
  0x7b   :  { %1677 = vmatmul.mubr.msk.bf16.vlgmr.msra.gmra.mxu1 %vm862_vm0, %v1993_v23  ;;  %1365 = vmatpush1.bf16.msra.mxu0 %v1870_v63 }
  0x7c   :  { %1406 = vmatpush1.bf16.msra.mxu1 %v1873_v0  ;;  %1366 = vmatprep.subr.bf16.mxu0 %v1878_v2 }
  0x7d   :  { %1407 = vmatprep.subr.bf16.mxu1 %v1881_v3  ;;  %1390 = vmatprep.mubr.bf16.mxu0 %v1900_v1 }
  0x7e   :  { %1431 = vmatprep.mubr.bf16.mxu1 %v1900_v1  ;;  %v1893_v1 = vld [vmem:[%s2455_s0 + $0x14c] ss:$112 sps:$4 sm:$0xff]  }
  0x7f   :  { %1367 = vmatpush1.bf16.msra.mxu0 %v1876_v4 }
  0x80   :  { %1408 = vmatpush1.bf16.msra.mxu1 %v1879_v5  ;;  %1368 = vmatprep.subr.bf16.mxu0 %v1884_v6 }
  0x81   :  { %1409 = vmatprep.subr.bf16.mxu1 %v1887_v7 }
  0x83   :  { %1369 = vmatpush1.bf16.msra.mxu0 %v1882_v8 }
  0x84   :  { %1410 = vmatpush1.bf16.msra.mxu1 %v1885_v9  ;;  %1370 = vmatprep.subr.bf16.mxu0 %v1890_v10 }
  0x85   :  { %1411 = vmatprep.subr.bf16.mxu1 %v1893_v1 }
  0x87   :  { %1371 = vmatpush1.bf16.msra.mxu0 %v1888_v11 }
  0x88   :  { %1412 = vmatpush1.bf16.msra.mxu1 %v1891_v12  ;;  %1372 = vmatprep.subr.bf16.mxu0 %v1896_v13 }
  0x89   :  { %1413 = vmatprep.subr.bf16.mxu1 %v1899_v14 }
  0x8b   :  { %1373 = vmatpush1.bf16.msra.mxu0 %v1894_v15 }
  0x8c   :  { %1414 = vmatpush1.bf16.msra.mxu1 %v1897_v16 }
  0x8e   :  { %1678 = vmatmul.mubr.msk.bf16.vlgmr.msra.gmra.mxu0 %vm862_vm0, %v1993_v23 }
  0x8f   :  { %1679 = vmatmul.mubr.msk.bf16.vlgmr.msra.gmra.mxu1 %vm862_vm0, %v1993_v23 }
  0x95   :  { %v2394_v26 = vpop.permute.xlu0 %159 }
  0xd6   :  { %v900_v17 = vpop.f32.mrf.mxu0 }
  0xd7   :  { %v941_v18 = vpop.f32.mrf.mxu1  ;;  %v901_v29 = vadd.f32 %v900_v17, %v2394_v26 }
  0xd8   :  { %v2392_v19 = vpop.f32.mrf.mxu0  ;;  %v942_v42 = vadd.f32 %v941_v18, %v2394_v26 }
  0xd9   :  { %v943_v20 = vpop.f32.mrf.mxu1  ;;  %v1440_v34 = vmax.f32 %v901_v29, 0.0  ;;  %v903_v18 = vadd.f32 %v2392_v19, %v2394_v26 }
  0xda   :  { %v904_v21 = vpop.f32.mrf.mxu0  ;;  %v944_v39 = vadd.f32 %v943_v20, %v2394_v26  ;;  %v1442_v51 = vmax.f32 %v942_v42, 0.0 }
  0xdb   :  { %v945_v22 = vpop.f32.mrf.mxu1 }
  0xdc   :  { %v905_v24 = vpop.f32.mrf.mxu0  ;;  %v1443_v47 = vmax.f32 %v944_v39, 0.0 }
  0xdd   :  { %v946_v25 = vpop.f32.mrf.mxu1 }
  0xea   :  { %v982_v27 = vpop.f32.mrf.mxu0 }
  0xeb   :  { %v2396_v28 = vpop.f32.mrf.mxu1  ;;  %v983_v43 = vadd.f32 %v982_v27, %v2394_v26 }
  0xec   :  { %v2399_v30 = vpop.f32.mrf.mxu0 }
  0xed   :  { %v1025_v31 = vpop.f32.mrf.mxu1  ;;  %v1444_v54 = vmax.f32 %v983_v43, 0.0 }
  0xee   :  { %v1026_v23 = vadd.f32 %v1025_v31, %v2394_v26  ;;  %v986_v32 = vpop.f32.mrf.mxu0 }
  0xef   :  { %v1027_v33 = vpop.f32.mrf.mxu1 }
  0xf0   :  { %v1447_v35 = vmax.f32 %v1026_v23, 0.0  ;;  %v987_v36 = vpop.f32.mrf.mxu0  ;;  %v1441_v33 = vmax.f32 %v903_v18, 0.0 }
  0xf1   :  { %v1028_v37 = vpop.f32.mrf.mxu1 }
  0xf2   :  { %v2402_v38 = vmax.f32 %v1440_v34, %v1447_v35 }
  0xfe   :  { %v1064_v40 = vpop.f32.mrf.mxu0 }
  0xff   :  { %v1105_v41 = vpop.f32.mrf.mxu1  ;;  %v1065_v14 = vadd.f32 %v1064_v40, %v2394_v26 }
 0x100   :  { %v1106_v44 = vadd.f32 %v1105_v41, %v2394_v26  ;;  %v1066_v45 = vpop.f32.mrf.mxu0 }
 0x101   :  { %v1107_v46 = vpop.f32.mrf.mxu1  ;;  %v1067_v49 = vadd.f32 %v1066_v45, %v2394_v26  ;;  %v1448_v25 = vmax.f32 %v1065_v14, 0.0 }
 0x102   :  { %v1450_v48 = vmax.f32 %v1106_v44, 0.0  ;;  %v1108_v50 = vadd.f32 %v1107_v46, %v2394_v26  ;;  %v1068_v52 = vpop.f32.mrf.mxu0 }
 0x103   :  { %v1109_v53 = vpop.f32.mrf.mxu1  ;;  %v1449_v56 = vmax.f32 %v1067_v49, 0.0  ;;  %v1469_v19 = vmax.f32 %v1441_v33, %v1448_v25 }
 0x104   :  { %v2410_v55 = vmax.f32 %v1443_v47, %v1450_v48  ;;  %v1451_v57 = vmax.f32 %v1108_v50, 0.0  ;;  %v1069_v58 = vpop.f32.mrf.mxu0 }
 0x105   :  { %v1110_v59 = vpop.f32.mrf.mxu1  ;;  %v2412_v60 = vmax.f32 %v1442_v51, %v1449_v56  ;;  %v985_v51 = vadd.f32 %v2399_v30, %v2394_v26 }
 0x106   :  { %v2414_v61 = vmax.f32 %v1444_v54, %v1451_v57 }
 0x112   :  { %v1146_v62 = vpop.f32.mrf.mxu0 }
 0x113   :  { %v1187_v63 = vpop.f32.mrf.mxu1  ;;  %v1147_v46 = vadd.f32 %v1146_v62, %v2394_v26 }
 0x114   :  { %v1148_v0 = vpop.f32.mrf.mxu0  ;;  %v1188_v20 = vadd.f32 %v1187_v63, %v2394_v26 }
 0x115   :  { %v1189_v2 = vpop.f32.mrf.mxu1  ;;  %v1149_v47 = vadd.f32 %v1148_v0, %v2394_v26  ;;  %v1452_v58 = vmax.f32 %v1147_v46, 0.0 }
 0x116   :  { %v1150_v3 = vpop.f32.mrf.mxu0  ;;  %v1190_v15 = vadd.f32 %v1189_v2, %v2394_v26  ;;  %v1454_v34 = vmax.f32 %v1188_v20, 0.0 }
 0x117   :  { %v1191_v4 = vpop.f32.mrf.mxu1  ;;  %v1453_v63 = vmax.f32 %v1149_v47, 0.0 }
 0x118   :  { %v1151_v5 = vpop.f32.mrf.mxu0  ;;  %v1455_v27 = vmax.f32 %v1190_v15, 0.0 }
 0x119   :  { %v1192_v6 = vpop.f32.mrf.mxu1 }
 0x126   :  { %v1228_v7 = vpop.f32.mrf.mxu0 }
 0x127   :  { %v1269_v8 = vpop.f32.mrf.mxu1  ;;  %v1229_v45 = vadd.f32 %v1228_v7, %v2394_v26 }
 0x128   :  { %v1230_v9 = vpop.f32.mrf.mxu0  ;;  %v1270_v53 = vadd.f32 %v1269_v8, %v2394_v26 }
 0x129   :  { %v1271_v10 = vpop.f32.mrf.mxu1  ;;  %v1231_v48 = vadd.f32 %v1230_v9, %v2394_v26  ;;  %v1456_v52 = vmax.f32 %v1229_v45, 0.0  ;;  %v1445_v9 = vmax.f32 %v985_v51, 0.0 }
 0x12a   :  { %v1232_v1 = vpop.f32.mrf.mxu0  ;;  %v1272_v49 = vadd.f32 %v1271_v10, %v2394_v26  ;;  %v1458_v10 = vmax.f32 %v1270_v53, 0.0 }
 0x12b   :  { %v1273_v11 = vpop.f32.mrf.mxu1  ;;  %v1457_v0 = vmax.f32 %v1231_v48, 0.0 }
 0x12c   :  { %v1233_v12 = vpop.f32.mrf.mxu0  ;;  %v1459_v2 = vmax.f32 %v1272_v49, 0.0 }
 0x12d   :  { %v1274_v13 = vpop.f32.mrf.mxu1 }
 0x13a   :  { %v1310_v16 = vpop.f32.mrf.mxu0 }
 0x13b   :  { %v1351_v17 = vpop.f32.mrf.mxu1  ;;  %v1311_v54 = vadd.f32 %v1310_v16, %v2394_v26 }
 0x13c   :  { %v1352_v21 = vadd.f32 %v1351_v17, %v2394_v26  ;;  %v1312_v22 = vpop.f32.mrf.mxu0  ;;  %v1473_v17 = vmax.f32 %v1445_v9, %v1452_v58 }
 0x13d   :  { %v1353_v24 = vpop.f32.mrf.mxu1  ;;  %v1313_v31 = vadd.f32 %v1312_v22, %v2394_v26  ;;  %v1460_v1 = vmax.f32 %v1311_v54, 0.0 }
 0x13e   :  { %v1462_v29 = vmax.f32 %v1352_v21, 0.0  ;;  %v1314_v23 = vpop.f32.mrf.mxu0  ;;  %v1354_v44 = vadd.f32 %v1353_v24, %v2394_v26 }
 0x13f   :  { %v1355_v32 = vpop.f32.mrf.mxu1  ;;  %v1461_v36 = vmax.f32 %v1313_v31, 0.0 }
 0x140   :  { %v1476_v35 = vmax.f32 %v1455_v27, %v1462_v29  ;;  %v1315_v37 = vpop.f32.mrf.mxu0  ;;  %v1463_v50 = vmax.f32 %v1354_v44, 0.0 }
 0x141   :  { %v1356_v39 = vpop.f32.mrf.mxu1  ;;  %v1475_v40 = vmax.f32 %v1454_v34, %v1461_v36 }
 0x142   :  { %v1483_v41 = vmax.f32 %v1469_v19, %v1476_v35  ;;  %v1477_v3 = vmax.f32 %v1456_v52, %v1463_v50 }
 0x143   :  { %v1482_v42 = vmax.f32 %v2402_v38, %v1475_v40  ;;  %v1024_v38 = vadd.f32 %v2396_v28, %v2394_v26 }
 0x144   :  { %v1484_v22 = vmax.f32 %v2412_v60, %v1477_v3 }
 0x145   :  { %v1684_v43 = vpack.c.bf16 %v1483_v41, %v1482_v42  ;;  %v1446_v8 = vmax.f32 %v1024_v38, 0.0 }
 0x147   :  { %1518 = vst [vmem:[%s2458_s3] sm:$0x77] %v1684_v43  ;;  %v1474_v18 = vmax.f32 %v1446_v8, %v1453_v63 }
 0x14e   :  { %v1392_v56 = vpop.f32.mrf.mxu0 }
 0x14f   :  { %v1433_v57 = vpop.f32.mrf.mxu1  ;;  %v1393_v59 = vadd.f32 %v1392_v56, %v2394_v26 }
 0x150   :  { %v1434_v62 = vadd.f32 %v1433_v57, %v2394_v26  ;;  %v1394_v28 = vpop.f32.mrf.mxu0 }
 0x151   :  { %v1435_v4 = vpop.f32.mrf.mxu1  ;;  %v1464_v5 = vmax.f32 %v1393_v59, 0.0  ;;  %v1395_v6 = vadd.f32 %v1394_v28, %v2394_v26 }
 0x152   :  { %v1466_v30 = vmax.f32 %v1434_v62, 0.0  ;;  %v1436_v7 = vadd.f32 %v1435_v4, %v2394_v26  ;;  %v1396_v11 = vpop.f32.mrf.mxu0 }
 0x153   :  { %v1437_v12 = vpop.f32.mrf.mxu1  ;;  %v1478_v13 = vmax.f32 %v1457_v0, %v1464_v5  ;;  %v1465_v15 = vmax.f32 %v1395_v6, 0.0 }
 0x154   :  { %v1480_v14 = vmax.f32 %v1459_v2, %v1466_v30  ;;  %v1467_v16 = vmax.f32 %v1436_v7, 0.0  ;;  %v1397_v20 = vpop.f32.mrf.mxu0 }
 0x155   :  { %v1438_v21 = vpop.f32.mrf.mxu1  ;;  %v1485_v24 = vmax.f32 %v2410_v55, %v1478_v13  ;;  %v1479_v25 = vmax.f32 %v1458_v10, %v1465_v15 }
 0x156   :  { %v1481_v26 = vmax.f32 %v1460_v1, %v1467_v16  ;;  %v1487_v29 = vmax.f32 %v1473_v17, %v1480_v14 }
 0x157   :  { %v1685_v27 = vpack.c.bf16 %v1485_v24, %v1484_v22  ;;  %v1486_v31 = vmax.f32 %v2414_v61, %v1479_v25 }
 0x158   :  { %v1488_v23 = vmax.f32 %v1474_v18, %v1481_v26 }
 0x159   :  { %1519 = vst [vmem:[%s2458_s3 + $0x8] sm:$0x77] %v1685_v27  ;;  %v1686_v32 = vpack.c.bf16 %v1487_v29, %v1486_v31 }
 0x15a   :  { %v1687_v33 = vpack.c.bf16 %v1488_v23, %v1488_v23 }
 0x15b   :  { %1520 = vst [vmem:[%s2458_s3 + $0x10] sm:$0x77] %v1686_v32 }
 0x15c   :  { %1521 = vst [vmem:[%s2458_s3 + $0x18] sm:$0x7] %v1687_v33 }

// kernel: forward_train.3
= control target key start
LH: loop header
LB: loop body
LE: loop exit
PB: predicated region body
PF: predicated region fallthrough
CT: control target
= control target key end

     0   :  { %v5894_v0 = vmov 0   ;;  %vm406_vm0 = vcmask 261120   ;;  %vm5896_vm1 = vmmov 0   ;;  %vm2858_vm2 = vcmask 130048   ;;  %s7454_s1 = inlined_call_operand.vmem [shape: bf16[160,16], index: 1, kind: input, shape index: {}]   ;;  %s7455_s0 = inlined_call_operand.vmem [shape: bf16[4,400,160], index: 0, kind: input, shape index: {}]   ;;  %s7456_s3 = inlined_call_operand.vmem [shape: bf16[25,16,120], index: 3, kind: input, shape index: {}]   ;;  %s7457_s2 = inlined_call_operand.vmem [shape: f32[1,16], index: 2, kind: input, shape index: {}]   ;;  %s7458_s4 = inlined_call_operand.vmem [shape: f32[1,120], index: 4, kind: input, shape index: {}]   ;;  %s7459_s5 = inlined_call_operand.vmem [shape: bf16[120,84], index: 5, kind: input, shape index: {}]   ;;  %s7460_s7 = inlined_call_operand.vmem [shape: bf16[84,10], index: 7, kind: input, shape index: {}]   ;;  %s7461_s6 = inlined_call_operand.vmem [shape: f32[1,84], index: 6, kind: input, shape index: {}]   ;;  %s7462_s11 = inlined_call_operand.vmem [shape: f32[2,16], index: 11, kind: input, shape index: {}]   ;;  %s7463_s8 = inlined_call_operand.vmem [shape: f32[1,10], index: 8, kind: input, shape index: {}]   ;;  %s7464_s12 = inlined_call_operand.vmem [shape: f32[16,10], index: 12, kind: output, shape index: {0}]   ;;  %s7465_s9 = inlined_call_operand.vmem [shape: s32[16,1], index: 9, kind: input, shape index: {}]   ;;  %s7466_s10 = inlined_call_operand.vmem [shape: f32[2,1], index: 10, kind: input, shape index: {}]   ;;  %s7467_s13 = inlined_call_operand.vmem [shape: f32[1,8], index: 13, kind: output, shape index: {1}]  }
   0x1   :  { %482 = vmatprep.subr.bf16.mxu0 %v5894_v0  ;;  %1116 = vmatprep.subr.bf16.mxu1 %v5894_v0  ;;  %v5972_v1 = vld [vmem:[%s7454_s1 + $0x38] sm:$0xff]   ;;  %v5981_v2 = vld [vmem:[%s7454_s1 + $0x30] sm:$0xff]   ;;  %v5990_v3 = vld [vmem:[%s7454_s1 + $0x28] sm:$0xff]   ;;  %vm4299_vm3 = vcmask 1043456   ;;  %vm4402_vm4 = vcmask 1041408   ;;  %vm4295_vm5 = vcmask 982016  }
   0x2   :  { %5531 = vset.pattern.permute.xlu0 %v5894_v0  ;;  %5532 = vset.pattern.permute.xlu1 %v5894_v0  ;;  %v5999_v4 = vld [vmem:[%s7454_s1 + $0x20] sm:$0xff]   ;;  %v5548_v6 = vld [vmem:[%s7455_s0 + $0x194] ss:$8 sps:$4 sm:$0xff]   ;;  %v6034_v9 = vld [vmem:[%s7454_s1 + $0x8] sm:$0xff]   ;;  %vm4398_vm6 = vcmask 687104   ;;  %vm4447_vm7 = vcmask 80896  }
   0x3   :  { %483 = vmatpush1.bf16.msra.mxu0 %v5972_v1  ;;  %1117 = vmatpush1.bf16.msra.mxu1 %v5972_v1  ;;  %v5545_v5 = vld [vmem:[%s7455_s0 + $0x4] ss:$8 sps:$4 sm:$0xff]   ;;  %v6015_v7 = vld [vmem:[%s7454_s1 + $0x18] sm:$0xff]   ;;  %v6025_v8 = vld [vmem:[%s7454_s1 + $0x10] sm:$0xff]   ;;  %vm4623_vm8 = vcmask 680960   ;;  %vm4643_vm13 = vcmask 1024  }
   0x4   :  { %484 = vmatprep.subr.bf16.mxu0 %v5894_v0  ;;  %1118 = vmatprep.subr.bf16.mxu1 %v5894_v0  ;;  %v6043_v10 = vld [vmem:[%s7454_s1] sm:$0xff]   ;;  %v6052_v11 = vld [vmem:[%s7454_s1 + $0x48] sm:$0xff]   ;;  %v5546_v14 = vld [vmem:[%s7455_s0 + $0x190] ss:$8 sps:$4 sm:$0xff]  }
   0x5   :  { %4744 = vmatprep.mubr.msk.bf16.mxu0 %vm406_vm0, %v5545_v5  ;;  %4869 = vmatprep.mubr.msk.bf16.mxu1 %vm406_vm0, %v5548_v6  ;;  %v6061_v12 = vld [vmem:[%s7454_s1 + $0x40] sm:$0xff]   ;;  %v5549_v15 = vld [vmem:[%s7455_s0 + $0x14] ss:$8 sps:$4 sm:$0xff]   ;;  %v5553_v17 = vld [vmem:[%s7455_s0 + $0x10] ss:$8 sps:$4 sm:$0xff]  }
   0x6   :  { %v5543_v13 = vld [vmem:[%s7455_s0] ss:$8 sps:$4 sm:$0xff]   ;;  %v5551_v16 = vld [vmem:[%s7455_s0 + $0x1a4] ss:$8 sps:$4 sm:$0xff]   ;;  %v5557_v20 = vld [vmem:[%s7455_s0 + $0x1b4] ss:$8 sps:$4 sm:$0xff]  }
   0x7   :  { %485 = vmatpush1.bf16.msra.mxu0 %v5981_v2  ;;  %1119 = vmatpush1.bf16.msra.mxu1 %v5981_v2  ;;  %v5554_v18 = vld [vmem:[%s7455_s0 + $0x1a0] ss:$8 sps:$4 sm:$0xff]   ;;  %v5555_v19 = vld [vmem:[%s7455_s0 + $0x24] ss:$8 sps:$4 sm:$0xff]   ;;  %v5560_v22 = vld [vmem:[%s7455_s0 + $0x1b0] ss:$8 sps:$4 sm:$0xff]  }
   0x8   :  { %486 = vmatprep.subr.bf16.mxu0 %v5894_v0  ;;  %1120 = vmatprep.subr.bf16.mxu1 %v5894_v0  ;;  %v5559_v21 = vld [vmem:[%s7455_s0 + $0x20] ss:$8 sps:$4 sm:$0xff]   ;;  %v5561_v23 = vld [vmem:[%s7455_s0 + $0x34] ss:$8 sps:$4 sm:$0xff]   ;;  %v5563_v24 = vld [vmem:[%s7455_s0 + $0x1c4] ss:$8 sps:$4 sm:$0xff]  }
   0x9   :  { %v5565_v25 = vld [vmem:[%s7455_s0 + $0x30] ss:$8 sps:$4 sm:$0xff]   ;;  %v5566_v26 = vld [vmem:[%s7455_s0 + $0x1c0] ss:$8 sps:$4 sm:$0xff]   ;;  %v5567_v27 = vld [vmem:[%s7455_s0 + $0x44] ss:$8 sps:$4 sm:$0xff]  }
   0xa   :  { %v5569_v28 = vld [vmem:[%s7455_s0 + $0x1d4] ss:$8 sps:$4 sm:$0xff]   ;;  %v5571_v29 = vld [vmem:[%s7455_s0 + $0x40] ss:$8 sps:$4 sm:$0xff]   ;;  %v5572_v30 = vld [vmem:[%s7455_s0 + $0x1d0] ss:$8 sps:$4 sm:$0xff]  }
   0xb   :  { %487 = vmatpush1.bf16.msra.mxu0 %v5990_v3  ;;  %1121 = vmatpush1.bf16.msra.mxu1 %v5990_v3  ;;  %v5573_v31 = vld [vmem:[%s7455_s0 + $0x54] ss:$8 sps:$4 sm:$0xff]   ;;  %v5575_v32 = vld [vmem:[%s7455_s0 + $0x1e4] ss:$8 sps:$4 sm:$0xff]   ;;  %v5577_v33 = vld [vmem:[%s7455_s0 + $0x50] ss:$8 sps:$4 sm:$0xff]  }
   0xc   :  { %488 = vmatprep.subr.bf16.mxu0 %v5894_v0  ;;  %1122 = vmatprep.subr.bf16.mxu1 %v5894_v0  ;;  %v5578_v34 = vld [vmem:[%s7455_s0 + $0x1e0] ss:$8 sps:$4 sm:$0xff]   ;;  %v5579_v35 = vld [vmem:[%s7455_s0 + $0x64] ss:$8 sps:$4 sm:$0xff]   ;;  %v5581_v36 = vld [vmem:[%s7455_s0 + $0x1f4] ss:$8 sps:$4 sm:$0xff]  }
   0xd   :  { %v5583_v37 = vld [vmem:[%s7455_s0 + $0x60] ss:$8 sps:$4 sm:$0xff]   ;;  %v5584_v38 = vld [vmem:[%s7455_s0 + $0x1f0] ss:$8 sps:$4 sm:$0xff]   ;;  %v5585_v39 = vld [vmem:[%s7455_s0 + $0x74] ss:$8 sps:$4 sm:$0xff]  }
   0xe   :  { %v5587_v40 = vld [vmem:[%s7455_s0 + $0x204] ss:$8 sps:$4 sm:$0xff]   ;;  %v5589_v41 = vld [vmem:[%s7455_s0 + $0x70] ss:$8 sps:$4 sm:$0xff]   ;;  %v5590_v42 = vld [vmem:[%s7455_s0 + $0x200] ss:$8 sps:$4 sm:$0xff]  }
   0xf   :  { %489 = vmatpush1.bf16.msra.mxu0 %v5999_v4  ;;  %1123 = vmatpush1.bf16.msra.mxu1 %v5999_v4  ;;  %v5591_v43 = vld [vmem:[%s7455_s0 + $0x84] ss:$8 sps:$4 sm:$0xff]   ;;  %v5593_v44 = vld [vmem:[%s7455_s0 + $0x214] ss:$8 sps:$4 sm:$0xff]   ;;  %v5595_v45 = vld [vmem:[%s7455_s0 + $0x80] ss:$8 sps:$4 sm:$0xff]  }
  0x10   :  { %490 = vmatprep.subr.bf16.mxu0 %v5894_v0  ;;  %1124 = vmatprep.subr.bf16.mxu1 %v5894_v0  ;;  %v5596_v46 = vld [vmem:[%s7455_s0 + $0x210] ss:$8 sps:$4 sm:$0xff]   ;;  %v5597_v47 = vld [vmem:[%s7455_s0 + $0x94] ss:$8 sps:$4 sm:$0xff]   ;;  %v5599_v48 = vld [vmem:[%s7455_s0 + $0x224] ss:$8 sps:$4 sm:$0xff]  }
  0x11   :  { %v5601_v49 = vld [vmem:[%s7455_s0 + $0x90] ss:$8 sps:$4 sm:$0xff]   ;;  %v5602_v50 = vld [vmem:[%s7455_s0 + $0x220] ss:$8 sps:$4 sm:$0xff]   ;;  %v5603_v51 = vld [vmem:[%s7455_s0 + $0xa4] ss:$8 sps:$4 sm:$0xff]  }
  0x12   :  { %v5605_v52 = vld [vmem:[%s7455_s0 + $0x234] ss:$8 sps:$4 sm:$0xff]   ;;  %v5607_v53 = vld [vmem:[%s7455_s0 + $0xa0] ss:$8 sps:$4 sm:$0xff]   ;;  %v5608_v54 = vld [vmem:[%s7455_s0 + $0x230] ss:$8 sps:$4 sm:$0xff]  }
  0x13   :  { %491 = vmatpush1.bf16.msra.mxu0 %v6015_v7  ;;  %1125 = vmatpush1.bf16.msra.mxu1 %v6015_v7  ;;  %v5609_v55 = vld [vmem:[%s7455_s0 + $0xb4] ss:$8 sps:$4 sm:$0xff]   ;;  %v5611_v56 = vld [vmem:[%s7455_s0 + $0x244] ss:$8 sps:$4 sm:$0xff]   ;;  %v5613_v57 = vld [vmem:[%s7455_s0 + $0xb0] ss:$8 sps:$4 sm:$0xff]  }
  0x14   :  { %492 = vmatprep.subr.bf16.mxu0 %v5894_v0  ;;  %1126 = vmatprep.subr.bf16.mxu1 %v5894_v0  ;;  %v5614_v58 = vld [vmem:[%s7455_s0 + $0x240] ss:$8 sps:$4 sm:$0xff]   ;;  %v5615_v59 = vld [vmem:[%s7455_s0 + $0xc4] ss:$8 sps:$4 sm:$0xff]   ;;  %v5617_v60 = vld [vmem:[%s7455_s0 + $0x254] ss:$8 sps:$4 sm:$0xff]  }
  0x15   :  { %v5619_v61 = vld [vmem:[%s7455_s0 + $0xc0] ss:$8 sps:$4 sm:$0xff]   ;;  %v5620_v62 = vld [vmem:[%s7455_s0 + $0x250] ss:$8 sps:$4 sm:$0xff]   ;;  %v5621_v63 = vld [vmem:[%s7455_s0 + $0xd4] ss:$8 sps:$4 sm:$0xff]  }
  0x16   :  { %v5631_v5 = vld [vmem:[%s7455_s0 + $0xe0] ss:$8 sps:$4 sm:$0xff]   ;;  %v5632_v6 = vld [vmem:[%s7455_s0 + $0x270] ss:$8 sps:$4 sm:$0xff]  }
  0x17   :  { %493 = vmatpush1.bf16.msra.mxu0 %v6025_v8  ;;  %1127 = vmatpush1.bf16.msra.mxu1 %v6025_v8 }
  0x18   :  { %494 = vmatprep.subr.bf16.mxu0 %v5894_v0  ;;  %1128 = vmatprep.subr.bf16.mxu1 %v5894_v0 }
  0x1b   :  { %495 = vmatpush1.bf16.msra.mxu0 %v6034_v9  ;;  %1129 = vmatpush1.bf16.msra.mxu1 %v6034_v9 }
  0x1c   :  { %496 = vmatprep.subr.bf16.mxu0 %v5894_v0  ;;  %1130 = vmatprep.subr.bf16.mxu1 %v5894_v0 }
  0x1f   :  { %497 = vmatpush1.bf16.msra.mxu0 %v6043_v10  ;;  %1131 = vmatpush1.bf16.msra.mxu1 %v6043_v10 }
  0x20   :  { %510 = vmatprep.subr.bf16.mxu0 %v5894_v0  ;;  %1144 = vmatprep.subr.bf16.mxu1 %v5894_v0 }
  0x23   :  { %511 = vmatpush2.bf16.msra.mxu0 %v6052_v11  ;;  %1145 = vmatpush2.bf16.msra.mxu1 %v6052_v11 }
  0x24   :  { %512 = vmatprep.subr.bf16.mxu0 %v5894_v0  ;;  %1146 = vmatprep.subr.bf16.mxu1 %v5894_v0 }
  0x27   :  { %513 = vmatpush2.bf16.msra.mxu0 %v6061_v12  ;;  %1147 = vmatpush2.bf16.msra.mxu1 %v6061_v12 }
  0x28   :  { %1800 = vmatprep.subr.bf16.mxu0 %v5894_v0  ;;  %2484 = vmatprep.subr.bf16.mxu1 %v5894_v0 }
  0x2a   :  { %515 = vmatmul.mubr.bf16.vlgmr.msra.gmra.mxu0 %v5543_v13  ;;  %1149 = vmatmul.mubr.bf16.vlgmr.msra.gmra.mxu1 %v5546_v14  ;;  %v5643_v13 = vld [vmem:[%s7455_s0 + $0x100] ss:$8 sps:$4 sm:$0xff]   ;;  %v5644_v14 = vld [vmem:[%s7455_s0 + $0x290] ss:$8 sps:$4 sm:$0xff]  }
  0x2b   :  { %1801 = vmatpush1.bf16.msra.mxu0 %v5972_v1  ;;  %2485 = vmatpush1.bf16.msra.mxu1 %v5972_v1  ;;  %v5625_v1 = vld [vmem:[%s7455_s0 + $0xd0] ss:$8 sps:$4 sm:$0xff]  }
  0x2c   :  { %4745 = vmatprep.mubr.msk.bf16.mxu0 %vm406_vm0, %v5549_v15  ;;  %4870 = vmatprep.mubr.msk.bf16.mxu1 %vm406_vm0, %v5551_v16  ;;  %v5645_v15 = vld [vmem:[%s7455_s0 + $0x114] ss:$8 sps:$4 sm:$0xff]   ;;  %v5647_v16 = vld [vmem:[%s7455_s0 + $0x2a4] ss:$8 sps:$4 sm:$0xff]  }
  0x2d   :  { %1802 = vmatprep.subr.bf16.mxu0 %v5894_v0  ;;  %2486 = vmatprep.subr.bf16.mxu1 %v5894_v0 }
  0x2f   :  { %1803 = vmatpush1.bf16.msra.mxu0 %v5981_v2  ;;  %2487 = vmatpush1.bf16.msra.mxu1 %v5981_v2  ;;  %v5626_v2 = vld [vmem:[%s7455_s0 + $0x260] ss:$8 sps:$4 sm:$0xff]  }
  0x30   :  { %1804 = vmatprep.subr.bf16.mxu0 %v5894_v0  ;;  %2488 = vmatprep.subr.bf16.mxu1 %v5894_v0 }
  0x32   :  { %523 = vmatmul.mubr.bf16.gmra.mxu0 %v5553_v17  ;;  %1157 = vmatmul.mubr.bf16.gmra.mxu1 %v5554_v18  ;;  %v5649_v17 = vld [vmem:[%s7455_s0 + $0x110] ss:$8 sps:$4 sm:$0xff]   ;;  %v5650_v18 = vld [vmem:[%s7455_s0 + $0x2a0] ss:$8 sps:$4 sm:$0xff]  }
  0x33   :  { %4746 = vmatprep.mubr.msk.bf16.mxu0 %vm406_vm0, %v5555_v19  ;;  %4871 = vmatprep.mubr.msk.bf16.mxu1 %vm406_vm0, %v5557_v20  ;;  %v5651_v19 = vld [vmem:[%s7455_s0 + $0x124] ss:$8 sps:$4 sm:$0xff]   ;;  %v5653_v20 = vld [vmem:[%s7455_s0 + $0x2b4] ss:$8 sps:$4 sm:$0xff]  }
  0x34   :  { %1805 = vmatpush1.bf16.msra.mxu0 %v5990_v3  ;;  %2489 = vmatpush1.bf16.msra.mxu1 %v5990_v3  ;;  %v5627_v3 = vld [vmem:[%s7455_s0 + $0xe4] ss:$8 sps:$4 sm:$0xff]  }
  0x35   :  { %1806 = vmatprep.subr.bf16.mxu0 %v5894_v0  ;;  %2490 = vmatprep.subr.bf16.mxu1 %v5894_v0 }
  0x38   :  { %1807 = vmatpush1.bf16.msra.mxu0 %v5999_v4  ;;  %2491 = vmatpush1.bf16.msra.mxu1 %v5999_v4  ;;  %v5629_v4 = vld [vmem:[%s7455_s0 + $0x274] ss:$8 sps:$4 sm:$0xff]  }
  0x39   :  { %1808 = vmatprep.subr.bf16.mxu0 %v5894_v0  ;;  %2492 = vmatprep.subr.bf16.mxu1 %v5894_v0 }
  0x3a   :  { %531 = vmatmul.mubr.bf16.gmra.mxu0 %v5559_v21  ;;  %1165 = vmatmul.mubr.bf16.gmra.mxu1 %v5560_v22  ;;  %v5655_v21 = vld [vmem:[%s7455_s0 + $0x120] ss:$8 sps:$4 sm:$0xff]   ;;  %v5656_v22 = vld [vmem:[%s7455_s0 + $0x2b0] ss:$8 sps:$4 sm:$0xff]  }
  0x3b   :  { %4747 = vmatprep.mubr.msk.bf16.mxu0 %vm406_vm0, %v5561_v23  ;;  %4872 = vmatprep.mubr.msk.bf16.mxu1 %vm406_vm0, %v5563_v24  ;;  %v5657_v23 = vld [vmem:[%s7455_s0 + $0x134] ss:$8 sps:$4 sm:$0xff]   ;;  %v5659_v24 = vld [vmem:[%s7455_s0 + $0x2c4] ss:$8 sps:$4 sm:$0xff]  }
  0x3c   :  { %1809 = vmatpush1.bf16.msra.mxu0 %v6015_v7  ;;  %2493 = vmatpush1.bf16.msra.mxu1 %v6015_v7  ;;  %v5633_v7 = vld [vmem:[%s7455_s0 + $0xf4] ss:$8 sps:$4 sm:$0xff]  }
  0x3d   :  { %1810 = vmatprep.subr.bf16.mxu0 %v5894_v0  ;;  %2494 = vmatprep.subr.bf16.mxu1 %v5894_v0 }
  0x40   :  { %1811 = vmatpush1.bf16.msra.mxu0 %v6025_v8  ;;  %2495 = vmatpush1.bf16.msra.mxu1 %v6025_v8  ;;  %v5635_v8 = vld [vmem:[%s7455_s0 + $0x284] ss:$8 sps:$4 sm:$0xff]  }
  0x41   :  { %1812 = vmatprep.subr.bf16.mxu0 %v5894_v0  ;;  %2496 = vmatprep.subr.bf16.mxu1 %v5894_v0 }
  0x42   :  { %539 = vmatmul.mubr.bf16.gmra.mxu0 %v5565_v25  ;;  %1173 = vmatmul.mubr.bf16.gmra.mxu1 %v5566_v26  ;;  %v5661_v25 = vld [vmem:[%s7455_s0 + $0x130] ss:$8 sps:$4 sm:$0xff]   ;;  %v5662_v26 = vld [vmem:[%s7455_s0 + $0x2c0] ss:$8 sps:$4 sm:$0xff]  }
  0x43   :  { %4748 = vmatprep.mubr.msk.bf16.mxu0 %vm406_vm0, %v5567_v27  ;;  %4873 = vmatprep.mubr.msk.bf16.mxu1 %vm406_vm0, %v5569_v28  ;;  %v5663_v27 = vld [vmem:[%s7455_s0 + $0x144] ss:$8 sps:$4 sm:$0xff]   ;;  %v5665_v28 = vld [vmem:[%s7455_s0 + $0x2d4] ss:$8 sps:$4 sm:$0xff]  }
  0x44   :  { %1813 = vmatpush1.bf16.msra.mxu0 %v6034_v9  ;;  %2497 = vmatpush1.bf16.msra.mxu1 %v6034_v9  ;;  %v5637_v9 = vld [vmem:[%s7455_s0 + $0xf0] ss:$8 sps:$4 sm:$0xff]  }
  0x45   :  { %1814 = vmatprep.subr.bf16.mxu0 %v5894_v0  ;;  %2498 = vmatprep.subr.bf16.mxu1 %v5894_v0 }
  0x48   :  { %1815 = vmatpush1.bf16.msra.mxu0 %v6043_v10  ;;  %2499 = vmatpush1.bf16.msra.mxu1 %v6043_v10  ;;  %v5638_v10 = vld [vmem:[%s7455_s0 + $0x280] ss:$8 sps:$4 sm:$0xff]  }
  0x49   :  { %1828 = vmatprep.subr.bf16.mxu0 %v5894_v0  ;;  %2512 = vmatprep.subr.bf16.mxu1 %v5894_v0 }
  0x4a   :  { %547 = vmatmul.mubr.bf16.gmra.mxu0 %v5571_v29  ;;  %1181 = vmatmul.mubr.bf16.gmra.mxu1 %v5572_v30  ;;  %v5667_v29 = vld [vmem:[%s7455_s0 + $0x140] ss:$8 sps:$4 sm:$0xff]   ;;  %v5668_v30 = vld [vmem:[%s7455_s0 + $0x2d0] ss:$8 sps:$4 sm:$0xff]  }
  0x4b   :  { %4749 = vmatprep.mubr.msk.bf16.mxu0 %vm406_vm0, %v5573_v31  ;;  %4874 = vmatprep.mubr.msk.bf16.mxu1 %vm406_vm0, %v5575_v32  ;;  %v5669_v31 = vld [vmem:[%s7455_s0 + $0x154] ss:$8 sps:$4 sm:$0xff]   ;;  %v5671_v32 = vld [vmem:[%s7455_s0 + $0x2e4] ss:$8 sps:$4 sm:$0xff]  }
  0x4c   :  { %1829 = vmatpush2.bf16.msra.mxu0 %v6052_v11  ;;  %2513 = vmatpush2.bf16.msra.mxu1 %v6052_v11  ;;  %v5639_v11 = vld [vmem:[%s7455_s0 + $0x104] ss:$8 sps:$4 sm:$0xff]  }
  0x4d   :  { %1830 = vmatprep.subr.bf16.mxu0 %v5894_v0  ;;  %2514 = vmatprep.subr.bf16.mxu1 %v5894_v0  ;;  %v5623_v0 = vld [vmem:[%s7455_s0 + $0x264] ss:$8 sps:$4 sm:$0xff]  }
  0x50   :  { %1831 = vmatpush2.bf16.msra.mxu0 %v6061_v12  ;;  %2515 = vmatpush2.bf16.msra.mxu1 %v6061_v12  ;;  %v5641_v12 = vld [vmem:[%s7455_s0 + $0x294] ss:$8 sps:$4 sm:$0xff]  }
  0x52   :  { %555 = vmatmul.mubr.bf16.gmra.mxu0 %v5577_v33  ;;  %1189 = vmatmul.mubr.bf16.gmra.mxu1 %v5578_v34  ;;  %v5673_v33 = vld [vmem:[%s7455_s0 + $0x150] ss:$8 sps:$4 sm:$0xff]   ;;  %v5674_v34 = vld [vmem:[%s7455_s0 + $0x2e0] ss:$8 sps:$4 sm:$0xff]  }
  0x53   :  { %4750 = vmatprep.mubr.msk.bf16.mxu0 %vm406_vm0, %v5579_v35  ;;  %4875 = vmatprep.mubr.msk.bf16.mxu1 %vm406_vm0, %v5581_v36  ;;  %v5675_v35 = vld [vmem:[%s7455_s0 + $0x164] ss:$8 sps:$4 sm:$0xff]   ;;  %v5677_v36 = vld [vmem:[%s7455_s0 + $0x2f4] ss:$8 sps:$4 sm:$0xff]  }
  0x5a   :  { %563 = vmatmul.mubr.bf16.gmra.mxu0 %v5583_v37  ;;  %1197 = vmatmul.mubr.bf16.gmra.mxu1 %v5584_v38  ;;  %v5679_v37 = vld [vmem:[%s7455_s0 + $0x160] ss:$8 sps:$4 sm:$0xff]   ;;  %v5680_v38 = vld [vmem:[%s7455_s0 + $0x2f0] ss:$8 sps:$4 sm:$0xff]  }
  0x5b   :  { %4751 = vmatprep.mubr.msk.bf16.mxu0 %vm406_vm0, %v5585_v39  ;;  %4876 = vmatprep.mubr.msk.bf16.mxu1 %vm406_vm0, %v5587_v40  ;;  %v5681_v39 = vld [vmem:[%s7455_s0 + $0x174] ss:$8 sps:$4 sm:$0xff]   ;;  %v5683_v40 = vld [vmem:[%s7455_s0 + $0x304] ss:$8 sps:$4 sm:$0xff]  }
  0x62   :  { %571 = vmatmul.mubr.bf16.gmra.mxu0 %v5589_v41  ;;  %1205 = vmatmul.mubr.bf16.gmra.mxu1 %v5590_v42  ;;  %v7468_v41 = vmov 0.0   ;;  %v5685_v42 = vld [vmem:[%s7455_s0 + $0x170] ss:$8 sps:$4 sm:$0xff]  }
  0x63   :  { %4752 = vmatprep.mubr.msk.bf16.mxu0 %vm406_vm0, %v5591_v43  ;;  %4877 = vmatprep.mubr.msk.bf16.mxu1 %vm406_vm0, %v5593_v44  ;;  %v5686_v43 = vld [vmem:[%s7455_s0 + $0x300] ss:$8 sps:$4 sm:$0xff]   ;;  %v5687_v44 = vld [vmem:[%s7455_s0 + $0x184] ss:$8 sps:$4 sm:$0xff]  }
  0x64   :  { %5335 = vmatprep.subr.bf16.mxu0 %v7468_v41  ;;  %5341 = vmatprep.subr.bf16.mxu1 %v7468_v41 }
  0x6a   :  { %579 = vmatmul.mubr.bf16.gmra.mxu0 %v5595_v45  ;;  %1213 = vmatmul.mubr.bf16.gmra.mxu1 %v5596_v46  ;;  %v5689_v45 = vld [vmem:[%s7455_s0 + $0x314] ss:$8 sps:$4 sm:$0xff]   ;;  %v5691_v46 = vld [vmem:[%s7455_s0 + $0x180] ss:$8 sps:$4 sm:$0xff]  }
  0x6b   :  { %4753 = vmatprep.mubr.msk.bf16.mxu0 %vm406_vm0, %v5597_v47  ;;  %4878 = vmatprep.mubr.msk.bf16.mxu1 %vm406_vm0, %v5599_v48  ;;  %v5692_v47 = vld [vmem:[%s7455_s0 + $0x310] ss:$8 sps:$4 sm:$0xff]   ;;  %v5695_v48 = vld [vmem:[%s7455_s0 + $0x324] ss:$8 sps:$4 sm:$0xff]  }
  0x72   :  { %587 = vmatmul.mubr.bf16.gmra.mxu0 %v5601_v49  ;;  %1221 = vmatmul.mubr.bf16.gmra.mxu1 %v5602_v50  ;;  %v5698_v49 = vld [vmem:[%s7455_s0 + $0x4b4] ss:$8 sps:$4 sm:$0xff]   ;;  %v6460_v50 = vld [vmem:[%s7457_s2] ss:$0 sm:$0xff] }
  0x73   :  { %4754 = vmatprep.mubr.msk.bf16.mxu0 %vm406_vm0, %v5603_v51  ;;  %4879 = vmatprep.mubr.msk.bf16.mxu1 %vm406_vm0, %v5605_v52 }
  0x7a   :  { %595 = vmatmul.mubr.bf16.gmra.mxu0 %v5607_v53  ;;  %1229 = vmatmul.mubr.bf16.gmra.mxu1 %v5608_v54 }
  0x7b   :  { %4755 = vmatprep.mubr.msk.bf16.mxu0 %vm406_vm0, %v5609_v55  ;;  %4880 = vmatprep.mubr.msk.bf16.mxu1 %vm406_vm0, %v5611_v56 }
  0x82   :  { %603 = vmatmul.mubr.bf16.gmra.mxu0 %v5613_v57  ;;  %1237 = vmatmul.mubr.bf16.gmra.mxu1 %v5614_v58  ;;  %v5693_v57 = vld [vmem:[%s7455_s0 + $0x320] ss:$8 sps:$4 sm:$0xff]   ;;  %v5696_v58 = vld [vmem:[%s7455_s0 + $0x4b0] ss:$8 sps:$4 sm:$0xff]  }
  0x83   :  { %4756 = vmatprep.mubr.msk.bf16.mxu0 %vm406_vm0, %v5615_v59  ;;  %4881 = vmatprep.mubr.msk.bf16.mxu1 %vm406_vm0, %v5617_v60 }
  0x8a   :  { %611 = vmatmul.mubr.bf16.gmra.mxu0 %v5619_v61  ;;  %1245 = vmatmul.mubr.bf16.gmra.mxu1 %v5620_v62 }
  0x8b   :  { %4757 = vmatprep.mubr.msk.bf16.mxu0 %vm406_vm0, %v5621_v63  ;;  %4882 = vmatprep.mubr.msk.bf16.mxu1 %vm406_vm0, %v5623_v0 }
  0x92   :  { %619 = vmatmul.mubr.bf16.gmra.mxu0 %v5625_v1  ;;  %1253 = vmatmul.mubr.bf16.gmra.mxu1 %v5626_v2  ;;  %v5699_v2 = vld [vmem:[%s7455_s0 + $0x334] ss:$8 sps:$4 sm:$0xff]  }
  0x93   :  { %4758 = vmatprep.mubr.msk.bf16.mxu0 %vm406_vm0, %v5627_v3  ;;  %4883 = vmatprep.mubr.msk.bf16.mxu1 %vm406_vm0, %v5629_v4  ;;  %v5701_v3 = vld [vmem:[%s7455_s0 + $0x4c4] ss:$8 sps:$4 sm:$0xff]  }
  0x9a   :  { %627 = vmatmul.mubr.bf16.gmra.mxu0 %v5631_v5  ;;  %1261 = vmatmul.mubr.bf16.gmra.mxu1 %v5632_v6  ;;  %v5777_v6 = vld [vmem:[%s7456_s3] sm:$0xff]  }
  0x9b   :  { %4759 = vmatprep.mubr.msk.bf16.mxu0 %vm406_vm0, %v5633_v7  ;;  %4884 = vmatprep.mubr.msk.bf16.mxu1 %vm406_vm0, %v5635_v8  ;;  %v5778_v7 = vld [vmem:[%s7456_s3 + $0x8] sm:$0xff]  }
  0xa2   :  { %635 = vmatmul.mubr.bf16.gmra.mxu0 %v5637_v9  ;;  %1269 = vmatmul.mubr.bf16.gmra.mxu1 %v5638_v10 }
  0xa3   :  { %4760 = vmatprep.mubr.msk.bf16.mxu0 %vm406_vm0, %v5639_v11  ;;  %4885 = vmatprep.mubr.msk.bf16.mxu1 %vm406_vm0, %v5641_v12 }
  0xaa   :  { %643 = vmatmul.mubr.bf16.gmra.mxu0 %v5643_v13  ;;  %1277 = vmatmul.mubr.bf16.gmra.mxu1 %v5644_v14 }
  0xab   :  { %4761 = vmatprep.mubr.msk.bf16.mxu0 %vm406_vm0, %v5645_v15  ;;  %4886 = vmatprep.mubr.msk.bf16.mxu1 %vm406_vm0, %v5647_v16 }
  0xb2   :  { %651 = vmatmul.mubr.bf16.gmra.mxu0 %v5649_v17  ;;  %1285 = vmatmul.mubr.bf16.gmra.mxu1 %v5650_v18 }
  0xb3   :  { %4762 = vmatprep.mubr.msk.bf16.mxu0 %vm406_vm0, %v5651_v19  ;;  %4887 = vmatprep.mubr.msk.bf16.mxu1 %vm406_vm0, %v5653_v20 }
  0xba   :  { %659 = vmatmul.mubr.bf16.gmra.mxu0 %v5655_v21  ;;  %1293 = vmatmul.mubr.bf16.gmra.mxu1 %v5656_v22  ;;  %v5703_v21 = vld [vmem:[%s7455_s0 + $0x330] ss:$8 sps:$4 sm:$0xff]   ;;  %v5704_v22 = vld [vmem:[%s7455_s0 + $0x4c0] ss:$8 sps:$4 sm:$0xff]  }
  0xbb   :  { %4763 = vmatprep.mubr.msk.bf16.mxu0 %vm406_vm0, %v5657_v23  ;;  %4888 = vmatprep.mubr.msk.bf16.mxu1 %vm406_vm0, %v5659_v24 }
  0xc2   :  { %667 = vmatmul.mubr.bf16.gmra.mxu0 %v5661_v25  ;;  %1301 = vmatmul.mubr.bf16.gmra.mxu1 %v5662_v26  ;;  %v5705_v26 = vld [vmem:[%s7455_s0 + $0x344] ss:$8 sps:$4 sm:$0xff]  }
  0xc3   :  { %4764 = vmatprep.mubr.msk.bf16.mxu0 %vm406_vm0, %v5663_v27  ;;  %4889 = vmatprep.mubr.msk.bf16.mxu1 %vm406_vm0, %v5665_v28  ;;  %v5707_v27 = vld [vmem:[%s7455_s0 + $0x4d4] ss:$8 sps:$4 sm:$0xff]  }
  0xca   :  { %675 = vmatmul.mubr.bf16.gmra.mxu0 %v5667_v29  ;;  %1309 = vmatmul.mubr.bf16.gmra.mxu1 %v5668_v30 }
  0xcb   :  { %4765 = vmatprep.mubr.msk.bf16.mxu0 %vm406_vm0, %v5669_v31  ;;  %4890 = vmatprep.mubr.msk.bf16.mxu1 %vm406_vm0, %v5671_v32 }
  0xd2   :  { %683 = vmatmul.mubr.bf16.gmra.mxu0 %v5673_v33  ;;  %1317 = vmatmul.mubr.bf16.gmra.mxu1 %v5674_v34 }
  0xd3   :  { %4766 = vmatprep.mubr.msk.bf16.mxu0 %vm406_vm0, %v5675_v35  ;;  %4891 = vmatprep.mubr.msk.bf16.mxu1 %vm406_vm0, %v5677_v36 }
  0xda   :  { %691 = vmatmul.mubr.bf16.gmra.mxu0 %v5679_v37  ;;  %1325 = vmatmul.mubr.bf16.gmra.mxu1 %v5680_v38 }
  0xdb   :  { %4767 = vmatprep.mubr.msk.bf16.mxu0 %vm406_vm0, %v5681_v39  ;;  %4892 = vmatprep.mubr.msk.bf16.mxu1 %vm406_vm0, %v5683_v40 }
  0xe2   :  { %699 = vmatmul.mubr.bf16.gmra.mxu0 %v5685_v42  ;;  %1333 = vmatmul.mubr.bf16.gmra.mxu1 %v5686_v43 }
  0xe3   :  { %4768 = vmatprep.mubr.msk.bf16.mxu0 %vm406_vm0, %v5687_v44  ;;  %4893 = vmatprep.mubr.msk.bf16.mxu1 %vm406_vm0, %v5689_v45  ;;  %v5709_v44 = vld [vmem:[%s7455_s0 + $0x340] ss:$8 sps:$4 sm:$0xff]   ;;  %v5710_v45 = vld [vmem:[%s7455_s0 + $0x4d0] ss:$8 sps:$4 sm:$0xff]  }
  0xea   :  { %v516_v51 = vpop.f32.mrf.mxu0  ;;  %707 = vmatmul.mubr.bf16.gmra.mxu0 %v5691_v46  ;;  %v1150_v52 = vpop.f32.mrf.mxu1  ;;  %1341 = vmatmul.mubr.bf16.gmra.mxu1 %v5692_v47 }
  0xeb   :  { %v517_v53 = vadd.f32 %v6460_v50, %v516_v51  ;;  %v1151_v54 = vadd.f32 %v6460_v50, %v1150_v52  ;;  %4994 = vmatprep.mubr.msk.bf16.mxu0 %vm406_vm0, %v5695_v48  ;;  %5119 = vmatprep.mubr.msk.bf16.mxu1 %vm406_vm0, %v5698_v49  ;;  %v5711_v49 = vld [vmem:[%s7455_s0 + $0x354] ss:$8 sps:$4 sm:$0xff]   ;;  %v5713_v51 = vld [vmem:[%s7455_s0 + $0x4e4] ss:$8 sps:$4 sm:$0xff]  }
  0xec   :  { %v518_v55 = vpop.f32.mrf.mxu0  ;;  %v1152_v56 = vpop.f32.mrf.mxu1 }
  0xed   :  { %v715_v59 = vmax.f32 %v517_v53, 0.0  ;;  %v1349_v60 = vmax.f32 %v1151_v54, 0.0 }
  0xee   :  { %v519_v61 = vpop.f32.mrf.mxu0  ;;  %v1153_v62 = vpop.f32.mrf.mxu1 }
  0xef   :  { %v6472_v63 = vmax.f32 %v715_v59, %v1349_v60  ;;  %v520_v0 = vadd.f32 %v6460_v50, %v519_v61  ;;  %v1154_v1 = vadd.f32 %v6460_v50, %v1153_v62 }
  0xf0   :  { %v521_v4 = vpop.f32.mrf.mxu0  ;;  %v1155_v5 = vpop.f32.mrf.mxu1 }
  0xf1   :  { %v716_v8 = vmax.f32 %v520_v0, 0.0  ;;  %v1350_v9 = vmax.f32 %v1154_v1, 0.0  ;;  %v5715_v4 = vld [vmem:[%s7455_s0 + $0x350] ss:$8 sps:$4 sm:$0xff]   ;;  %v5716_v5 = vld [vmem:[%s7455_s0 + $0x4e0] ss:$8 sps:$4 sm:$0xff]  }
  0xf2   :  { %v524_v10 = vpop.f32.mrf.mxu0  ;;  %v1158_v11 = vpop.f32.mrf.mxu1  ;;  %1833 = vmatmul.mubr.bf16.vlgmr.msra.gmra.mxu0 %v5693_v57  ;;  %2517 = vmatmul.mubr.bf16.vlgmr.msra.gmra.mxu1 %v5696_v58 }
  0xf3   :  { %v6488_v12 = vmax.f32 %v716_v8, %v1350_v9  ;;  %v525_v13 = vadd.f32 %v6460_v50, %v524_v10  ;;  %v1159_v14 = vadd.f32 %v6460_v50, %v1158_v11  ;;  %4995 = vmatprep.mubr.msk.bf16.mxu0 %vm406_vm0, %v5699_v2  ;;  %5120 = vmatprep.mubr.msk.bf16.mxu1 %vm406_vm0, %v5701_v3  ;;  %v5717_v9 = vld [vmem:[%s7455_s0 + $0x364] ss:$8 sps:$4 sm:$0xff]   ;;  %v5719_v10 = vld [vmem:[%s7455_s0 + $0x4f4] ss:$8 sps:$4 sm:$0xff]  }
  0xf4   :  { %v526_v15 = vpop.f32.mrf.mxu0  ;;  %v1160_v16 = vpop.f32.mrf.mxu1  ;;  %5336 = vmatpush3.bf16.msra.mxu0 %v5777_v6  ;;  %5342 = vmatpush3.bf16.msra.mxu1 %v5778_v7 }
  0xf5   :  { %v717_v17 = vmax.f32 %v525_v13, 0.0  ;;  %v1351_v18 = vmax.f32 %v1159_v14, 0.0  ;;  %5347 = vmatprep.subr.bf16.mxu0 %v7468_v41  ;;  %5353 = vmatprep.subr.bf16.mxu1 %v7468_v41 }
  0xf6   :  { %v527_v19 = vpop.f32.mrf.mxu0  ;;  %v1161_v20 = vpop.f32.mrf.mxu1 }
  0xf7   :  { %v6502_v23 = vmax.f32 %v717_v17, %v1351_v18  ;;  %v528_v24 = vadd.f32 %v6460_v50, %v527_v19  ;;  %v1162_v25 = vadd.f32 %v6460_v50, %v1161_v20 }
  0xf8   :  { %v529_v28 = vpop.f32.mrf.mxu0  ;;  %v1163_v29 = vpop.f32.mrf.mxu1 }
  0xf9   :  { %v718_v30 = vmax.f32 %v528_v24, 0.0  ;;  %v1352_v31 = vmax.f32 %v1162_v25, 0.0  ;;  %v5721_v28 = vld [vmem:[%s7455_s0 + $0x360] ss:$8 sps:$4 sm:$0xff]   ;;  %v5722_v29 = vld [vmem:[%s7455_s0 + $0x4f0] ss:$8 sps:$4 sm:$0xff]  }
  0xfa   :  { %v532_v32 = vpop.f32.mrf.mxu0  ;;  %v1166_v33 = vpop.f32.mrf.mxu1  ;;  %1841 = vmatmul.mubr.bf16.gmra.mxu0 %v5703_v21  ;;  %2525 = vmatmul.mubr.bf16.gmra.mxu1 %v5704_v22 }
  0xfb   :  { %v6512_v34 = vmax.f32 %v718_v30, %v1352_v31  ;;  %v533_v35 = vadd.f32 %v6460_v50, %v532_v32  ;;  %v1167_v36 = vadd.f32 %v6460_v50, %v1166_v33  ;;  %4996 = vmatprep.mubr.msk.bf16.mxu0 %vm406_vm0, %v5705_v26  ;;  %5121 = vmatprep.mubr.msk.bf16.mxu1 %vm406_vm0, %v5707_v27  ;;  %v5723_v33 = vld [vmem:[%s7455_s0 + $0x374] ss:$8 sps:$4 sm:$0xff]  }
  0xfc   :  { %v534_v37 = vpop.f32.mrf.mxu0  ;;  %v1168_v38 = vpop.f32.mrf.mxu1 }
  0xfd   :  { %v719_v39 = vmax.f32 %v533_v35, 0.0  ;;  %v1353_v40 = vmax.f32 %v1167_v36, 0.0  ;;  %v5725_v35 = vld [vmem:[%s7455_s0 + $0x504] ss:$8 sps:$4 sm:$0xff]  }
  0xfe   :  { %v535_v42 = vpop.f32.mrf.mxu0  ;;  %v1169_v43 = vpop.f32.mrf.mxu1 }
  0xff   :  { %v6524_v46 = vmax.f32 %v719_v39, %v1353_v40  ;;  %v536_v47 = vadd.f32 %v6460_v50, %v535_v42  ;;  %v1170_v48 = vadd.f32 %v6460_v50, %v1169_v43 }
 0x100   :  { %v537_v52 = vpop.f32.mrf.mxu0  ;;  %v1171_v53 = vpop.f32.mrf.mxu1 }
 0x101   :  { %v720_v54 = vmax.f32 %v536_v47, 0.0  ;;  %v1354_v55 = vmax.f32 %v1170_v48, 0.0 }
 0x102   :  { %v540_v56 = vpop.f32.mrf.mxu0  ;;  %v1174_v57 = vpop.f32.mrf.mxu1  ;;  %1849 = vmatmul.mubr.bf16.gmra.mxu0 %v5709_v44  ;;  %2533 = vmatmul.mubr.bf16.gmra.mxu1 %v5710_v45 }
 0x103   :  { %v6534_v58 = vmax.f32 %v720_v54, %v1354_v55  ;;  %v541_v59 = vadd.f32 %v6460_v50, %v540_v56  ;;  %v1175_v60 = vadd.f32 %v6460_v50, %v1174_v57  ;;  %4997 = vmatprep.mubr.msk.bf16.mxu0 %vm406_vm0, %v5711_v49  ;;  %5122 = vmatprep.mubr.msk.bf16.mxu1 %vm406_vm0, %v5713_v51  ;;  %v5727_v54 = vld [vmem:[%s7455_s0 + $0x370] ss:$8 sps:$4 sm:$0xff]   ;;  %v5728_v55 = vld [vmem:[%s7455_s0 + $0x500] ss:$8 sps:$4 sm:$0xff]  }
 0x104   :  { %v542_v61 = vpop.f32.mrf.mxu0  ;;  %v1176_v62 = vpop.f32.mrf.mxu1 }
 0x105   :  { %v721_v0 = vmax.f32 %v541_v59, 0.0  ;;  %v1355_v1 = vmax.f32 %v1175_v60, 0.0  ;;  %v5729_v60 = vld [vmem:[%s7455_s0 + $0x384] ss:$8 sps:$4 sm:$0xff]   ;;  %v5731_v61 = vld [vmem:[%s7455_s0 + $0x514] ss:$8 sps:$4 sm:$0xff]  }
 0x106   :  { %v543_v2 = vpop.f32.mrf.mxu0  ;;  %v1177_v3 = vpop.f32.mrf.mxu1 }
 0x107   :  { %v6546_v6 = vmax.f32 %v721_v0, %v1355_v1  ;;  %v544_v7 = vadd.f32 %v6460_v50, %v543_v2  ;;  %v1178_v8 = vadd.f32 %v6460_v50, %v1177_v3 }
 0x108   :  { %v545_v11 = vpop.f32.mrf.mxu0  ;;  %v1179_v13 = vpop.f32.mrf.mxu1 }
 0x109   :  { %v722_v14 = vmax.f32 %v544_v7, 0.0  ;;  %v1356_v15 = vmax.f32 %v1178_v8, 0.0 }
 0x10a   :  { %v548_v16 = vpop.f32.mrf.mxu0  ;;  %v1182_v17 = vpop.f32.mrf.mxu1  ;;  %1857 = vmatmul.mubr.bf16.gmra.mxu0 %v5715_v4  ;;  %2541 = vmatmul.mubr.bf16.gmra.mxu1 %v5716_v5 }
 0x10b   :  { %v6556_v18 = vmax.f32 %v722_v14, %v1356_v15  ;;  %v549_v19 = vadd.f32 %v6460_v50, %v548_v16  ;;  %v1183_v20 = vadd.f32 %v6460_v50, %v1182_v17  ;;  %4998 = vmatprep.mubr.msk.bf16.mxu0 %vm406_vm0, %v5717_v9  ;;  %5123 = vmatprep.mubr.msk.bf16.mxu1 %vm406_vm0, %v5719_v10  ;;  %v5733_v16 = vld [vmem:[%s7455_s0 + $0x380] ss:$8 sps:$4 sm:$0xff]   ;;  %v5734_v17 = vld [vmem:[%s7455_s0 + $0x510] ss:$8 sps:$4 sm:$0xff]  }
 0x10c   :  { %v550_v21 = vpop.f32.mrf.mxu0  ;;  %v1184_v22 = vpop.f32.mrf.mxu1 }
 0x10d   :  { %v723_v24 = vmax.f32 %v549_v19, 0.0  ;;  %v1357_v25 = vmax.f32 %v1183_v20, 0.0  ;;  %v5735_v22 = vld [vmem:[%s7455_s0 + $0x394] ss:$8 sps:$4 sm:$0xff]  }
 0x10e   :  { %v551_v26 = vpop.f32.mrf.mxu0  ;;  %v1185_v27 = vpop.f32.mrf.mxu1 }
 0x10f   :  { %v6568_v30 = vmax.f32 %v723_v24, %v1357_v25  ;;  %v552_v31 = vadd.f32 %v6460_v50, %v551_v26  ;;  %v1186_v32 = vadd.f32 %v6460_v50, %v1185_v27  ;;  %v5737_v24 = vld [vmem:[%s7455_s0 + $0x524] ss:$8 sps:$4 sm:$0xff]  }
 0x110   :  { %v553_v36 = vpop.f32.mrf.mxu0  ;;  %v1187_v37 = vpop.f32.mrf.mxu1 }
 0x111   :  { %v724_v38 = vmax.f32 %v552_v31, 0.0  ;;  %v1358_v39 = vmax.f32 %v1186_v32, 0.0 }
 0x112   :  { %v556_v40 = vpop.f32.mrf.mxu0  ;;  %v1190_v42 = vpop.f32.mrf.mxu1  ;;  %1865 = vmatmul.mubr.bf16.gmra.mxu0 %v5721_v28  ;;  %2549 = vmatmul.mubr.bf16.gmra.mxu1 %v5722_v29 }
 0x113   :  { %v6578_v43 = vmax.f32 %v724_v38, %v1358_v39  ;;  %v557_v44 = vadd.f32 %v6460_v50, %v556_v40  ;;  %v1191_v45 = vadd.f32 %v6460_v50, %v1190_v42  ;;  %4999 = vmatprep.mubr.msk.bf16.mxu0 %vm406_vm0, %v5723_v33  ;;  %5124 = vmatprep.mubr.msk.bf16.mxu1 %vm406_vm0, %v5725_v35 }
 0x114   :  { %v558_v47 = vpop.f32.mrf.mxu0  ;;  %v1192_v48 = vpop.f32.mrf.mxu1 }
 0x115   :  { %v725_v49 = vmax.f32 %v557_v44, 0.0  ;;  %v1359_v51 = vmax.f32 %v1191_v45, 0.0  ;;  %v5739_v44 = vld [vmem:[%s7455_s0 + $0x390] ss:$8 sps:$4 sm:$0xff]   ;;  %v5740_v45 = vld [vmem:[%s7455_s0 + $0x520] ss:$8 sps:$4 sm:$0xff]  }
 0x116   :  { %v559_v52 = vpop.f32.mrf.mxu0  ;;  %v1193_v53 = vpop.f32.mrf.mxu1 }
 0x117   :  { %v6590_v56 = vmax.f32 %v725_v49, %v1359_v51  ;;  %v560_v57 = vadd.f32 %v6460_v50, %v559_v52  ;;  %v1194_v59 = vadd.f32 %v6460_v50, %v1193_v53  ;;  %v5741_v51 = vld [vmem:[%s7455_s0 + $0x3a4] ss:$8 sps:$4 sm:$0xff]   ;;  %v5743_v52 = vld [vmem:[%s7455_s0 + $0x534] ss:$8 sps:$4 sm:$0xff]  }
 0x118   :  { %v561_v62 = vpop.f32.mrf.mxu0  ;;  %v1195_v0 = vpop.f32.mrf.mxu1 }
 0x119   :  { %v726_v1 = vmax.f32 %v560_v57, 0.0  ;;  %v1360_v2 = vmax.f32 %v1194_v59, 0.0 }
 0x11a   :  { %v564_v3 = vpop.f32.mrf.mxu0  ;;  %v1198_v4 = vpop.f32.mrf.mxu1  ;;  %1873 = vmatmul.mubr.bf16.gmra.mxu0 %v5727_v54  ;;  %2557 = vmatmul.mubr.bf16.gmra.mxu1 %v5728_v55 }
 0x11b   :  { %v6600_v5 = vmax.f32 %v726_v1, %v1360_v2  ;;  %v565_v7 = vadd.f32 %v6460_v50, %v564_v3  ;;  %v1199_v8 = vadd.f32 %v6460_v50, %v1198_v4  ;;  %5000 = vmatprep.mubr.msk.bf16.mxu0 %vm406_vm0, %v5729_v60  ;;  %5125 = vmatprep.mubr.msk.bf16.mxu1 %vm406_vm0, %v5731_v61 }
 0x11c   :  { %v566_v9 = vpop.f32.mrf.mxu0  ;;  %v1200_v10 = vpop.f32.mrf.mxu1 }
 0x11d   :  { %v727_v11 = vmax.f32 %v565_v7, 0.0  ;;  %v1361_v13 = vmax.f32 %v1199_v8, 0.0  ;;  %v5745_v9 = vld [vmem:[%s7455_s0 + $0x3a0] ss:$8 sps:$4 sm:$0xff]   ;;  %v5746_v10 = vld [vmem:[%s7455_s0 + $0x530] ss:$8 sps:$4 sm:$0xff]  }
 0x11e   :  { %v567_v14 = vpop.f32.mrf.mxu0  ;;  %v1201_v15 = vpop.f32.mrf.mxu1 }
 0x11f   :  { %v6612_v19 = vmax.f32 %v727_v11, %v1361_v13  ;;  %v568_v20 = vadd.f32 %v6460_v50, %v567_v14  ;;  %v1202_v21 = vadd.f32 %v6460_v50, %v1201_v15  ;;  %v5747_v15 = vld [vmem:[%s7455_s0 + $0x3b4] ss:$8 sps:$4 sm:$0xff]  }
 0x120   :  { %v569_v25 = vpop.f32.mrf.mxu0  ;;  %v1203_v26 = vpop.f32.mrf.mxu1 }
 0x121   :  { %v728_v27 = vmax.f32 %v568_v20, 0.0  ;;  %v1362_v28 = vmax.f32 %v1202_v21, 0.0 }
 0x122   :  { %v572_v29 = vpop.f32.mrf.mxu0  ;;  %v1206_v31 = vpop.f32.mrf.mxu1  ;;  %1881 = vmatmul.mubr.bf16.gmra.mxu0 %v5733_v16  ;;  %2565 = vmatmul.mubr.bf16.gmra.mxu1 %v5734_v17  ;;  %v5749_v16 = vld [vmem:[%s7455_s0 + $0x544] ss:$8 sps:$4 sm:$0xff]  }
 0x123   :  { %v6622_v32 = vmax.f32 %v728_v27, %v1362_v28  ;;  %v573_v33 = vadd.f32 %v6460_v50, %v572_v29  ;;  %v1207_v35 = vadd.f32 %v6460_v50, %v1206_v31  ;;  %5001 = vmatprep.mubr.msk.bf16.mxu0 %vm406_vm0, %v5735_v22  ;;  %5126 = vmatprep.mubr.msk.bf16.mxu1 %vm406_vm0, %v5737_v24 }
 0x124   :  { %v574_v36 = vpop.f32.mrf.mxu0  ;;  %v1208_v37 = vpop.f32.mrf.mxu1 }
 0x125   :  { %v729_v38 = vmax.f32 %v573_v33, 0.0  ;;  %v1363_v39 = vmax.f32 %v1207_v35, 0.0 }
 0x126   :  { %v575_v40 = vpop.f32.mrf.mxu0  ;;  %v1209_v42 = vpop.f32.mrf.mxu1 }
 0x127   :  { %v6634_v47 = vmax.f32 %v729_v38, %v1363_v39  ;;  %v576_v48 = vadd.f32 %v6460_v50, %v575_v40  ;;  %v1210_v49 = vadd.f32 %v6460_v50, %v1209_v42  ;;  %v5751_v38 = vld [vmem:[%s7455_s0 + $0x3b0] ss:$8 sps:$4 sm:$0xff]   ;;  %v5752_v39 = vld [vmem:[%s7455_s0 + $0x540] ss:$8 sps:$4 sm:$0xff]  }
 0x128   :  { %v577_v53 = vpop.f32.mrf.mxu0  ;;  %v1211_v54 = vpop.f32.mrf.mxu1 }
 0x129   :  { %v730_v55 = vmax.f32 %v576_v48, 0.0  ;;  %v1364_v57 = vmax.f32 %v1210_v49, 0.0  ;;  %v5755_v48 = vld [vmem:[%s7455_s0 + $0x554] ss:$8 sps:$4 sm:$0xff]  }
 0x12a   :  { %v580_v59 = vpop.f32.mrf.mxu0  ;;  %v1214_v60 = vpop.f32.mrf.mxu1  ;;  %1889 = vmatmul.mubr.bf16.gmra.mxu0 %v5739_v44  ;;  %2573 = vmatmul.mubr.bf16.gmra.mxu1 %v5740_v45  ;;  %v5753_v45 = vld [vmem:[%s7455_s0 + $0x3c4] ss:$8 sps:$4 sm:$0xff]  }
 0x12b   :  { %v6644_v61 = vmax.f32 %v730_v55, %v1364_v57  ;;  %v581_v62 = vadd.f32 %v6460_v50, %v580_v59  ;;  %v1215_v0 = vadd.f32 %v6460_v50, %v1214_v60  ;;  %5002 = vmatprep.mubr.msk.bf16.mxu0 %vm406_vm0, %v5741_v51  ;;  %5127 = vmatprep.mubr.msk.bf16.mxu1 %vm406_vm0, %v5743_v52 }
 0x12c   :  { %v582_v1 = vpop.f32.mrf.mxu0  ;;  %v1216_v2 = vpop.f32.mrf.mxu1 }
 0x12d   :  { %v731_v3 = vmax.f32 %v581_v62, 0.0  ;;  %v1365_v4 = vmax.f32 %v1215_v0, 0.0 }
 0x12e   :  { %v583_v7 = vpop.f32.mrf.mxu0  ;;  %v1217_v8 = vpop.f32.mrf.mxu1 }
 0x12f   :  { %v6656_v11 = vmax.f32 %v731_v3, %v1365_v4  ;;  %v584_v13 = vadd.f32 %v6460_v50, %v583_v7  ;;  %v1218_v14 = vadd.f32 %v6460_v50, %v1217_v8  ;;  %v5757_v7 = vld [vmem:[%s7455_s0 + $0x3c0] ss:$8 sps:$4 sm:$0xff]   ;;  %v5758_v8 = vld [vmem:[%s7455_s0 + $0x550] ss:$8 sps:$4 sm:$0xff]  }
 0x130   :  { %v585_v17 = vpop.f32.mrf.mxu0  ;;  %v1219_v20 = vpop.f32.mrf.mxu1 }
 0x131   :  { %v732_v21 = vmax.f32 %v584_v13, 0.0  ;;  %v1366_v22 = vmax.f32 %v1218_v14, 0.0  ;;  %v5759_v14 = vld [vmem:[%s7455_s0 + $0x3d4] ss:$8 sps:$4 sm:$0xff]  }
 0x132   :  { %v588_v24 = vpop.f32.mrf.mxu0  ;;  %v1222_v25 = vpop.f32.mrf.mxu1  ;;  %1897 = vmatmul.mubr.bf16.gmra.mxu0 %v5745_v9  ;;  %2581 = vmatmul.mubr.bf16.gmra.mxu1 %v5746_v10 }
 0x133   :  { %v6666_v26 = vmax.f32 %v732_v21, %v1366_v22  ;;  %v589_v27 = vadd.f32 %v6460_v50, %v588_v24  ;;  %v1223_v28 = vadd.f32 %v6460_v50, %v1222_v25  ;;  %5003 = vmatprep.mubr.msk.bf16.mxu0 %vm406_vm0, %v5747_v15  ;;  %5128 = vmatprep.mubr.msk.bf16.mxu1 %vm406_vm0, %v5749_v16  ;;  %v5761_v15 = vld [vmem:[%s7455_s0 + $0x564] ss:$8 sps:$4 sm:$0xff]  }
 0x134   :  { %v590_v29 = vpop.f32.mrf.mxu0  ;;  %v1224_v31 = vpop.f32.mrf.mxu1 }
 0x135   :  { %v733_v33 = vmax.f32 %v589_v27, 0.0  ;;  %v1367_v35 = vmax.f32 %v1223_v28, 0.0 }
 0x136   :  { %v591_v36 = vpop.f32.mrf.mxu0  ;;  %v1225_v37 = vpop.f32.mrf.mxu1 }
 0x137   :  { %v6678_v40 = vmax.f32 %v733_v33, %v1367_v35  ;;  %v592_v42 = vadd.f32 %v6460_v50, %v591_v36  ;;  %v1226_v44 = vadd.f32 %v6460_v50, %v1225_v37 }
 0x138   :  { %v593_v49 = vpop.f32.mrf.mxu0  ;;  %v1227_v51 = vpop.f32.mrf.mxu1 }
 0x139   :  { %v734_v52 = vmax.f32 %v592_v42, 0.0  ;;  %v1368_v53 = vmax.f32 %v1226_v44, 0.0  ;;  %v5767_v49 = vld [vmem:[%s7455_s0 + $0x574] ss:$8 sps:$4 sm:$0xff]  }
 0x13a   :  { %v596_v54 = vpop.f32.mrf.mxu0  ;;  %v1230_v55 = vpop.f32.mrf.mxu1  ;;  %1905 = vmatmul.mubr.bf16.gmra.mxu0 %v5751_v38  ;;  %2589 = vmatmul.mubr.bf16.gmra.mxu1 %v5752_v39  ;;  %v5763_v38 = vld [vmem:[%s7455_s0 + $0x3d0] ss:$8 sps:$4 sm:$0xff]   ;;  %v5764_v39 = vld [vmem:[%s7455_s0 + $0x560] ss:$8 sps:$4 sm:$0xff]  }
 0x13b   :  { %v6688_v57 = vmax.f32 %v734_v52, %v1368_v53  ;;  %v597_v59 = vadd.f32 %v6460_v50, %v596_v54  ;;  %v1231_v60 = vadd.f32 %v6460_v50, %v1230_v55  ;;  %5004 = vmatprep.mubr.msk.bf16.mxu0 %vm406_vm0, %v5753_v45  ;;  %5129 = vmatprep.mubr.msk.bf16.mxu1 %vm406_vm0, %v5755_v48  ;;  %v5765_v48 = vld [vmem:[%s7455_s0 + $0x3e4] ss:$8 sps:$4 sm:$0xff]  }
 0x13c   :  { %v598_v62 = vpop.f32.mrf.mxu0  ;;  %v1232_v0 = vpop.f32.mrf.mxu1 }
 0x13d   :  { %v735_v1 = vmax.f32 %v597_v59, 0.0  ;;  %v1369_v2 = vmax.f32 %v1231_v60, 0.0 }
 0x13e   :  { %v599_v3 = vpop.f32.mrf.mxu0  ;;  %v1233_v4 = vpop.f32.mrf.mxu1 }
 0x13f   :  { %v6700_v9 = vmax.f32 %v735_v1, %v1369_v2  ;;  %v600_v10 = vadd.f32 %v6460_v50, %v599_v3  ;;  %v1234_v13 = vadd.f32 %v6460_v50, %v1233_v4 }
 0x140   :  { %v601_v16 = vpop.f32.mrf.mxu0  ;;  %v1235_v17 = vpop.f32.mrf.mxu1 }
 0x141   :  { %v736_v20 = vmax.f32 %v600_v10, 0.0  ;;  %v1370_v21 = vmax.f32 %v1234_v13, 0.0  ;;  %v5769_v10 = vld [vmem:[%s7455_s0 + $0x3e0] ss:$8 sps:$4 sm:$0xff]   ;;  %v5770_v13 = vld [vmem:[%s7455_s0 + $0x570] ss:$8 sps:$4 sm:$0xff]  }
 0x142   :  { %v604_v22 = vpop.f32.mrf.mxu0  ;;  %v1238_v24 = vpop.f32.mrf.mxu1  ;;  %1913 = vmatmul.mubr.bf16.gmra.mxu0 %v5757_v7  ;;  %2597 = vmatmul.mubr.bf16.gmra.mxu1 %v5758_v8  ;;  %v5771_v17 = vld [vmem:[%s7455_s0 + $0x3f4] ss:$8 sps:$4 sm:$0xff]  }
 0x143   :  { %v6710_v25 = vmax.f32 %v736_v20, %v1370_v21  ;;  %v605_v27 = vadd.f32 %v6460_v50, %v604_v22  ;;  %v1239_v28 = vadd.f32 %v6460_v50, %v1238_v24  ;;  %5005 = vmatprep.mubr.msk.bf16.mxu0 %vm406_vm0, %v5759_v14  ;;  %5130 = vmatprep.mubr.msk.bf16.mxu1 %vm406_vm0, %v5761_v15  ;;  %v5773_v20 = vld [vmem:[%s7455_s0 + $0x584] ss:$8 sps:$4 sm:$0xff]  }
 0x144   :  { %v606_v29 = vpop.f32.mrf.mxu0  ;;  %v1240_v31 = vpop.f32.mrf.mxu1 }
 0x145   :  { %v737_v33 = vmax.f32 %v605_v27, 0.0  ;;  %v1371_v35 = vmax.f32 %v1239_v28, 0.0 }
 0x146   :  { %v607_v36 = vpop.f32.mrf.mxu0  ;;  %v1241_v37 = vpop.f32.mrf.mxu1 }
 0x147   :  { %v6722_v42 = vmax.f32 %v737_v33, %v1371_v35  ;;  %v608_v44 = vadd.f32 %v6460_v50, %v607_v36  ;;  %v1242_v45 = vadd.f32 %v6460_v50, %v1241_v37 }
 0x148   :  { %v609_v51 = vpop.f32.mrf.mxu0  ;;  %v1243_v52 = vpop.f32.mrf.mxu1 }
 0x149   :  { %v738_v53 = vmax.f32 %v608_v44, 0.0  ;;  %v1372_v54 = vmax.f32 %v1242_v45, 0.0 }
 0x14a   :  { %v612_v55 = vpop.f32.mrf.mxu0  ;;  %v1246_v59 = vpop.f32.mrf.mxu1  ;;  %1921 = vmatmul.mubr.bf16.gmra.mxu0 %v5763_v38  ;;  %2605 = vmatmul.mubr.bf16.gmra.mxu1 %v5764_v39 }
 0x14b   :  { %v6732_v60 = vmax.f32 %v738_v53, %v1372_v54  ;;  %v613_v62 = vadd.f32 %v6460_v50, %v612_v55  ;;  %v1247_v0 = vadd.f32 %v6460_v50, %v1246_v59  ;;  %5006 = vmatprep.mubr.msk.bf16.mxu0 %vm406_vm0, %v5765_v48  ;;  %5131 = vmatprep.mubr.msk.bf16.mxu1 %vm406_vm0, %v5767_v49  ;;  %v5775_v48 = vld [vmem:[%s7455_s0 + $0x3f0] ss:$8 sps:$4 sm:$0xff]   ;;  %v5776_v49 = vld [vmem:[%s7455_s0 + $0x580] ss:$8 sps:$4 sm:$0xff]   ;;  %v5779_v54 = vld [vmem:[%s7455_s0 + $0x404] ss:$8 sps:$4 sm:$0xff]  }
 0x14c   :  { %v614_v1 = vpop.f32.mrf.mxu0  ;;  %v1248_v2 = vpop.f32.mrf.mxu1  ;;  %v5781_v55 = vld [vmem:[%s7455_s0 + $0x594] ss:$8 sps:$4 sm:$0xff]  }
 0x14d   :  { %v739_v3 = vmax.f32 %v613_v62, 0.0  ;;  %v1373_v4 = vmax.f32 %v1247_v0, 0.0 }
 0x14e   :  { %v615_v7 = vpop.f32.mrf.mxu0  ;;  %v1249_v8 = vpop.f32.mrf.mxu1 }
 0x14f   :  { %v6744_v14 = vmax.f32 %v739_v3, %v1373_v4  ;;  %v616_v15 = vadd.f32 %v6460_v50, %v615_v7  ;;  %v1250_v16 = vadd.f32 %v6460_v50, %v1249_v8 }
 0x150   :  { %v617_v21 = vpop.f32.mrf.mxu0  ;;  %v1251_v22 = vpop.f32.mrf.mxu1 }
 0x151   :  { %v740_v24 = vmax.f32 %v616_v15, 0.0  ;;  %v1374_v27 = vmax.f32 %v1250_v16, 0.0  ;;  %v5783_v21 = vld [vmem:[%s7455_s0 + $0x400] ss:$8 sps:$4 sm:$0xff]   ;;  %v5784_v22 = vld [vmem:[%s7455_s0 + $0x590] ss:$8 sps:$4 sm:$0xff]  }
 0x152   :  { %v620_v28 = vpop.f32.mrf.mxu0  ;;  %v1254_v29 = vpop.f32.mrf.mxu1  ;;  %1929 = vmatmul.mubr.bf16.gmra.mxu0 %v5769_v10  ;;  %2613 = vmatmul.mubr.bf16.gmra.mxu1 %v5770_v13 }
 0x153   :  { %v6754_v31 = vmax.f32 %v740_v24, %v1374_v27  ;;  %v621_v33 = vadd.f32 %v6460_v50, %v620_v28  ;;  %v1255_v35 = vadd.f32 %v6460_v50, %v1254_v29  ;;  %5007 = vmatprep.mubr.msk.bf16.mxu0 %vm406_vm0, %v5771_v17  ;;  %5132 = vmatprep.mubr.msk.bf16.mxu1 %vm406_vm0, %v5773_v20  ;;  %v5785_v29 = vld [vmem:[%s7455_s0 + $0x414] ss:$8 sps:$4 sm:$0xff]  }
 0x154   :  { %v622_v36 = vpop.f32.mrf.mxu0  ;;  %v1256_v37 = vpop.f32.mrf.mxu1 }
 0x155   :  { %v741_v38 = vmax.f32 %v621_v33, 0.0  ;;  %v1375_v39 = vmax.f32 %v1255_v35, 0.0  ;;  %v5787_v33 = vld [vmem:[%s7455_s0 + $0x5a4] ss:$8 sps:$4 sm:$0xff]  }
 0x156   :  { %v623_v44 = vpop.f32.mrf.mxu0  ;;  %v1257_v45 = vpop.f32.mrf.mxu1 }
 0x157   :  { %v6766_v51 = vmax.f32 %v741_v38, %v1375_v39  ;;  %v624_v52 = vadd.f32 %v6460_v50, %v623_v44  ;;  %v1258_v53 = vadd.f32 %v6460_v50, %v1257_v45 }
 0x158   :  { %v625_v59 = vpop.f32.mrf.mxu0  ;;  %v1259_v62 = vpop.f32.mrf.mxu1 }
 0x159   :  { %v742_v0 = vmax.f32 %v624_v52, 0.0  ;;  %v1376_v1 = vmax.f32 %v1258_v53, 0.0 }
 0x15a   :  { %v628_v2 = vpop.f32.mrf.mxu0  ;;  %v1262_v3 = vpop.f32.mrf.mxu1  ;;  %1937 = vmatmul.mubr.bf16.gmra.mxu0 %v5775_v48  ;;  %2621 = vmatmul.mubr.bf16.gmra.mxu1 %v5776_v49 }
 0x15b   :  { %v6776_v4 = vmax.f32 %v742_v0, %v1376_v1  ;;  %v629_v7 = vadd.f32 %v6460_v50, %v628_v2  ;;  %v1263_v8 = vadd.f32 %v6460_v50, %v1262_v3  ;;  %5008 = vmatprep.mubr.msk.bf16.mxu0 %vm406_vm0, %v5779_v54  ;;  %5133 = vmatprep.mubr.msk.bf16.mxu1 %vm406_vm0, %v5781_v55  ;;  %v5789_v0 = vld [vmem:[%s7455_s0 + $0x410] ss:$8 sps:$4 sm:$0xff]   ;;  %v5790_v1 = vld [vmem:[%s7455_s0 + $0x5a0] ss:$8 sps:$4 sm:$0xff]  }
 0x15c   :  { %v630_v10 = vpop.f32.mrf.mxu0  ;;  %v1264_v13 = vpop.f32.mrf.mxu1 }
 0x15d   :  { %v743_v15 = vmax.f32 %v629_v7, 0.0  ;;  %v1377_v16 = vmax.f32 %v1263_v8, 0.0  ;;  %v5791_v8 = vld [vmem:[%s7455_s0 + $0x424] ss:$8 sps:$4 sm:$0xff]   ;;  %v5793_v10 = vld [vmem:[%s7455_s0 + $0x5b4] ss:$8 sps:$4 sm:$0xff]  }
 0x15e   :  { %v631_v17 = vpop.f32.mrf.mxu0  ;;  %v1265_v20 = vpop.f32.mrf.mxu1 }
 0x15f   :  { %v6788_v24 = vmax.f32 %v743_v15, %v1377_v16  ;;  %v632_v27 = vadd.f32 %v6460_v50, %v631_v17  ;;  %v1266_v28 = vadd.f32 %v6460_v50, %v1265_v20 }
 0x160   :  { %v633_v35 = vpop.f32.mrf.mxu0  ;;  %v1267_v36 = vpop.f32.mrf.mxu1 }
 0x161   :  { %v744_v37 = vmax.f32 %v632_v27, 0.0  ;;  %v1378_v38 = vmax.f32 %v1266_v28, 0.0 }
 0x162   :  { %v636_v39 = vpop.f32.mrf.mxu0  ;;  %v1270_v44 = vpop.f32.mrf.mxu1  ;;  %1945 = vmatmul.mubr.bf16.gmra.mxu0 %v5783_v21  ;;  %2629 = vmatmul.mubr.bf16.gmra.mxu1 %v5784_v22 }
 0x163   :  { %v6798_v45 = vmax.f32 %v744_v37, %v1378_v38  ;;  %v637_v48 = vadd.f32 %v6460_v50, %v636_v39  ;;  %v1271_v49 = vadd.f32 %v6460_v50, %v1270_v44  ;;  %5009 = vmatprep.mubr.msk.bf16.mxu0 %vm406_vm0, %v5785_v29  ;;  %5134 = vmatprep.mubr.msk.bf16.mxu1 %vm406_vm0, %v5787_v33  ;;  %v5795_v39 = vld [vmem:[%s7455_s0 + $0x420] ss:$8 sps:$4 sm:$0xff]   ;;  %v5796_v44 = vld [vmem:[%s7455_s0 + $0x5b0] ss:$8 sps:$4 sm:$0xff]  }
 0x164   :  { %v638_v52 = vpop.f32.mrf.mxu0  ;;  %v1272_v53 = vpop.f32.mrf.mxu1 }
 0x165   :  { %v745_v54 = vmax.f32 %v637_v48, 0.0  ;;  %v1379_v55 = vmax.f32 %v1271_v49, 0.0  ;;  %v5797_v53 = vld [vmem:[%s7455_s0 + $0x434] ss:$8 sps:$4 sm:$0xff]  }
 0x166   :  { %v639_v59 = vpop.f32.mrf.mxu0  ;;  %v1273_v62 = vpop.f32.mrf.mxu1 }
 0x167   :  { %v6810_v2 = vmax.f32 %v745_v54, %v1379_v55  ;;  %v640_v3 = vadd.f32 %v6460_v50, %v639_v59  ;;  %v1274_v7 = vadd.f32 %v6460_v50, %v1273_v62  ;;  %v5799_v54 = vld [vmem:[%s7455_s0 + $0x5c4] ss:$8 sps:$4 sm:$0xff]  }
 0x168   :  { %v641_v13 = vpop.f32.mrf.mxu0  ;;  %v1275_v15 = vpop.f32.mrf.mxu1 }
 0x169   :  { %v746_v16 = vmax.f32 %v640_v3, 0.0  ;;  %v1380_v17 = vmax.f32 %v1274_v7, 0.0 }
 0x16a   :  { %v644_v20 = vpop.f32.mrf.mxu0  ;;  %v1278_v21 = vpop.f32.mrf.mxu1  ;;  %1953 = vmatmul.mubr.bf16.gmra.mxu0 %v5789_v0  ;;  %2637 = vmatmul.mubr.bf16.gmra.mxu1 %v5790_v1 }
 0x16b   :  { %v6820_v22 = vmax.f32 %v746_v16, %v1380_v17  ;;  %v645_v27 = vadd.f32 %v6460_v50, %v644_v20  ;;  %v1279_v28 = vadd.f32 %v6460_v50, %v1278_v21  ;;  %5010 = vmatprep.mubr.msk.bf16.mxu0 %vm406_vm0, %v5791_v8  ;;  %5135 = vmatprep.mubr.msk.bf16.mxu1 %vm406_vm0, %v5793_v10 }
 0x16c   :  { %v646_v29 = vpop.f32.mrf.mxu0  ;;  %v1280_v33 = vpop.f32.mrf.mxu1 }
 0x16d   :  { %v747_v35 = vmax.f32 %v645_v27, 0.0  ;;  %v1381_v36 = vmax.f32 %v1279_v28, 0.0  ;;  %v5801_v27 = vld [vmem:[%s7455_s0 + $0x430] ss:$8 sps:$4 sm:$0xff]   ;;  %v5802_v28 = vld [vmem:[%s7455_s0 + $0x5c0] ss:$8 sps:$4 sm:$0xff]  }
 0x16e   :  { %v647_v37 = vpop.f32.mrf.mxu0  ;;  %v1281_v38 = vpop.f32.mrf.mxu1 }
 0x16f   :  { %v6832_v48 = vmax.f32 %v747_v35, %v1381_v36  ;;  %v648_v49 = vadd.f32 %v6460_v50, %v647_v37  ;;  %v1282_v52 = vadd.f32 %v6460_v50, %v1281_v38  ;;  %v5803_v36 = vld [vmem:[%s7455_s0 + $0x444] ss:$8 sps:$4 sm:$0xff]   ;;  %v5805_v37 = vld [vmem:[%s7455_s0 + $0x5d4] ss:$8 sps:$4 sm:$0xff]  }
 0x170   :  { %v649_v55 = vpop.f32.mrf.mxu0  ;;  %v1283_v59 = vpop.f32.mrf.mxu1 }
 0x171   :  { %v748_v62 = vmax.f32 %v648_v49, 0.0  ;;  %v1382_v0 = vmax.f32 %v1282_v52, 0.0  ;;  %v6870_v59 = vld [vmem:[%s7457_s2] ss:$0 sm:$0xff] }
 0x172   :  { %v652_v1 = vpop.f32.mrf.mxu0  ;;  %v1286_v3 = vpop.f32.mrf.mxu1  ;;  %1961 = vmatmul.mubr.bf16.gmra.mxu0 %v5795_v39  ;;  %2645 = vmatmul.mubr.bf16.gmra.mxu1 %v5796_v44 }
 0x173   :  { %v6842_v7 = vmax.f32 %v748_v62, %v1382_v0  ;;  %v653_v8 = vadd.f32 %v6460_v50, %v652_v1  ;;  %v1287_v10 = vadd.f32 %v6460_v50, %v1286_v3  ;;  %5011 = vmatprep.mubr.msk.bf16.mxu0 %vm406_vm0, %v5797_v53  ;;  %5136 = vmatprep.mubr.msk.bf16.mxu1 %vm406_vm0, %v5799_v54 }
 0x174   :  { %v654_v13 = vpop.f32.mrf.mxu0  ;;  %v1288_v15 = vpop.f32.mrf.mxu1 }
 0x175   :  { %v749_v16 = vmax.f32 %v653_v8, 0.0  ;;  %v1383_v17 = vmax.f32 %v1287_v10, 0.0  ;;  %v5808_v15 = vld [vmem:[%s7455_s0 + $0x5d0] ss:$8 sps:$4 sm:$0xff]  }
 0x176   :  { %v655_v20 = vpop.f32.mrf.mxu0  ;;  %v1289_v21 = vpop.f32.mrf.mxu1 }
 0x177   :  { %v6854_v29 = vmax.f32 %v749_v16, %v1383_v17  ;;  %v656_v33 = vadd.f32 %v6460_v50, %v655_v20  ;;  %v1290_v35 = vadd.f32 %v6460_v50, %v1289_v21  ;;  %v5809_v21 = vld [vmem:[%s7455_s0 + $0x454] ss:$8 sps:$4 sm:$0xff]  }
 0x178   :  { %v657_v38 = vpop.f32.mrf.mxu0  ;;  %v1291_v39 = vpop.f32.mrf.mxu1 }
 0x179   :  { %v750_v44 = vmax.f32 %v656_v33, 0.0  ;;  %v1384_v49 = vmax.f32 %v1290_v35, 0.0 }
 0x17a   :  { %v660_v52 = vpop.f32.mrf.mxu0  ;;  %v1294_v53 = vpop.f32.mrf.mxu1  ;;  %1969 = vmatmul.mubr.bf16.gmra.mxu0 %v5801_v27  ;;  %2653 = vmatmul.mubr.bf16.gmra.mxu1 %v5802_v28  ;;  %v5811_v27 = vld [vmem:[%s7455_s0 + $0x5e4] ss:$8 sps:$4 sm:$0xff]  }
 0x17b   :  { %v6864_v54 = vmax.f32 %v750_v44, %v1384_v49  ;;  %v661_v55 = vadd.f32 %v6460_v50, %v660_v52  ;;  %v1295_v62 = vadd.f32 %v6870_v59, %v1294_v53  ;;  %5012 = vmatprep.mubr.msk.bf16.mxu0 %vm406_vm0, %v5803_v36  ;;  %5137 = vmatprep.mubr.msk.bf16.mxu1 %vm406_vm0, %v5805_v37  ;;  %v5807_v50 = vld [vmem:[%s7455_s0 + $0x440] ss:$8 sps:$4 sm:$0xff]  }
 0x17c   :  { %v662_v0 = vpop.f32.mrf.mxu0  ;;  %v1296_v1 = vpop.f32.mrf.mxu1 }
 0x17d   :  { %v751_v3 = vmax.f32 %v661_v55, 0.0  ;;  %v1385_v8 = vmax.f32 %v1295_v62, 0.0 }
 0x17e   :  { %v663_v10 = vpop.f32.mrf.mxu0  ;;  %v1297_v13 = vpop.f32.mrf.mxu1 }
 0x17f   :  { %v6881_v16 = vmax.f32 %v751_v3, %v1385_v8  ;;  %v664_v17 = vadd.f32 %v6870_v59, %v663_v10  ;;  %v1298_v20 = vadd.f32 %v6870_v59, %v1297_v13  ;;  %v5813_v3 = vld [vmem:[%s7455_s0 + $0x450] ss:$8 sps:$4 sm:$0xff]   ;;  %v5814_v8 = vld [vmem:[%s7455_s0 + $0x5e0] ss:$8 sps:$4 sm:$0xff]  }
 0x180   :  { %v665_v28 = vpop.f32.mrf.mxu0  ;;  %v1299_v33 = vpop.f32.mrf.mxu1 }
 0x181   :  { %v752_v35 = vmax.f32 %v664_v17, 0.0  ;;  %v1386_v36 = vmax.f32 %v1298_v20, 0.0  ;;  %v5817_v17 = vld [vmem:[%s7455_s0 + $0x5f4] ss:$8 sps:$4 sm:$0xff]  }
 0x182   :  { %v668_v37 = vpop.f32.mrf.mxu0  ;;  %v1302_v38 = vpop.f32.mrf.mxu1  ;;  %1977 = vmatmul.mubr.bf16.gmra.mxu0 %v5807_v50  ;;  %2661 = vmatmul.mubr.bf16.gmra.mxu1 %v5808_v15  ;;  %v5815_v15 = vld [vmem:[%s7455_s0 + $0x464] ss:$8 sps:$4 sm:$0xff]  }
 0x183   :  { %v6891_v39 = vmax.f32 %v752_v35, %v1386_v36  ;;  %v669_v44 = vadd.f32 %v6870_v59, %v668_v37  ;;  %v1303_v49 = vadd.f32 %v6870_v59, %v1302_v38  ;;  %5013 = vmatprep.mubr.msk.bf16.mxu0 %vm406_vm0, %v5809_v21  ;;  %5138 = vmatprep.mubr.msk.bf16.mxu1 %vm406_vm0, %v5811_v27 }
 0x184   :  { %v670_v52 = vpop.f32.mrf.mxu0  ;;  %v1304_v53 = vpop.f32.mrf.mxu1 }
 0x185   :  { %v753_v55 = vmax.f32 %v669_v44, 0.0  ;;  %v1387_v62 = vmax.f32 %v1303_v49, 0.0 }
 0x186   :  { %v671_v0 = vpop.f32.mrf.mxu0  ;;  %v1305_v1 = vpop.f32.mrf.mxu1 }
 0x187   :  { %v6903_v10 = vmax.f32 %v753_v55, %v1387_v62  ;;  %v672_v13 = vadd.f32 %v6870_v59, %v671_v0  ;;  %v1306_v50 = vadd.f32 %v6870_v59, %v1305_v1  ;;  %v5819_v0 = vld [vmem:[%s7455_s0 + $0x460] ss:$8 sps:$4 sm:$0xff]   ;;  %v5820_v1 = vld [vmem:[%s7455_s0 + $0x5f0] ss:$8 sps:$4 sm:$0xff]  }
 0x188   :  { %v673_v20 = vpop.f32.mrf.mxu0  ;;  %v1307_v21 = vpop.f32.mrf.mxu1 }
 0x189   :  { %v754_v27 = vmax.f32 %v672_v13, 0.0  ;;  %v1388_v28 = vmax.f32 %v1306_v50, 0.0  ;;  %v5821_v50 = vld [vmem:[%s7455_s0 + $0x474] ss:$8 sps:$4 sm:$0xff]  }
 0x18a   :  { %v676_v33 = vpop.f32.mrf.mxu0  ;;  %v1310_v35 = vpop.f32.mrf.mxu1  ;;  %1985 = vmatmul.mubr.bf16.gmra.mxu0 %v5813_v3  ;;  %2669 = vmatmul.mubr.bf16.gmra.mxu1 %v5814_v8 }
 0x18b   :  { %v6913_v36 = vmax.f32 %v754_v27, %v1388_v28  ;;  %v677_v37 = vadd.f32 %v6870_v59, %v676_v33  ;;  %v1311_v38 = vadd.f32 %v6870_v59, %v1310_v35  ;;  %5014 = vmatprep.mubr.msk.bf16.mxu0 %vm406_vm0, %v5815_v15  ;;  %5139 = vmatprep.mubr.msk.bf16.mxu1 %vm406_vm0, %v5817_v17  ;;  %v5823_v15 = vld [vmem:[%s7455_s0 + $0x604] ss:$8 sps:$4 sm:$0xff]  }
 0x18c   :  { %v678_v44 = vpop.f32.mrf.mxu0  ;;  %v1312_v49 = vpop.f32.mrf.mxu1 }
 0x18d   :  { %v755_v52 = vmax.f32 %v677_v37, 0.0  ;;  %v1389_v53 = vmax.f32 %v1311_v38, 0.0 }
 0x18e   :  { %v679_v55 = vpop.f32.mrf.mxu0  ;;  %v1313_v62 = vpop.f32.mrf.mxu1 }
 0x18f   :  { %v6925_v3 = vmax.f32 %v755_v52, %v1389_v53  ;;  %v680_v8 = vadd.f32 %v6870_v59, %v679_v55  ;;  %v1314_v13 = vadd.f32 %v6870_v59, %v1313_v62 }
 0x190   :  { %v681_v17 = vpop.f32.mrf.mxu0  ;;  %v1315_v20 = vpop.f32.mrf.mxu1 }
 0x191   :  { %v756_v21 = vmax.f32 %v680_v8, 0.0  ;;  %v1390_v27 = vmax.f32 %v1314_v13, 0.0  ;;  %v5829_v17 = vld [vmem:[%s7455_s0 + $0x614] ss:$8 sps:$4 sm:$0xff]  }
 0x192   :  { %v684_v28 = vpop.f32.mrf.mxu0  ;;  %v1318_v33 = vpop.f32.mrf.mxu1  ;;  %1993 = vmatmul.mubr.bf16.gmra.mxu0 %v5819_v0  ;;  %2677 = vmatmul.mubr.bf16.gmra.mxu1 %v5820_v1  ;;  %v5825_v0 = vld [vmem:[%s7455_s0 + $0x470] ss:$8 sps:$4 sm:$0xff]   ;;  %v5826_v1 = vld [vmem:[%s7455_s0 + $0x600] ss:$8 sps:$4 sm:$0xff]  }
 0x193   :  { %v6935_v35 = vmax.f32 %v756_v21, %v1390_v27  ;;  %v685_v37 = vadd.f32 %v6870_v59, %v684_v28  ;;  %v1319_v38 = vadd.f32 %v6870_v59, %v1318_v33  ;;  %5015 = vmatprep.mubr.msk.bf16.mxu0 %vm406_vm0, %v5821_v50  ;;  %5140 = vmatprep.mubr.msk.bf16.mxu1 %vm406_vm0, %v5823_v15  ;;  %v5827_v15 = vld [vmem:[%s7455_s0 + $0x484] ss:$8 sps:$4 sm:$0xff]  }
 0x194   :  { %v686_v44 = vpop.f32.mrf.mxu0  ;;  %v1320_v49 = vpop.f32.mrf.mxu1 }
 0x195   :  { %v757_v52 = vmax.f32 %v685_v37, 0.0  ;;  %v1391_v53 = vmax.f32 %v1319_v38, 0.0 }
 0x196   :  { %v687_v55 = vpop.f32.mrf.mxu0  ;;  %v1321_v62 = vpop.f32.mrf.mxu1 }
 0x197   :  { %v6947_v8 = vmax.f32 %v757_v52, %v1391_v53  ;;  %v688_v13 = vadd.f32 %v6870_v59, %v687_v55  ;;  %v1322_v50 = vadd.f32 %v6870_v59, %v1321_v62 }
 0x198   :  { %v689_v20 = vpop.f32.mrf.mxu0  ;;  %v1323_v21 = vpop.f32.mrf.mxu1 }
 0x199   :  { %7470 = vst [vmem:[#allocation2_spill] sm:$0xff] %v6947_v8  ;;  %v758_v27 = vmax.f32 %v688_v13, 0.0  ;;  %v1392_v28 = vmax.f32 %v1322_v50, 0.0  ;;  %v5833_v21 = vld [vmem:[%s7455_s0 + $0x494] ss:$8 sps:$4 sm:$0xff]  }
 0x19a   :  { %v692_v33 = vpop.f32.mrf.mxu0  ;;  %v1326_v37 = vpop.f32.mrf.mxu1  ;;  %2001 = vmatmul.mubr.bf16.gmra.mxu0 %v5825_v0  ;;  %2685 = vmatmul.mubr.bf16.gmra.mxu1 %v5826_v1  ;;  %v5831_v0 = vld [vmem:[%s7455_s0 + $0x480] ss:$8 sps:$4 sm:$0xff]   ;;  %v5832_v1 = vld [vmem:[%s7455_s0 + $0x610] ss:$8 sps:$4 sm:$0xff]  }
 0x19b   :  { %v6957_v38 = vmax.f32 %v758_v27, %v1392_v28  ;;  %v693_v44 = vadd.f32 %v6870_v59, %v692_v33  ;;  %v1327_v49 = vadd.f32 %v6870_v59, %v1326_v37  ;;  %5016 = vmatprep.mubr.msk.bf16.mxu0 %vm406_vm0, %v5827_v15  ;;  %5141 = vmatprep.mubr.msk.bf16.mxu1 %vm406_vm0, %v5829_v17  ;;  %v5835_v27 = vld [vmem:[%s7455_s0 + $0x624] ss:$8 sps:$4 sm:$0xff]  }
 0x19c   :  { %v694_v52 = vpop.f32.mrf.mxu0  ;;  %v1328_v53 = vpop.f32.mrf.mxu1 }
 0x19d   :  { %7471 = vst [vmem:[#allocation3_spill] sm:$0xff] %v6957_v38  ;;  %v759_v55 = vmax.f32 %v693_v44, 0.0  ;;  %v1393_v62 = vmax.f32 %v1327_v49, 0.0 }
 0x19e   :  { %v695_v13 = vpop.f32.mrf.mxu0  ;;  %v1329_v50 = vpop.f32.mrf.mxu1 }
 0x19f   :  { %v6969_v20 = vmax.f32 %v759_v55, %v1393_v62  ;;  %v696_v15 = vadd.f32 %v6870_v59, %v695_v13  ;;  %v1330_v17 = vadd.f32 %v6870_v59, %v1329_v50 }
 0x1a0   :  { %v697_v28 = vpop.f32.mrf.mxu0  ;;  %v1331_v33 = vpop.f32.mrf.mxu1 }
 0x1a1   :  { %7472 = vst [vmem:[#allocation4_spill] sm:$0xff] %v6969_v20  ;;  %v760_v37 = vmax.f32 %v696_v15, 0.0  ;;  %v1394_v44 = vmax.f32 %v1330_v17, 0.0 }
 0x1a2   :  { %v700_v49 = vpop.f32.mrf.mxu0  ;;  %v1334_v52 = vpop.f32.mrf.mxu1  ;;  %2009 = vmatmul.mubr.bf16.gmra.mxu0 %v5831_v0  ;;  %2693 = vmatmul.mubr.bf16.gmra.mxu1 %v5832_v1  ;;  %v5837_v0 = vld [vmem:[%s7455_s0 + $0x490] ss:$8 sps:$4 sm:$0xff]   ;;  %v5838_v1 = vld [vmem:[%s7455_s0 + $0x620] ss:$8 sps:$4 sm:$0xff]  }
 0x1a3   :  { %v6979_v53 = vmax.f32 %v760_v37, %v1394_v44  ;;  %v701_v55 = vadd.f32 %v6870_v59, %v700_v49  ;;  %v1335_v62 = vadd.f32 %v6870_v59, %v1334_v52  ;;  %5017 = vmatprep.mubr.msk.bf16.mxu0 %vm406_vm0, %v5833_v21  ;;  %5142 = vmatprep.mubr.msk.bf16.mxu1 %vm406_vm0, %v5835_v27  ;;  %v5839_v44 = vld [vmem:[%s7455_s0 + $0x4a4] ss:$8 sps:$4 sm:$0xff]   ;;  %v5841_v49 = vld [vmem:[%s7455_s0 + $0x634] ss:$8 sps:$4 sm:$0xff]  }
 0x1a4   :  { %v702_v13 = vpop.f32.mrf.mxu0  ;;  %v1336_v50 = vpop.f32.mrf.mxu1 }
 0x1a5   :  { %7473 = vst [vmem:[#allocation5_spill] sm:$0xff] %v6979_v53  ;;  %v761_v28 = vmax.f32 %v701_v55, 0.0  ;;  %v1395_v33 = vmax.f32 %v1335_v62, 0.0  ;;  %v7478_v53 = vmov 0.0  }
 0x1a6   :  { %v703_v15 = vpop.f32.mrf.mxu0  ;;  %v1337_v17 = vpop.f32.mrf.mxu1 }
 0x1a7   :  { %v6991_v37 = vmax.f32 %v761_v28, %v1395_v33  ;;  %v704_v21 = vadd.f32 %v6870_v59, %v703_v15  ;;  %v1338_v27 = vadd.f32 %v6870_v59, %v1337_v17 }
 0x1a8   :  { %v705_v52 = vpop.f32.mrf.mxu0  ;;  %v1339_v55 = vpop.f32.mrf.mxu1 }
 0x1a9   :  { %7474 = vst [vmem:[#allocation6_spill] sm:$0xff] %v6991_v37  ;;  %v762_v62 = vmax.f32 %v704_v21, 0.0  ;;  %v1396_v13 = vmax.f32 %v1338_v27, 0.0 }
 0x1aa   :  { %v708_v50 = vpop.f32.mrf.mxu0  ;;  %v1342_v41 = vpop.f32.mrf.mxu1  ;;  %2017 = vmatmul.mubr.bf16.gmra.mxu0 %v5837_v0  ;;  %2701 = vmatmul.mubr.bf16.gmra.mxu1 %v5838_v1  ;;  %v5843_v0 = vld [vmem:[%s7455_s0 + $0x4a0] ss:$8 sps:$4 sm:$0xff]   ;;  %v5844_v1 = vld [vmem:[%s7455_s0 + $0x630] ss:$8 sps:$4 sm:$0xff]  }
 0x1ab   :  { %v7001_v28 = vmax.f32 %v762_v62, %v1396_v13  ;;  %v709_v33 = vadd.f32 %v6870_v59, %v708_v50  ;;  %v1343_v15 = vadd.f32 %v6870_v59, %v1342_v41  ;;  %5018 = vmatprep.mubr.msk.bf16.mxu0 %vm406_vm0, %v5839_v44  ;;  %5143 = vmatprep.mubr.msk.bf16.mxu1 %vm406_vm0, %v5841_v49 }
 0x1ac   :  { %v710_v17 = vpop.f32.mrf.mxu0  ;;  %v1344_v37 = vpop.f32.mrf.mxu1 }
 0x1ad   :  { %7475 = vst [vmem:[#allocation7_spill] sm:$0xff] %v7001_v28  ;;  %v763_v52 = vmax.f32 %v709_v33, 0.0  ;;  %v1397_v55 = vmax.f32 %v1343_v15, 0.0 }
 0x1ae   :  { %v711_v21 = vpop.f32.mrf.mxu0  ;;  %v1345_v27 = vpop.f32.mrf.mxu1 }
 0x1af   :  { %v7013_v62 = vmax.f32 %v763_v52, %v1397_v55  ;;  %v712_v41 = vadd.f32 %v6870_v59, %v711_v21  ;;  %v1346_v44 = vadd.f32 %v6870_v59, %v1345_v27 }
 0x1b0   :  { %v713_v49 = vpop.f32.mrf.mxu0  ;;  %v1347_v37 = vpop.f32.mrf.mxu1 }
 0x1b1   :  { %7476 = vst [vmem:[#allocation8_spill] sm:$0xff] %v7013_v62  ;;  %v764_v13 = vmax.f32 %v712_v41, 0.0  ;;  %v1398_v50 = vmax.f32 %v1346_v44, 0.0 }
 0x1b2   :  { %v1834_v33 = vpop.f32.mrf.mxu0  ;;  %2025 = vmatmul.mubr.bf16.gmra.mxu0 %v5843_v0  ;;  %v2518_v15 = vpop.f32.mrf.mxu1  ;;  %2709 = vmatmul.mubr.bf16.gmra.mxu1 %v5844_v1 }
 0x1b3   :  { %v7017_v17 = vmax.f32 %v764_v13, %v1398_v50  ;;  %v1835_v28 = vadd.f32 %v6870_v59, %v1834_v33  ;;  %5337 = vmatprep.mubr.msk.bf16.mxu0 %vm5896_vm1, %v7478_v53  ;;  %5343 = vmatprep.mubr.msk.bf16.mxu1 %vm5896_vm1, %v7478_v53  ;;  %v2519_v27 = vadd.f32 %v6870_v59, %v2518_v15 }
 0x1b4   :  { %v1836_v52 = vpop.f32.mrf.mxu0  ;;  %v2520_v55 = vpop.f32.mrf.mxu1 }
 0x1b5   :  { %7477 = vst [vmem:[#allocation9_spill] sm:$0xff] %v7017_v17  ;;  %v2033_v21 = vmax.f32 %v1835_v28, 0.0  ;;  %v2717_v50 = vmax.f32 %v2519_v27, 0.0 }
 0x1b6   :  { %v1837_v41 = vpop.f32.mrf.mxu0  ;;  %v2521_v0 = vpop.f32.mrf.mxu1 }
 0x1b7   :  { %v1838_v1 = vadd.f32 %v6870_v59, %v1837_v41  ;;  %v2522_v44 = vadd.f32 %v6870_v59, %v2521_v0  ;;  %v2083_v13 = vmax.f32 %v6472_v63, %v2033_v21  ;;  %v5845_v63 = vld [vmem:[%s7456_s3 + $0x10] sm:$0xff]  }
 0x1b8   :  { %v1839_v49 = vpop.f32.mrf.mxu0  ;;  %v2523_v37 = vpop.f32.mrf.mxu1 }
 0x1b9   :  { %v2034_v33 = vmax.f32 %v1838_v1, 0.0  ;;  %v2718_v55 = vmax.f32 %v2522_v44, 0.0  ;;  %v2767_v38 = vmax.f32 %v2083_v13, %v2717_v50 }
 0x1ba   :  { %v1842_v17 = vpop.f32.mrf.mxu0  ;;  %v2526_v62 = vpop.f32.mrf.mxu1 }
 0x1bb   :  { %v2084_v52 = vmax.f32 %v6488_v12, %v2034_v33  ;;  %v1843_v28 = vadd.f32 %v6870_v59, %v1842_v17  ;;  %v2527_v0 = vadd.f32 %v6870_v59, %v2526_v62 }
 0x1bc   :  { %v1844_v15 = vpop.f32.mrf.mxu0  ;;  %v2528_v20 = vpop.f32.mrf.mxu1 }
 0x1bd   :  { %v2768_v8 = vmax.f32 %v2084_v52, %v2718_v55  ;;  %v2035_v41 = vmax.f32 %v1843_v28, 0.0  ;;  %v2719_v44 = vmax.f32 %v2527_v0, 0.0 }
 0x1be   :  { %v1845_v49 = vpop.f32.mrf.mxu0  ;;  %v2529_v37 = vpop.f32.mrf.mxu1 }
 0x1bf   :  { %v2817_v21 = vpack.c.bf16 %v2768_v8, %v2767_v38  ;;  %v1846_v12 = vadd.f32 %v6870_v59, %v1845_v49  ;;  %v2530_v27 = vadd.f32 %v6870_v59, %v2529_v37  ;;  %v2085_v20 = vmax.f32 %v6502_v23, %v2035_v41  ;;  %v5846_v37 = vld [vmem:[%s7456_s3 + $0x18] sm:$0xff]  }
 0x1c0   :  { %v1847_v17 = vpop.f32.mrf.mxu0  ;;  %v2531_v1 = vpop.f32.mrf.mxu1 }
 0x1c1   :  { %v2036_v13 = vmax.f32 %v1846_v12, 0.0  ;;  %5338 = vmatmul.mubr.msk.bf16.vlgmr.msra.gmra.mxu0 %vm2858_vm2, %v2817_v21  ;;  %v2720_v38 = vmax.f32 %v2530_v27, 0.0  ;;  %v2769_v23 = vmax.f32 %v2085_v20, %v2719_v44 }
 0x1c2   :  { %v1850_v62 = vpop.f32.mrf.mxu0  ;;  %v2534_v50 = vpop.f32.mrf.mxu1  ;;  %5348 = vmatpush3.bf16.msra.mxu0 %v5845_v63  ;;  %5349 = vmatprep.mubr.msk.bf16.mxu0 %vm5896_vm1, %v7478_v53 }
 0x1c3   :  { %v2086_v8 = vmax.f32 %v6512_v34, %v2036_v13  ;;  %v1851_v33 = vadd.f32 %v6870_v59, %v1850_v62  ;;  %5359 = vmatprep.subr.bf16.mxu0 %v7478_v53  ;;  %v2535_v41 = vadd.f32 %v6870_v59, %v2534_v50 }
 0x1c4   :  { %v1852_v52 = vpop.f32.mrf.mxu0  ;;  %v2536_v55 = vpop.f32.mrf.mxu1 }
 0x1c5   :  { %v2770_v28 = vmax.f32 %v2086_v8, %v2720_v38  ;;  %v2037_v15 = vmax.f32 %v1851_v33, 0.0  ;;  %v2721_v1 = vmax.f32 %v2535_v41, 0.0  ;;  %v5847_v41 = vld [vmem:[%s7456_s3 + $0x20] sm:$0xff]  }
 0x1c6   :  { %v1853_v0 = vpop.f32.mrf.mxu0  ;;  %v2537_v49 = vpop.f32.mrf.mxu1 }
 0x1c7   :  { %v2818_v63 = vpack.c.bf16 %v2770_v28, %v2769_v23  ;;  %v1854_v34 = vadd.f32 %v6870_v59, %v1853_v0  ;;  %v2538_v21 = vadd.f32 %v6870_v59, %v2537_v49  ;;  %v2087_v17 = vmax.f32 %v6524_v46, %v2037_v15 }
 0x1c8   :  { %v1855_v12 = vpop.f32.mrf.mxu0  ;;  %v2539_v27 = vpop.f32.mrf.mxu1 }
 0x1c9   :  { %v2038_v20 = vmax.f32 %v1854_v34, 0.0  ;;  %5344 = vmatmul.mubr.msk.bf16.vlgmr.msra.gmra.mxu1 %vm2858_vm2, %v2818_v63  ;;  %v2722_v50 = vmax.f32 %v2538_v21, 0.0  ;;  %v2771_v46 = vmax.f32 %v2087_v17, %v2721_v1 }
 0x1ca   :  { %v1858_v44 = vpop.f32.mrf.mxu0  ;;  %v2542_v13 = vpop.f32.mrf.mxu1  ;;  %5354 = vmatpush3.bf16.msra.mxu1 %v5846_v37  ;;  %5355 = vmatprep.mubr.msk.bf16.mxu1 %vm5896_vm1, %v7478_v53 }
 0x1cb   :  { %v2088_v62 = vmax.f32 %v6534_v58, %v2038_v20  ;;  %v1859_v8 = vadd.f32 %v6870_v59, %v1858_v44  ;;  %5365 = vmatprep.subr.bf16.mxu1 %v7478_v53  ;;  %v2543_v23 = vadd.f32 %v6870_v59, %v2542_v13 }
 0x1cc   :  { %v1860_v38 = vpop.f32.mrf.mxu0  ;;  %v2544_v33 = vpop.f32.mrf.mxu1 }
 0x1cd   :  { %v2772_v52 = vmax.f32 %v2088_v62, %v2722_v50  ;;  %v2039_v55 = vmax.f32 %v1859_v8, 0.0  ;;  %v2723_v21 = vmax.f32 %v2543_v23, 0.0 }
 0x1ce   :  { %v1861_v28 = vpop.f32.mrf.mxu0  ;;  %v2545_v15 = vpop.f32.mrf.mxu1 }
 0x1cf   :  { %v2819_v0 = vpack.c.bf16 %v2772_v52, %v2771_v46  ;;  %v1862_v58 = vadd.f32 %v6870_v59, %v1861_v28  ;;  %v2546_v49 = vadd.f32 %v6870_v59, %v2545_v15  ;;  %v2089_v34 = vmax.f32 %v6546_v6, %v2039_v55  ;;  %v5848_v52 = vld [vmem:[%s7456_s3 + $0x28] sm:$0xff]  }
 0x1d0   :  { %v1863_v37 = vpop.f32.mrf.mxu0  ;;  %v2547_v63 = vpop.f32.mrf.mxu1 }
 0x1d1   :  { %v2040_v12 = vmax.f32 %v1862_v58, 0.0  ;;  %5350 = vmatmul.mubr.msk.bf16.vlgmr.msra.gmra.mxu0 %vm2858_vm2, %v2819_v0  ;;  %v2724_v20 = vmax.f32 %v2546_v49, 0.0  ;;  %v2773_v6 = vmax.f32 %v2089_v34, %v2723_v21 }
 0x1d2   :  { %v1866_v27 = vpop.f32.mrf.mxu0  ;;  %v2550_v17 = vpop.f32.mrf.mxu1  ;;  %5360 = vmatpush3.bf16.msra.mxu0 %v5847_v41  ;;  %5361 = vmatprep.mubr.msk.bf16.mxu0 %vm5896_vm1, %v7478_v53 }
 0x1d3   :  { %v2090_v1 = vmax.f32 %v6556_v18, %v2040_v12  ;;  %v1867_v44 = vadd.f32 %v6870_v59, %v1866_v27  ;;  %5371 = vmatprep.subr.bf16.mxu0 %v7478_v53  ;;  %v2551_v38 = vadd.f32 %v6870_v59, %v2550_v17 }
 0x1d4   :  { %v1868_v13 = vpop.f32.mrf.mxu0  ;;  %v2552_v62 = vpop.f32.mrf.mxu1 }
 0x1d5   :  { %v2774_v50 = vmax.f32 %v2090_v1, %v2724_v20  ;;  %v2041_v8 = vmax.f32 %v1867_v44, 0.0  ;;  %v2725_v0 = vmax.f32 %v2551_v38, 0.0  ;;  %v5849_v62 = vld [vmem:[%s7456_s3 + $0x30] sm:$0xff]  }
 0x1d6   :  { %v1869_v33 = vpop.f32.mrf.mxu0  ;;  %v2553_v46 = vpop.f32.mrf.mxu1 }
 0x1d7   :  { %v2820_v55 = vpack.c.bf16 %v2774_v50, %v2773_v6  ;;  %v1870_v18 = vadd.f32 %v6870_v59, %v1869_v33  ;;  %v2554_v23 = vadd.f32 %v6870_v59, %v2553_v46  ;;  %v2091_v41 = vmax.f32 %v6568_v30, %v2041_v8 }
 0x1d8   :  { %v1871_v28 = vpop.f32.mrf.mxu0  ;;  %v2555_v15 = vpop.f32.mrf.mxu1 }
 0x1d9   :  { %v2042_v58 = vmax.f32 %v1870_v18, 0.0  ;;  %5356 = vmatmul.mubr.msk.bf16.vlgmr.msra.gmra.mxu1 %vm2858_vm2, %v2820_v55  ;;  %v2726_v34 = vmax.f32 %v2554_v23, 0.0  ;;  %v2775_v30 = vmax.f32 %v2091_v41, %v2725_v0 }
 0x1da   :  { %v1874_v49 = vpop.f32.mrf.mxu0  ;;  %v2558_v37 = vpop.f32.mrf.mxu1  ;;  %5366 = vmatpush3.bf16.msra.mxu1 %v5848_v52  ;;  %5367 = vmatprep.mubr.msk.bf16.mxu1 %vm5896_vm1, %v7478_v53 }
 0x1db   :  { %v2092_v63 = vmax.f32 %v6578_v43, %v2042_v58  ;;  %v1875_v21 = vadd.f32 %v6870_v59, %v1874_v49  ;;  %5377 = vmatprep.subr.bf16.mxu1 %v7478_v53  ;;  %v2559_v20 = vadd.f32 %v6870_v59, %v2558_v37 }
 0x1dc   :  { %v1876_v12 = vpop.f32.mrf.mxu0  ;;  %v2560_v27 = vpop.f32.mrf.mxu1 }
 0x1dd   :  { %v2776_v17 = vmax.f32 %v2092_v63, %v2726_v34  ;;  %v2043_v1 = vmax.f32 %v1875_v21, 0.0  ;;  %v2727_v46 = vmax.f32 %v2559_v20, 0.0  ;;  %v5850_v21 = vld [vmem:[%s7456_s3 + $0x38] sm:$0xff]  }
 0x1de   :  { %v1877_v44 = vpop.f32.mrf.mxu0  ;;  %v2561_v13 = vpop.f32.mrf.mxu1 }
 0x1df   :  { %v2821_v6 = vpack.c.bf16 %v2776_v17, %v2775_v30  ;;  %v1878_v43 = vadd.f32 %v6870_v59, %v1877_v44  ;;  %v2562_v50 = vadd.f32 %v6870_v59, %v2561_v13  ;;  %v2093_v33 = vmax.f32 %v6590_v56, %v2043_v1 }
 0x1e0   :  { %v1879_v8 = vpop.f32.mrf.mxu0  ;;  %v2563_v38 = vpop.f32.mrf.mxu1 }
 0x1e1   :  { %v2044_v52 = vmax.f32 %v1878_v43, 0.0  ;;  %5362 = vmatmul.mubr.msk.bf16.vlgmr.msra.gmra.mxu0 %vm2858_vm2, %v2821_v6  ;;  %v2728_v28 = vmax.f32 %v2562_v50, 0.0  ;;  %v2777_v56 = vmax.f32 %v2093_v33, %v2727_v46 }
 0x1e2   :  { %v1882_v55 = vpop.f32.mrf.mxu0  ;;  %v2566_v18 = vpop.f32.mrf.mxu1  ;;  %5372 = vmatpush3.bf16.msra.mxu0 %v5849_v62  ;;  %5373 = vmatprep.mubr.msk.bf16.mxu0 %vm5896_vm1, %v7478_v53 }
 0x1e3   :  { %v2094_v23 = vmax.f32 %v6600_v5, %v2044_v52  ;;  %v1883_v15 = vadd.f32 %v6870_v59, %v1882_v55  ;;  %5383 = vmatprep.subr.bf16.mxu0 %v7478_v53  ;;  %v2567_v37 = vadd.f32 %v6870_v59, %v2566_v18 }
 0x1e4   :  { %v1884_v41 = vpop.f32.mrf.mxu0  ;;  %v2568_v0 = vpop.f32.mrf.mxu1 }
 0x1e5   :  { %v2778_v58 = vmax.f32 %v2094_v23, %v2728_v28  ;;  %v2045_v49 = vmax.f32 %v1883_v15, 0.0  ;;  %v2729_v20 = vmax.f32 %v2567_v37, 0.0  ;;  %v5851_v23 = vld [vmem:[%s7456_s3 + $0x40] sm:$0xff]  }
 0x1e6   :  { %v1885_v63 = vpop.f32.mrf.mxu0  ;;  %v2569_v34 = vpop.f32.mrf.mxu1 }
 0x1e7   :  { %v2822_v12 = vpack.c.bf16 %v2778_v58, %v2777_v56  ;;  %v1886_v5 = vadd.f32 %v6870_v59, %v1885_v63  ;;  %v2570_v27 = vadd.f32 %v6870_v59, %v2569_v34  ;;  %v2095_v1 = vmax.f32 %v6612_v19, %v2045_v49 }
 0x1e8   :  { %v1887_v30 = vpop.f32.mrf.mxu0  ;;  %v2571_v17 = vpop.f32.mrf.mxu1 }
 0x1e9   :  { %v2046_v44 = vmax.f32 %v1886_v5, 0.0  ;;  %5368 = vmatmul.mubr.msk.bf16.vlgmr.msra.gmra.mxu1 %vm2858_vm2, %v2822_v12  ;;  %v2730_v43 = vmax.f32 %v2570_v27, 0.0  ;;  %v2779_v19 = vmax.f32 %v2095_v1, %v2729_v20 }
 0x1ea   :  { %v1890_v13 = vpop.f32.mrf.mxu0  ;;  %v2574_v62 = vpop.f32.mrf.mxu1  ;;  %5378 = vmatpush3.bf16.msra.mxu1 %v5850_v21  ;;  %5379 = vmatprep.mubr.msk.bf16.mxu1 %vm5896_vm1, %v7478_v53 }
 0x1eb   :  { %v2096_v6 = vmax.f32 %v6622_v32, %v2046_v44  ;;  %v1891_v50 = vadd.f32 %v6870_v59, %v1890_v13  ;;  %5389 = vmatprep.subr.bf16.mxu1 %v7478_v53  ;;  %v2575_v52 = vadd.f32 %v6870_v59, %v2574_v62  ;;  %v5852_v13 = vld [vmem:[%s7456_s3 + $0x48] sm:$0xff]  }
 0x1ec   :  { %v1892_v8 = vpop.f32.mrf.mxu0  ;;  %v2576_v38 = vpop.f32.mrf.mxu1 }
 0x1ed   :  { %v2780_v33 = vmax.f32 %v2096_v6, %v2730_v43  ;;  %v2047_v46 = vmax.f32 %v1891_v50, 0.0  ;;  %v2731_v58 = vmax.f32 %v2575_v52, 0.0 }
 0x1ee   :  { %v1893_v55 = vpop.f32.mrf.mxu0  ;;  %v2577_v18 = vpop.f32.mrf.mxu1 }
 0x1ef   :  { %v2823_v28 = vpack.c.bf16 %v2780_v33, %v2779_v19  ;;  %v1894_v32 = vadd.f32 %v6870_v59, %v1893_v55  ;;  %v2578_v15 = vadd.f32 %v6870_v59, %v2577_v18  ;;  %v2097_v56 = vmax.f32 %v6634_v47, %v2047_v46 }
 0x1f0   :  { %v1895_v41 = vpop.f32.mrf.mxu0  ;;  %v2579_v0 = vpop.f32.mrf.mxu1 }
 0x1f1   :  { %v2048_v49 = vmax.f32 %v1894_v32, 0.0  ;;  %5374 = vmatmul.mubr.msk.bf16.vlgmr.msra.gmra.mxu0 %vm2858_vm2, %v2823_v28  ;;  %v2732_v21 = vmax.f32 %v2578_v15, 0.0  ;;  %v2781_v47 = vmax.f32 %v2097_v56, %v2731_v58  ;;  %v5853_v58 = vld [vmem:[%s7456_s3 + $0x50] sm:$0xff]  }
 0x1f2   :  { %v1898_v37 = vpop.f32.mrf.mxu0  ;;  %v2582_v63 = vpop.f32.mrf.mxu1  ;;  %5384 = vmatpush3.bf16.msra.mxu0 %v5851_v23  ;;  %5385 = vmatprep.mubr.msk.bf16.mxu0 %vm5896_vm1, %v7478_v53 }
 0x1f3   :  { %v2098_v34 = vmax.f32 %v6644_v61, %v2048_v49  ;;  %v1899_v12 = vadd.f32 %v6870_v59, %v1898_v37  ;;  %5395 = vmatprep.subr.bf16.mxu0 %v7478_v53  ;;  %v2583_v1 = vadd.f32 %v6870_v59, %v2582_v63 }
 0x1f4   :  { %v1900_v5 = vpop.f32.mrf.mxu0  ;;  %v2584_v27 = vpop.f32.mrf.mxu1 }
 0x1f5   :  { %v2782_v30 = vmax.f32 %v2098_v34, %v2732_v21  ;;  %v2049_v17 = vmax.f32 %v1899_v12, 0.0  ;;  %v2733_v38 = vmax.f32 %v2583_v1, 0.0 }
 0x1f6   :  { %v1901_v20 = vpop.f32.mrf.mxu0  ;;  %v2585_v44 = vpop.f32.mrf.mxu1 }
 0x1f7   :  { %v2824_v62 = vpack.c.bf16 %v2782_v30, %v2781_v47  ;;  %v1902_v61 = vadd.f32 %v6870_v59, %v1901_v20  ;;  %v2586_v6 = vadd.f32 %v6870_v59, %v2585_v44  ;;  %v2099_v8 = vmax.f32 %v6656_v11, %v2049_v17 }
 0x1f8   :  { %v1903_v43 = vpop.f32.mrf.mxu0  ;;  %v2587_v50 = vpop.f32.mrf.mxu1 }
 0x1f9   :  { %v2050_v19 = vmax.f32 %v1902_v61, 0.0  ;;  %5380 = vmatmul.mubr.msk.bf16.vlgmr.msra.gmra.mxu1 %vm2858_vm2, %v2824_v62  ;;  %v2734_v55 = vmax.f32 %v2586_v6, 0.0  ;;  %v2783_v11 = vmax.f32 %v2099_v8, %v2733_v38  ;;  %v5854_v50 = vld [vmem:[%s7456_s3 + $0x58] sm:$0xff]  }
 0x1fa   :  { %v1906_v33 = vpop.f32.mrf.mxu0  ;;  %v2590_v46 = vpop.f32.mrf.mxu1  ;;  %5390 = vmatpush3.bf16.msra.mxu1 %v5852_v13  ;;  %5391 = vmatprep.mubr.msk.bf16.mxu1 %vm5896_vm1, %v7478_v53 }
 0x1fb   :  { %v2100_v52 = vmax.f32 %v6666_v26, %v2050_v19  ;;  %v1907_v18 = vadd.f32 %v6870_v59, %v1906_v33  ;;  %5401 = vmatprep.subr.bf16.mxu1 %v7478_v53  ;;  %v2591_v41 = vadd.f32 %v6870_v59, %v2590_v46 }
 0x1fc   :  { %v1908_v23 = vpop.f32.mrf.mxu0  ;;  %v2592_v28 = vpop.f32.mrf.mxu1 }
 0x1fd   :  { %v2784_v32 = vmax.f32 %v2100_v52, %v2734_v55  ;;  %v2051_v15 = vmax.f32 %v1907_v18, 0.0  ;;  %v2735_v12 = vmax.f32 %v2591_v41, 0.0 }
 0x1fe   :  { %v1909_v0 = vpop.f32.mrf.mxu0  ;;  %v2593_v56 = vpop.f32.mrf.mxu1 }
 0x1ff   :  { %v2825_v49 = vpack.c.bf16 %v2784_v32, %v2783_v11  ;;  %v1910_v26 = vadd.f32 %v6870_v59, %v1909_v0  ;;  %v2594_v37 = vadd.f32 %v6870_v59, %v2593_v56  ;;  %v2101_v21 = vmax.f32 %v6678_v40, %v2051_v15 }
 0x200   :  { %v1911_v63 = vpop.f32.mrf.mxu0  ;;  %v2595_v34 = vpop.f32.mrf.mxu1 }
 0x201   :  { %v2052_v5 = vmax.f32 %v1910_v26, 0.0  ;;  %5386 = vmatmul.mubr.msk.bf16.vlgmr.msra.gmra.mxu0 %vm2858_vm2, %v2825_v49  ;;  %v2736_v17 = vmax.f32 %v2594_v37, 0.0  ;;  %v2785_v40 = vmax.f32 %v2101_v21, %v2735_v12  ;;  %v5855_v37 = vld [vmem:[%s7456_s3 + $0x60] sm:$0xff]  }
 0x202   :  { %v1914_v27 = vpop.f32.mrf.mxu0  ;;  %v2598_v47 = vpop.f32.mrf.mxu1  ;;  %5396 = vmatpush3.bf16.msra.mxu0 %v5853_v58  ;;  %5397 = vmatprep.mubr.msk.bf16.mxu0 %vm5896_vm1, %v7478_v53 }
 0x203   :  { %v2102_v30 = vmax.f32 %v6688_v57, %v2052_v5  ;;  %v1915_v1 = vadd.f32 %v6870_v59, %v1914_v27  ;;  %5407 = vmatprep.subr.bf16.mxu0 %v7478_v53  ;;  %v2599_v61 = vadd.f32 %v6870_v59, %v2598_v47 }
 0x204   :  { %v1916_v20 = vpop.f32.mrf.mxu0  ;;  %v2600_v44 = vpop.f32.mrf.mxu1 }
 0x205   :  { %v2786_v13 = vmax.f32 %v2102_v30, %v2736_v17  ;;  %v2053_v62 = vmax.f32 %v1915_v1, 0.0  ;;  %v2737_v52 = vmax.f32 %v2599_v61, 0.0 }
 0x206   :  { %v1917_v6 = vpop.f32.mrf.mxu0  ;;  %v2601_v43 = vpop.f32.mrf.mxu1 }
 0x207   :  { %v2826_v8 = vpack.c.bf16 %v2786_v13, %v2785_v40  ;;  %v1918_v57 = vadd.f32 %v6870_v59, %v1917_v6  ;;  %v2602_v38 = vadd.f32 %v6870_v59, %v2601_v43  ;;  %v2103_v46 = vmax.f32 %v6700_v9, %v2053_v62 }
 0x208   :  { %v1919_v19 = vpop.f32.mrf.mxu0  ;;  %v2603_v33 = vpop.f32.mrf.mxu1 }
 0x209   :  { %v2054_v55 = vmax.f32 %v1918_v57, 0.0  ;;  %5392 = vmatmul.mubr.msk.bf16.vlgmr.msra.gmra.mxu1 %vm2858_vm2, %v2826_v8  ;;  %v2738_v11 = vmax.f32 %v2602_v38, 0.0  ;;  %v2787_v9 = vmax.f32 %v2103_v46, %v2737_v52  ;;  %v5856_v8 = vld [vmem:[%s7456_s3 + $0x68] sm:$0xff]  }
 0x20a   :  { %v1922_v18 = vpop.f32.mrf.mxu0  ;;  %v2606_v23 = vpop.f32.mrf.mxu1  ;;  %5402 = vmatpush3.bf16.msra.mxu1 %v5854_v50  ;;  %5403 = vmatprep.mubr.msk.bf16.mxu1 %vm5896_vm1, %v7478_v53 }
 0x20b   :  { %v2104_v28 = vmax.f32 %v6710_v25, %v2054_v55  ;;  %v1923_v32 = vadd.f32 %v6870_v59, %v1922_v18  ;;  %5413 = vmatprep.subr.bf16.mxu1 %v7478_v53  ;;  %v2607_v58 = vadd.f32 %v6870_v59, %v2606_v23 }
 0x20c   :  { %v1924_v15 = vpop.f32.mrf.mxu0  ;;  %v2608_v41 = vpop.f32.mrf.mxu1 }
 0x20d   :  { %v2788_v0 = vmax.f32 %v2104_v28, %v2738_v11  ;;  %v2055_v56 = vmax.f32 %v1923_v32, 0.0  ;;  %v2739_v27 = vmax.f32 %v2607_v58, 0.0 }
 0x20e   :  { %v1925_v49 = vpop.f32.mrf.mxu0  ;;  %v2609_v26 = vpop.f32.mrf.mxu1 }
 0x20f   :  { %v2827_v63 = vpack.c.bf16 %v2788_v0, %v2787_v9  ;;  %v1926_v25 = vadd.f32 %v6870_v59, %v1925_v49  ;;  %v2610_v34 = vadd.f32 %v6870_v59, %v2609_v26  ;;  %v2105_v5 = vmax.f32 %v6722_v42, %v2055_v56 }
 0x210   :  { %v1927_v21 = vpop.f32.mrf.mxu0  ;;  %v2611_v12 = vpop.f32.mrf.mxu1 }
 0x211   :  { %v2056_v47 = vmax.f32 %v1926_v25, 0.0  ;;  %5398 = vmatmul.mubr.msk.bf16.vlgmr.msra.gmra.mxu0 %vm2858_vm2, %v2827_v63  ;;  %v2740_v20 = vmax.f32 %v2610_v34, 0.0  ;;  %v2789_v42 = vmax.f32 %v2105_v5, %v2739_v27 }
 0x212   :  { %v1930_v30 = vpop.f32.mrf.mxu0  ;;  %v2614_v17 = vpop.f32.mrf.mxu1  ;;  %5408 = vmatpush3.bf16.msra.mxu0 %v5855_v37  ;;  %5409 = vmatprep.mubr.msk.bf16.mxu0 %vm5896_vm1, %v7478_v53 }
 0x213   :  { %v2106_v1 = vmax.f32 %v6732_v60, %v2056_v47  ;;  %v1931_v44 = vadd.f32 %v6870_v59, %v1930_v30  ;;  %5419 = vmatprep.subr.bf16.mxu0 %v7478_v53  ;;  %v2615_v6 = vadd.f32 %v6870_v59, %v2614_v17 }
 0x214   :  { %v1932_v40 = vpop.f32.mrf.mxu0  ;;  %v2616_v13 = vpop.f32.mrf.mxu1 }
 0x215   :  { %v2790_v62 = vmax.f32 %v2106_v1, %v2740_v20  ;;  %v2057_v61 = vmax.f32 %v1931_v44, 0.0  ;;  %v2741_v52 = vmax.f32 %v2615_v6, 0.0  ;;  %v5858_v6 = vld [vmem:[%s7456_s3 + $0x78] sm:$0xff]  }
 0x216   :  { %v1933_v43 = vpop.f32.mrf.mxu0  ;;  %v2617_v50 = vpop.f32.mrf.mxu1 }
 0x217   :  { %v2828_v57 = vpack.c.bf16 %v2790_v62, %v2789_v42  ;;  %v1934_v60 = vadd.f32 %v6870_v59, %v1933_v43  ;;  %v2618_v38 = vadd.f32 %v6870_v59, %v2617_v50  ;;  %v2107_v46 = vmax.f32 %v6744_v14, %v2057_v61  ;;  %v7187_v59 = vld [vmem:[%s7457_s2] ss:$0 sm:$0xff] }
 0x218   :  { %v1935_v19 = vpop.f32.mrf.mxu0  ;;  %v2619_v33 = vpop.f32.mrf.mxu1 }
 0x219   :  { %v2058_v55 = vmax.f32 %v1934_v60, 0.0  ;;  %5404 = vmatmul.mubr.msk.bf16.vlgmr.msra.gmra.mxu1 %vm2858_vm2, %v2828_v57  ;;  %v2742_v11 = vmax.f32 %v2618_v38, 0.0  ;;  %v2791_v41 = vmax.f32 %v2107_v46, %v2741_v52 }
 0x21a   :  { %v1938_v18 = vpop.f32.mrf.mxu0  ;;  %v2622_v23 = vpop.f32.mrf.mxu1  ;;  %5414 = vmatpush3.bf16.msra.mxu1 %v5856_v8  ;;  %5415 = vmatprep.mubr.msk.bf16.mxu1 %vm5896_vm1, %v7478_v53 }
 0x21b   :  { %v2108_v28 = vmax.f32 %v6754_v31, %v2058_v55  ;;  %v1939_v14 = vadd.f32 %v7187_v59, %v1938_v18  ;;  %5425 = vmatprep.subr.bf16.mxu1 %v7478_v53  ;;  %v2623_v56 = vadd.f32 %v7187_v59, %v2622_v23  ;;  %v5857_v31 = vld [vmem:[%s7456_s3 + $0x70] sm:$0xff]  }
 0x21c   :  { %v1940_v32 = vpop.f32.mrf.mxu0  ;;  %v2624_v15 = vpop.f32.mrf.mxu1 }
 0x21d   :  { %v2792_v9 = vmax.f32 %v2108_v28, %v2742_v11  ;;  %v2059_v0 = vmax.f32 %v1939_v14, 0.0  ;;  %v2743_v12 = vmax.f32 %v2623_v56, 0.0 }
 0x21e   :  { %v1941_v58 = vpop.f32.mrf.mxu0  ;;  %v2625_v49 = vpop.f32.mrf.mxu1 }
 0x21f   :  { %v2829_v26 = vpack.c.bf16 %v2792_v9, %v2791_v41  ;;  %v1942_v37 = vadd.f32 %v7187_v59, %v1941_v58  ;;  %v2626_v63 = vadd.f32 %v7187_v59, %v2625_v49  ;;  %v2109_v21 = vmax.f32 %v6766_v51, %v2059_v0  ;;  %v5859_v9 = vld [vmem:[%s7456_s3 + $0x80] sm:$0xff]  }
 0x220   :  { %v1943_v25 = vpop.f32.mrf.mxu0  ;;  %v2627_v34 = vpop.f32.mrf.mxu1 }
 0x221   :  { %v2060_v5 = vmax.f32 %v1942_v37, 0.0  ;;  %5410 = vmatmul.mubr.msk.bf16.vlgmr.msra.gmra.mxu0 %vm2858_vm2, %v2829_v26  ;;  %v2744_v17 = vmax.f32 %v2626_v63, 0.0  ;;  %v2793_v51 = vmax.f32 %v2109_v21, %v2743_v12 }
 0x222   :  { %v1946_v27 = vpop.f32.mrf.mxu0  ;;  %v2630_v47 = vpop.f32.mrf.mxu1  ;;  %5420 = vmatpush3.bf16.msra.mxu0 %v5857_v31  ;;  %5421 = vmatprep.mubr.msk.bf16.mxu0 %vm5896_vm1, %v7478_v53 }
 0x223   :  { %v2110_v30 = vmax.f32 %v6776_v4, %v2060_v5  ;;  %v1947_v1 = vadd.f32 %v7187_v59, %v1946_v27  ;;  %5431 = vmatprep.subr.bf16.mxu0 %v7478_v53  ;;  %v2631_v42 = vadd.f32 %v7187_v59, %v2630_v47 }
 0x224   :  { %v1948_v20 = vpop.f32.mrf.mxu0  ;;  %v2632_v44 = vpop.f32.mrf.mxu1 }
 0x225   :  { %v2794_v40 = vmax.f32 %v2110_v30, %v2744_v17  ;;  %v2061_v13 = vmax.f32 %v1947_v1, 0.0  ;;  %v2745_v38 = vmax.f32 %v2631_v42, 0.0  ;;  %v5860_v44 = vld [vmem:[%s7456_s3 + $0x88] sm:$0xff]  }
 0x226   :  { %v1949_v62 = vpop.f32.mrf.mxu0  ;;  %v2633_v61 = vpop.f32.mrf.mxu1 }
 0x227   :  { %v2830_v43 = vpack.c.bf16 %v2794_v40, %v2793_v51  ;;  %v1950_v4 = vadd.f32 %v7187_v59, %v1949_v62  ;;  %v2634_v50 = vadd.f32 %v7187_v59, %v2633_v61  ;;  %v2111_v60 = vmax.f32 %v6788_v24, %v2061_v13 }
 0x228   :  { %v1951_v8 = vpop.f32.mrf.mxu0  ;;  %v2635_v57 = vpop.f32.mrf.mxu1 }
 0x229   :  { %v2062_v19 = vmax.f32 %v1950_v4, 0.0  ;;  %5416 = vmatmul.mubr.msk.bf16.vlgmr.msra.gmra.mxu1 %vm2858_vm2, %v2830_v43  ;;  %v2746_v55 = vmax.f32 %v2634_v50, 0.0  ;;  %v2795_v24 = vmax.f32 %v2111_v60, %v2745_v38 }
 0x22a   :  { %v1954_v33 = vpop.f32.mrf.mxu0  ;;  %v2638_v46 = vpop.f32.mrf.mxu1  ;;  %5426 = vmatpush3.bf16.msra.mxu1 %v5858_v6  ;;  %5427 = vmatprep.mubr.msk.bf16.mxu1 %vm5896_vm1, %v7478_v53 }
 0x22b   :  { %v2112_v52 = vmax.f32 %v6798_v45, %v2062_v19  ;;  %v1955_v18 = vadd.f32 %v7187_v59, %v1954_v33  ;;  %5437 = vmatprep.subr.bf16.mxu1 %v7478_v53  ;;  %v2639_v32 = vadd.f32 %v7187_v59, %v2638_v46 }
 0x22c   :  { %v1956_v23 = vpop.f32.mrf.mxu0  ;;  %v2640_v28 = vpop.f32.mrf.mxu1 }
 0x22d   :  { %v2796_v11 = vmax.f32 %v2112_v52, %v2746_v55  ;;  %v2063_v14 = vmax.f32 %v1955_v18, 0.0  ;;  %v2747_v26 = vmax.f32 %v2639_v32, 0.0  ;;  %v5861_v18 = vld [vmem:[%s7456_s3 + $0x90] sm:$0xff]  }
 0x22e   :  { %v1957_v15 = vpop.f32.mrf.mxu0  ;;  %v2641_v41 = vpop.f32.mrf.mxu1 }
 0x22f   :  { %v2831_v0 = vpack.c.bf16 %v2796_v11, %v2795_v24  ;;  %v1958_v45 = vadd.f32 %v7187_v59, %v1957_v15  ;;  %v2642_v56 = vadd.f32 %v7187_v59, %v2641_v41  ;;  %v2113_v31 = vmax.f32 %v6810_v2, %v2063_v14 }
 0x230   :  { %v1959_v58 = vpop.f32.mrf.mxu0  ;;  %v2643_v49 = vpop.f32.mrf.mxu1 }
 0x231   :  { %v2064_v37 = vmax.f32 %v1958_v45, 0.0  ;;  %5422 = vmatmul.mubr.msk.bf16.vlgmr.msra.gmra.mxu0 %vm2858_vm2, %v2831_v0  ;;  %v2748_v21 = vmax.f32 %v2642_v56, 0.0  ;;  %v2797_v2 = vmax.f32 %v2113_v31, %v2747_v26 }
 0x232   :  { %v1962_v63 = vpop.f32.mrf.mxu0  ;;  %v2646_v25 = vpop.f32.mrf.mxu1  ;;  %5432 = vmatpush3.bf16.msra.mxu0 %v5859_v9  ;;  %5433 = vmatprep.mubr.msk.bf16.mxu0 %vm5896_vm1, %v7478_v53 }
 0x233   :  { %v2114_v34 = vmax.f32 %v6820_v22, %v2064_v37  ;;  %v1963_v12 = vadd.f32 %v7187_v59, %v1962_v63  ;;  %5443 = vmatprep.subr.bf16.mxu0 %v7478_v53  ;;  %v2647_v17 = vadd.f32 %v7187_v59, %v2646_v25 }
 0x234   :  { %v1964_v5 = vpop.f32.mrf.mxu0  ;;  %v2648_v27 = vpop.f32.mrf.mxu1 }
 0x235   :  { %v2798_v47 = vmax.f32 %v2114_v34, %v2748_v21  ;;  %v2065_v30 = vmax.f32 %v1963_v12, 0.0  ;;  %v2749_v61 = vmax.f32 %v2647_v17, 0.0  ;;  %v5862_v34 = vld [vmem:[%s7456_s3 + $0x98] sm:$0xff]  }
 0x236   :  { %v1965_v1 = vpop.f32.mrf.mxu0  ;;  %v2649_v20 = vpop.f32.mrf.mxu1 }
 0x237   :  { %v2832_v51 = vpack.c.bf16 %v2798_v47, %v2797_v2  ;;  %v1966_v22 = vadd.f32 %v7187_v59, %v1965_v1  ;;  %v2650_v40 = vadd.f32 %v7187_v59, %v2649_v20  ;;  %v2115_v62 = vmax.f32 %v6832_v48, %v2065_v30 }
 0x238   :  { %v1967_v13 = vpop.f32.mrf.mxu0  ;;  %v2651_v42 = vpop.f32.mrf.mxu1 }
 0x239   :  { %v2066_v6 = vmax.f32 %v1966_v22, 0.0  ;;  %5428 = vmatmul.mubr.msk.bf16.vlgmr.msra.gmra.mxu1 %vm2858_vm2, %v2832_v51  ;;  %v2750_v8 = vmax.f32 %v2650_v40, 0.0  ;;  %v2799_v48 = vmax.f32 %v2115_v62, %v2749_v61 }
 0x23a   :  { %v1970_v43 = vpop.f32.mrf.mxu0  ;;  %v2654_v4 = vpop.f32.mrf.mxu1  ;;  %5438 = vmatpush3.bf16.msra.mxu1 %v5860_v44  ;;  %5439 = vmatprep.mubr.msk.bf16.mxu1 %vm5896_vm1, %v7478_v53 }
 0x23b   :  { %v2116_v50 = vmax.f32 %v6842_v7, %v2066_v6  ;;  %v1971_v57 = vadd.f32 %v7187_v59, %v1970_v43  ;;  %5449 = vmatprep.subr.bf16.mxu1 %v7478_v53  ;;  %v2655_v46 = vadd.f32 %v7187_v59, %v2654_v4  ;;  %v5863_v43 = vld [vmem:[%s7456_s3 + $0xa0] sm:$0xff]  }
 0x23c   :  { %v1972_v60 = vpop.f32.mrf.mxu0  ;;  %v2656_v38 = vpop.f32.mrf.mxu1 }
 0x23d   :  { %v2800_v19 = vmax.f32 %v2116_v50, %v2750_v8  ;;  %v2067_v33 = vmax.f32 %v1971_v57, 0.0  ;;  %v2751_v32 = vmax.f32 %v2655_v46, 0.0 }
 0x23e   :  { %v1973_v52 = vpop.f32.mrf.mxu0  ;;  %v2657_v55 = vpop.f32.mrf.mxu1 }
 0x23f   :  { %v2833_v23 = vpack.c.bf16 %v2800_v19, %v2799_v48  ;;  %v1974_v7 = vadd.f32 %v7187_v59, %v1973_v52  ;;  %v2658_v28 = vadd.f32 %v7187_v59, %v2657_v55  ;;  %v2117_v14 = vmax.f32 %v6854_v29, %v2067_v33 }
 0x240   :  { %v1975_v24 = vpop.f32.mrf.mxu0  ;;  %v2659_v11 = vpop.f32.mrf.mxu1 }
 0x241   :  { %v2068_v15 = vmax.f32 %v1974_v7, 0.0  ;;  %5434 = vmatmul.mubr.msk.bf16.vlgmr.msra.gmra.mxu0 %vm2858_vm2, %v2833_v23  ;;  %v2752_v45 = vmax.f32 %v2658_v28, 0.0  ;;  %v2801_v29 = vmax.f32 %v2117_v14, %v2751_v32  ;;  %v5864_v32 = vld [vmem:[%s7456_s3 + $0xa8] sm:$0xff]  }
 0x242   :  { %v1978_v41 = vpop.f32.mrf.mxu0  ;;  %v2662_v9 = vpop.f32.mrf.mxu1  ;;  %5444 = vmatpush3.bf16.msra.mxu0 %v5861_v18  ;;  %5445 = vmatprep.mubr.msk.bf16.mxu0 %vm5896_vm1, %v7478_v53 }
 0x243   :  { %v2118_v0 = vmax.f32 %v6864_v54, %v2068_v15  ;;  %v1979_v56 = vadd.f32 %v7187_v59, %v1978_v41  ;;  %5455 = vmatprep.subr.bf16.mxu0 %v7478_v53  ;;  %v2663_v37 = vadd.f32 %v7187_v59, %v2662_v9 }
 0x244   :  { %v1980_v58 = vpop.f32.mrf.mxu0  ;;  %v2664_v49 = vpop.f32.mrf.mxu1 }
 0x245   :  { %v2802_v31 = vmax.f32 %v2118_v0, %v2752_v45  ;;  %v2069_v26 = vmax.f32 %v1979_v56, 0.0  ;;  %v2753_v47 = vmax.f32 %v2663_v37, 0.0 }
 0x246   :  { %v1981_v63 = vpop.f32.mrf.mxu0  ;;  %v2665_v25 = vpop.f32.mrf.mxu1 }
 0x247   :  { %v2834_v21 = vpack.c.bf16 %v2802_v31, %v2801_v29  ;;  %v1982_v54 = vadd.f32 %v7187_v59, %v1981_v63  ;;  %v2666_v12 = vadd.f32 %v7187_v59, %v2665_v25  ;;  %v2119_v2 = vmax.f32 %v6881_v16, %v2069_v26 }
 0x248   :  { %v1983_v5 = vpop.f32.mrf.mxu0  ;;  %v2667_v27 = vpop.f32.mrf.mxu1 }
 0x249   :  { %v2070_v30 = vmax.f32 %v1982_v54, 0.0  ;;  %5440 = vmatmul.mubr.msk.bf16.vlgmr.msra.gmra.mxu1 %vm2858_vm2, %v2834_v21  ;;  %v2754_v44 = vmax.f32 %v2666_v12, 0.0  ;;  %v2803_v16 = vmax.f32 %v2119_v2, %v2753_v47  ;;  %v5865_v27 = vld [vmem:[%s7456_s3 + $0xb0] sm:$0xff]  }
 0x24a   :  { %v1986_v17 = vpop.f32.mrf.mxu0  ;;  %v2670_v1 = vpop.f32.mrf.mxu1  ;;  %5450 = vmatpush3.bf16.msra.mxu1 %v5862_v34  ;;  %5451 = vmatprep.mubr.msk.bf16.mxu1 %vm5896_vm1, %v7478_v53 }
 0x24b   :  { %v2120_v20 = vmax.f32 %v6891_v39, %v2070_v30  ;;  %v1987_v51 = vadd.f32 %v7187_v59, %v1986_v17  ;;  %5461 = vmatprep.subr.bf16.mxu1 %v7478_v53  ;;  %v2671_v62 = vadd.f32 %v7187_v59, %v2670_v1  ;;  %v7479_v1 = vld [vmem:[#allocation2_spill] sm:$0xff] }
 0x24c   :  { %v1988_v22 = vpop.f32.mrf.mxu0  ;;  %v2672_v40 = vpop.f32.mrf.mxu1 }
 0x24d   :  { %v2804_v13 = vmax.f32 %v2120_v20, %v2754_v44  ;;  %v2071_v42 = vmax.f32 %v1987_v51, 0.0  ;;  %v2755_v38 = vmax.f32 %v2671_v62, 0.0 }
 0x24e   :  { %v1989_v61 = vpop.f32.mrf.mxu0  ;;  %v2673_v6 = vpop.f32.mrf.mxu1 }
 0x24f   :  { %v2835_v4 = vpack.c.bf16 %v2804_v13, %v2803_v16  ;;  %v1990_v39 = vadd.f32 %v7187_v59, %v1989_v61  ;;  %v2674_v50 = vadd.f32 %v7187_v59, %v2673_v6  ;;  %v2121_v60 = vmax.f32 %v6903_v10, %v2071_v42  ;;  %v7480_v16 = vld [vmem:[#allocation3_spill] sm:$0xff] }
 0x250   :  { %v1991_v8 = vpop.f32.mrf.mxu0  ;;  %v2675_v57 = vpop.f32.mrf.mxu1 }
 0x251   :  { %v2072_v48 = vmax.f32 %v1990_v39, 0.0  ;;  %5446 = vmatmul.mubr.msk.bf16.vlgmr.msra.gmra.mxu0 %vm2858_vm2, %v2835_v4  ;;  %v2756_v52 = vmax.f32 %v2674_v50, 0.0  ;;  %v2805_v10 = vmax.f32 %v2121_v60, %v2755_v38  ;;  %v5866_v60 = vld [vmem:[%s7456_s3 + $0xb8] sm:$0xff]  }
 0x252   :  { %v1994_v19 = vpop.f32.mrf.mxu0  ;;  %v2678_v33 = vpop.f32.mrf.mxu1  ;;  %5456 = vmatpush3.bf16.msra.mxu0 %v5863_v43  ;;  %5457 = vmatprep.mubr.msk.bf16.mxu0 %vm5896_vm1, %v7478_v53 }
 0x253   :  { %v2122_v46 = vmax.f32 %v6913_v36, %v2072_v48  ;;  %v1995_v55 = vadd.f32 %v7187_v59, %v1994_v19  ;;  %5467 = vmatprep.subr.bf16.mxu0 %v7478_v53  ;;  %v2679_v24 = vadd.f32 %v7187_v59, %v2678_v33 }
 0x254   :  { %v1996_v18 = vpop.f32.mrf.mxu0  ;;  %v2680_v23 = vpop.f32.mrf.mxu1 }
 0x255   :  { %v2806_v7 = vmax.f32 %v2122_v46, %v2756_v52  ;;  %v2073_v28 = vmax.f32 %v1995_v55, 0.0  ;;  %v2757_v56 = vmax.f32 %v2679_v24, 0.0  ;;  %v7481_v52 = vld [vmem:[#allocation4_spill] sm:$0xff] }
 0x256   :  { %v1997_v11 = vpop.f32.mrf.mxu0  ;;  %v2681_v14 = vpop.f32.mrf.mxu1 }
 0x257   :  { %v2836_v15 = vpack.c.bf16 %v2806_v7, %v2805_v10  ;;  %v1998_v36 = vadd.f32 %v7187_v59, %v1997_v11  ;;  %v2682_v41 = vadd.f32 %v7187_v59, %v2681_v14  ;;  %v2123_v45 = vmax.f32 %v6925_v3, %v2073_v28  ;;  %v7482_v28 = vld [vmem:[#allocation5_spill] sm:$0xff] }
 0x258   :  { %v1999_v9 = vpop.f32.mrf.mxu0  ;;  %v2683_v0 = vpop.f32.mrf.mxu1 }
 0x259   :  { %v2074_v58 = vmax.f32 %v1998_v36, 0.0  ;;  %5452 = vmatmul.mubr.msk.bf16.vlgmr.msra.gmra.mxu1 %vm2858_vm2, %v2836_v15  ;;  %v2758_v26 = vmax.f32 %v2682_v41, 0.0  ;;  %v2807_v3 = vmax.f32 %v2123_v45, %v2757_v56 }
 0x25a   :  { %v2002_v49 = vpop.f32.mrf.mxu0  ;;  %v2686_v29 = vpop.f32.mrf.mxu1  ;;  %5462 = vmatpush3.bf16.msra.mxu1 %v5864_v32  ;;  %5463 = vmatprep.mubr.msk.bf16.mxu1 %vm5896_vm1, %v7478_v53 }
 0x25b   :  { %v2124_v31 = vmax.f32 %v6935_v35, %v2074_v58  ;;  %v2003_v37 = vadd.f32 %v7187_v59, %v2002_v49  ;;  %5473 = vmatprep.subr.bf16.mxu1 %v7478_v53  ;;  %v2687_v54 = vadd.f32 %v7187_v59, %v2686_v29  ;;  %v5867_v58 = vld [vmem:[%s7456_s3 + $0xc0] sm:$0xff]  }
 0x25c   :  { %v2004_v63 = vpop.f32.mrf.mxu0  ;;  %v2688_v25 = vpop.f32.mrf.mxu1 }
 0x25d   :  { %v2808_v34 = vmax.f32 %v2124_v31, %v2758_v26  ;;  %v2075_v21 = vmax.f32 %v2003_v37, 0.0  ;;  %v2759_v44 = vmax.f32 %v2687_v54, 0.0  ;;  %v7483_v63 = vld [vmem:[#allocation6_spill] sm:$0xff] }
 0x25e   :  { %v2005_v12 = vpop.f32.mrf.mxu0  ;;  %v2689_v5 = vpop.f32.mrf.mxu1 }
 0x25f   :  { %v2837_v2 = vpack.c.bf16 %v2808_v34, %v2807_v3  ;;  %v2006_v35 = vadd.f32 %v7187_v59, %v2005_v12  ;;  %v2690_v47 = vadd.f32 %v7187_v59, %v2689_v5  ;;  %v2125_v20 = vmax.f32 %v7479_v1, %v2075_v21  ;;  %v7484_v12 = vld [vmem:[#allocation7_spill] sm:$0xff] }
 0x260   :  { %v2007_v30 = vpop.f32.mrf.mxu0  ;;  %v2691_v17 = vpop.f32.mrf.mxu1 }
 0x261   :  { %v2076_v51 = vmax.f32 %v2006_v35, 0.0  ;;  %5458 = vmatmul.mubr.msk.bf16.vlgmr.msra.gmra.mxu0 %vm2858_vm2, %v2837_v2  ;;  %v2760_v42 = vmax.f32 %v2690_v47, 0.0  ;;  %v2809_v43 = vmax.f32 %v2125_v20, %v2759_v44 }
 0x262   :  { %v2010_v22 = vpop.f32.mrf.mxu0  ;;  %v2694_v40 = vpop.f32.mrf.mxu1  ;;  %5468 = vmatpush3.bf16.msra.mxu0 %v5865_v27  ;;  %5469 = vmatprep.mubr.msk.bf16.mxu0 %vm5896_vm1, %v7478_v53 }
 0x263   :  { %v2126_v13 = vmax.f32 %v7480_v16, %v2076_v51  ;;  %v2011_v62 = vadd.f32 %v7187_v59, %v2010_v22  ;;  %5479 = vmatprep.subr.bf16.mxu0 %v7478_v53  ;;  %v2695_v50 = vadd.f32 %v7187_v59, %v2694_v40 }
 0x264   :  { %v2012_v61 = vpop.f32.mrf.mxu0  ;;  %v2696_v6 = vpop.f32.mrf.mxu1 }
 0x265   :  { %v2810_v4 = vmax.f32 %v2126_v13, %v2760_v42  ;;  %v2077_v39 = vmax.f32 %v2011_v62, 0.0  ;;  %v2761_v18 = vmax.f32 %v2695_v50, 0.0  ;;  %v7485_v62 = vld [vmem:[#allocation8_spill] sm:$0xff] }
 0x266   :  { %v2013_v8 = vpop.f32.mrf.mxu0  ;;  %v2697_v57 = vpop.f32.mrf.mxu1 }
 0x267   :  { %v2838_v38 = vpack.c.bf16 %v2810_v4, %v2809_v43  ;;  %v2014_v48 = vadd.f32 %v7187_v59, %v2013_v8  ;;  %v2698_v19 = vadd.f32 %v7187_v59, %v2697_v57  ;;  %v2127_v55 = vmax.f32 %v7481_v52, %v2077_v39  ;;  %v7486_v4 = vld [vmem:[#allocation9_spill] sm:$0xff] }
 0x268   :  { %v2015_v33 = vpop.f32.mrf.mxu0  ;;  %v2699_v46 = vpop.f32.mrf.mxu1 }
 0x269   :  { %v2078_v23 = vmax.f32 %v2014_v48, 0.0  ;;  %5464 = vmatmul.mubr.msk.bf16.vlgmr.msra.gmra.mxu1 %vm2858_vm2, %v2838_v38  ;;  %v2762_v11 = vmax.f32 %v2698_v19, 0.0  ;;  %v2811_v36 = vmax.f32 %v2127_v55, %v2761_v18  ;;  %v5144_v48 = vld [vmem:[%s7458_s4] ss:$0 sm:$0xff] }
 0x26a   :  { %v2018_v10 = vpop.f32.mrf.mxu0  ;;  %v2702_v7 = vpop.f32.mrf.mxu1  ;;  %5474 = vmatpush3.bf16.msra.mxu1 %v5866_v60  ;;  %5475 = vmatprep.mubr.msk.bf16.mxu1 %vm5896_vm1, %v7478_v53 }
 0x26b   :  { %v2128_v24 = vmax.f32 %v7482_v28, %v2078_v23  ;;  %v2019_v14 = vadd.f32 %v7187_v59, %v2018_v10  ;;  %5485 = vmatprep.subr.bf16.mxu1 %v7478_v53  ;;  %v2703_v0 = vadd.f32 %v7187_v59, %v2702_v7 }
 0x26c   :  { %v2020_v32 = vpop.f32.mrf.mxu0  ;;  %v2704_v15 = vpop.f32.mrf.mxu1 }
 0x26d   :  { %v2812_v41 = vmax.f32 %v2128_v24, %v2762_v11  ;;  %v2079_v9 = vmax.f32 %v2019_v14, 0.0  ;;  %v2763_v3 = vmax.f32 %v2703_v0, 0.0 }
 0x26e   :  { %v2021_v45 = vpop.f32.mrf.mxu0  ;;  %v2705_v56 = vpop.f32.mrf.mxu1 }
 0x26f   :  { %v2839_v49 = vpack.c.bf16 %v2812_v41, %v2811_v36  ;;  %v2022_v29 = vadd.f32 %v7187_v59, %v2021_v45  ;;  %v2706_v31 = vadd.f32 %v7187_v59, %v2705_v56  ;;  %v2129_v25 = vmax.f32 %v7483_v63, %v2079_v9 }
 0x270   :  { %v2023_v26 = vpop.f32.mrf.mxu0  ;;  %v2707_v37 = vpop.f32.mrf.mxu1 }
 0x271   :  { %v2080_v34 = vmax.f32 %v2022_v29, 0.0  ;;  %5470 = vmatmul.mubr.msk.bf16.vlgmr.msra.gmra.mxu0 %vm2858_vm2, %v2839_v49  ;;  %v2764_v27 = vmax.f32 %v2706_v31, 0.0  ;;  %v2813_v30 = vmax.f32 %v2129_v25, %v2763_v3 }
 0x272   :  { %v2026_v21 = vpop.f32.mrf.mxu0  ;;  %v2710_v54 = vpop.f32.mrf.mxu1  ;;  %5480 = vmatpush3.bf16.msra.mxu0 %v5867_v58  ;;  %5481 = vmatprep.mubr.msk.bf16.mxu0 %vm5896_vm1, %v7478_v53 }
 0x273   :  { %v2130_v5 = vmax.f32 %v7484_v12, %v2080_v34  ;;  %v2027_v2 = vadd.f32 %v7187_v59, %v2026_v21  ;;  %5505 = vmatprep.subr.bf16.mxu0 %v7478_v53  ;;  %v2711_v20 = vadd.f32 %v7187_v59, %v2710_v54  ;;  %v5868_v34 = vld [vmem:[%s7459_s5 + $0x38] ss:$0 sps:$4 sm:$0xff]  }
 0x274   :  { %v2028_v35 = vpop.f32.mrf.mxu0  ;;  %v2712_v47 = vpop.f32.mrf.mxu1  ;;  %v4301_v54 = vsel %vm4299_vm3, %v5868_v34, 0 }
 0x275   :  { %v2814_v17 = vmax.f32 %v2130_v5, %v2764_v27  ;;  %v2081_v1 = vmax.f32 %v2027_v2, 0.0  ;;  %v2765_v6 = vmax.f32 %v2711_v20, 0.0  ;;  %v5869_v2 = vld [vmem:[%s7459_s5 + $0x30] sm:$0xff]  }
 0x276   :  { %v2029_v44 = vpop.f32.mrf.mxu0  ;;  %v2713_v51 = vpop.f32.mrf.mxu1 }
 0x277   :  { %v2840_v22 = vpack.c.bf16 %v2814_v17, %v2813_v30  ;;  %v2030_v40 = vadd.f32 %v7187_v59, %v2029_v44  ;;  %v2714_v16 = vadd.f32 %v7187_v59, %v2713_v51  ;;  %v2131_v61 = vmax.f32 %v7485_v62, %v2081_v1  ;;  %v5870_v17 = vld [vmem:[%s7459_s5 + $0x28] sm:$0xff]   ;;  %v5871_v51 = vld [vmem:[%s7459_s5 + $0x20] sm:$0xff]  }
 0x278   :  { %v2031_v13 = vpop.f32.mrf.mxu0  ;;  %v2715_v42 = vpop.f32.mrf.mxu1 }
 0x279   :  { %v2082_v43 = vmax.f32 %v2030_v40, 0.0  ;;  %5476 = vmatmul.mubr.msk.bf16.vlgmr.msra.gmra.mxu1 %vm2858_vm2, %v2840_v22  ;;  %v2766_v50 = vmax.f32 %v2714_v16, 0.0  ;;  %v2815_v8 = vmax.f32 %v2131_v61, %v2765_v6  ;;  %v5872_v13 = vld [vmem:[%s7459_s5 + $0x18] sm:$0xff]   ;;  %v5873_v6 = vld [vmem:[%s7459_s5 + $0x10] sm:$0xff]  }
 0x27a   :  { %5501 = vmatprep.mubr.msk.bf16.mxu1 %vm5896_vm1, %v7478_v53  ;;  %5486 = vmatpush3.bf16.msra.mxu1 %v4301_v54 }
 0x27b   :  { %v2132_v39 = vmax.f32 %v7486_v4, %v2082_v43  ;;  %5487 = vmatprep.subr.bf16.mxu1 %v7478_v53 }
 0x27d   :  { %v2816_v57 = vmax.f32 %v2132_v39, %v2766_v50  ;;  %v5874_v50 = vld [vmem:[%s7459_s5 + $0x8] sm:$0xff]  }
 0x27e   :  { %5488 = vmatpush3.bf16.msra.mxu1 %v5869_v2 }
 0x27f   :  { %v2841_v60 = vpack.c.bf16 %v2816_v57, %v2815_v8  ;;  %5489 = vmatprep.subr.bf16.mxu1 %v7478_v53 }
 0x281   :  { %v2896_v38 = vpop.f32.mrf.mxu0  ;;  %5482 = vmatmul.mubr.msk.bf16.vlgmr.msra.gmra.mxu0 %vm2858_vm2, %v2841_v60 }
 0x282   :  { %5517 = vmatprep.mubr.msk.bf16.mxu0 %vm5896_vm1, %v7478_v53  ;;  %v2903_v46 = vadd.f32 %v5144_v48, %v2896_v38  ;;  %5490 = vmatpush3.bf16.msra.mxu1 %v5870_v17  ;;  %v5875_v38 = vld [vmem:[%s7459_s5] sm:$0xff]  }
 0x283   :  { %v5339_v59 = vpop.f32.mrf.mxu0  ;;  %5491 = vmatprep.subr.bf16.mxu1 %v7478_v53 }
 0x285   :  { %v2899_v19 = vpop.f32.mrf.mxu0 }
 0x286   :  { %v2904_v23 = vadd.f32 %v5144_v48, %v2899_v19  ;;  %5492 = vmatpush3.bf16.msra.mxu1 %v5871_v51 }
 0x287   :  { %v5340_v33 = vpop.f32.mrf.mxu0  ;;  %5493 = vmatprep.subr.bf16.mxu1 %v7478_v53 }
 0x289   :  { %v2951_v52 = vpop.f32.mrf.mxu1 }
 0x28a   :  { %v2958_v55 = vadd.f32 %v2951_v52, %v2903_v46  ;;  %5494 = vmatpush3.bf16.msra.mxu1 %v5872_v13  ;;  %v5876_v46 = vld [vmem:[%s7460_s7 + $0x28] ss:$0 sps:$4 sm:$0x33]  }
 0x28b   :  { %v5345_v18 = vpop.f32.mrf.mxu1  ;;  %5495 = vmatprep.subr.bf16.mxu1 %v7478_v53 }
 0x28c   :  { %v4404_v18 = vsel %vm4402_vm4, %v5876_v46, 0 }
 0x28d   :  { %v2954_v10 = vpop.f32.mrf.mxu1  ;;  %5506 = vmatpush3.bf16.msra.mxu0 %v4404_v18 }
 0x28e   :  { %v2959_v7 = vadd.f32 %v2954_v10, %v2904_v23  ;;  %5496 = vmatpush3.bf16.msra.mxu1 %v5873_v6  ;;  %v5877_v23 = vld [vmem:[%s7460_s7 + $0x20] sm:$0xff]   ;;  %5507 = vmatprep.subr.bf16.mxu0 %v7478_v53 }
 0x28f   :  { %v5346_v28 = vpop.f32.mrf.mxu1  ;;  %5497 = vmatprep.subr.bf16.mxu1 %v7478_v53 }
 0x291   :  { %v3006_v24 = vpop.f32.mrf.mxu0  ;;  %5508 = vmatpush3.bf16.msra.mxu0 %v5877_v23 }
 0x292   :  { %v3013_v11 = vadd.f32 %v3006_v24, %v2958_v55  ;;  %5498 = vmatpush3.bf16.msra.mxu1 %v5874_v50  ;;  %v5878_v24 = vld [vmem:[%s7460_s7 + $0x18] sm:$0xff]   ;;  %5509 = vmatprep.subr.bf16.mxu0 %v7478_v53 }
 0x293   :  { %v5351_v14 = vpop.f32.mrf.mxu0  ;;  %5499 = vmatprep.subr.bf16.mxu1 %v7478_v53 }
 0x295   :  { %v3009_v32 = vpop.f32.mrf.mxu0  ;;  %5510 = vmatpush3.bf16.msra.mxu0 %v5878_v24 }
 0x296   :  { %v3014_v15 = vadd.f32 %v3009_v32, %v2959_v7  ;;  %5500 = vmatpush3.bf16.msra.mxu1 %v5875_v38  ;;  %5511 = vmatprep.subr.bf16.mxu0 %v7478_v53 }
 0x297   :  { %v5352_v36 = vpop.f32.mrf.mxu0 }
 0x299   :  { %v3061_v41 = vpop.f32.mrf.mxu1 }
 0x29a   :  { %v3068_v9 = vadd.f32 %v3061_v41, %v3013_v11 }
 0x29b   :  { %v5357_v0 = vpop.f32.mrf.mxu1 }
 0x29d   :  { %v3064_v45 = vpop.f32.mrf.mxu1 }
 0x29e   :  { %v3069_v56 = vadd.f32 %v3064_v45, %v3014_v15  ;;  %v5879_v15 = vld [vmem:[%s7460_s7 + $0x10] sm:$0xff]  }
 0x29f   :  { %v5358_v58 = vpop.f32.mrf.mxu1  ;;  %5512 = vmatpush3.bf16.msra.mxu0 %v5879_v15 }
 0x2a0   :  { %5513 = vmatprep.subr.bf16.mxu0 %v7478_v53 }
 0x2a1   :  { %v3116_v49 = vpop.f32.mrf.mxu0 }
 0x2a2   :  { %v3123_v29 = vadd.f32 %v3116_v49, %v3068_v9 }
 0x2a3   :  { %v5363_v31 = vpop.f32.mrf.mxu0 }
 0x2a5   :  { %v3119_v26 = vpop.f32.mrf.mxu0 }
 0x2a6   :  { %v3124_v37 = vadd.f32 %v3119_v26, %v3069_v56 }
 0x2a7   :  { %v5364_v63 = vpop.f32.mrf.mxu0 }
 0x2a9   :  { %v3171_v25 = vpop.f32.mrf.mxu1 }
 0x2aa   :  { %v3178_v3 = vadd.f32 %v3171_v25, %v3123_v29 }
 0x2ab   :  { %v5369_v21 = vpop.f32.mrf.mxu1 }
 0x2ad   :  { %v3174_v12 = vpop.f32.mrf.mxu1 }
 0x2ae   :  { %v3179_v5 = vadd.f32 %v3174_v12, %v3124_v37 }
 0x2af   :  { %v5370_v27 = vpop.f32.mrf.mxu1 }
 0x2b1   :  { %v3226_v35 = vpop.f32.mrf.mxu0 }
 0x2b2   :  { %v3233_v47 = vadd.f32 %v3226_v35, %v3178_v3 }
 0x2b3   :  { %v5375_v30 = vpop.f32.mrf.mxu0 }
 0x2b5   :  { %v3229_v1 = vpop.f32.mrf.mxu0 }
 0x2b6   :  { %v3234_v20 = vadd.f32 %v3229_v1, %v3179_v5 }
 0x2b7   :  { %v5376_v44 = vpop.f32.mrf.mxu0 }
 0x2b9   :  { %v3281_v22 = vpop.f32.mrf.mxu1 }
 0x2ba   :  { %v3288_v40 = vadd.f32 %v3281_v22, %v3233_v47 }
 0x2bb   :  { %v5381_v16 = vpop.f32.mrf.mxu1 }
 0x2bd   :  { %v3284_v42 = vpop.f32.mrf.mxu1 }
 0x2be   :  { %v3289_v62 = vadd.f32 %v3284_v42, %v3234_v20 }
 0x2bf   :  { %v5382_v61 = vpop.f32.mrf.mxu1 }
 0x2c1   :  { %v3336_v43 = vpop.f32.mrf.mxu0 }
 0x2c2   :  { %v3343_v4 = vadd.f32 %v3336_v43, %v3288_v40 }
 0x2c3   :  { %v5387_v39 = vpop.f32.mrf.mxu0 }
 0x2c5   :  { %v3339_v8 = vpop.f32.mrf.mxu0 }
 0x2c6   :  { %v3344_v57 = vadd.f32 %v3339_v8, %v3289_v62 }
 0x2c7   :  { %v5388_v60 = vpop.f32.mrf.mxu0 }
 0x2c9   :  { %v3391_v59 = vpop.f32.mrf.mxu1 }
 0x2ca   :  { %v3398_v48 = vadd.f32 %v3391_v59, %v3343_v4 }
 0x2cb   :  { %v5393_v19 = vpop.f32.mrf.mxu1 }
 0x2cd   :  { %v3394_v33 = vpop.f32.mrf.mxu1 }
 0x2ce   :  { %v3399_v52 = vadd.f32 %v3394_v33, %v3344_v57 }
 0x2cf   :  { %v5394_v55 = vpop.f32.mrf.mxu1 }
 0x2d1   :  { %v3446_v10 = vpop.f32.mrf.mxu0 }
 0x2d2   :  { %v3453_v7 = vadd.f32 %v3446_v10, %v3398_v48 }
 0x2d3   :  { %v5399_v28 = vpop.f32.mrf.mxu0 }
 0x2d5   :  { %v3449_v11 = vpop.f32.mrf.mxu0 }
 0x2d6   :  { %v3454_v14 = vadd.f32 %v3449_v11, %v3399_v52 }
 0x2d7   :  { %v5400_v32 = vpop.f32.mrf.mxu0 }
 0x2d9   :  { %v3501_v36 = vpop.f32.mrf.mxu1 }
 0x2da   :  { %v3508_v41 = vadd.f32 %v3501_v36, %v3453_v7 }
 0x2db   :  { %v5405_v9 = vpop.f32.mrf.mxu1 }
 0x2dd   :  { %v3504_v0 = vpop.f32.mrf.mxu1 }
 0x2de   :  { %v3509_v45 = vadd.f32 %v3504_v0, %v3454_v14 }
 0x2df   :  { %v5406_v56 = vpop.f32.mrf.mxu1 }
 0x2e1   :  { %v3556_v58 = vpop.f32.mrf.mxu0 }
 0x2e2   :  { %v3563_v49 = vadd.f32 %v3556_v58, %v3508_v41 }
 0x2e3   :  { %v5411_v29 = vpop.f32.mrf.mxu0 }
 0x2e5   :  { %v3559_v31 = vpop.f32.mrf.mxu0 }
 0x2e6   :  { %v3564_v26 = vadd.f32 %v3559_v31, %v3509_v45 }
 0x2e7   :  { %v5412_v37 = vpop.f32.mrf.mxu0 }
 0x2e9   :  { %v3611_v63 = vpop.f32.mrf.mxu1 }
 0x2ea   :  { %v3618_v25 = vadd.f32 %v3611_v63, %v3563_v49 }
 0x2eb   :  { %v5417_v3 = vpop.f32.mrf.mxu1 }
 0x2ed   :  { %v3614_v34 = vpop.f32.mrf.mxu1 }
 0x2ee   :  { %v3619_v21 = vadd.f32 %v3614_v34, %v3564_v26 }
 0x2ef   :  { %v5418_v54 = vpop.f32.mrf.mxu1 }
 0x2f1   :  { %v3666_v12 = vpop.f32.mrf.mxu0 }
 0x2f2   :  { %v3673_v5 = vadd.f32 %v3666_v12, %v3618_v25 }
 0x2f3   :  { %v5423_v27 = vpop.f32.mrf.mxu0 }
 0x2f5   :  { %v3669_v2 = vpop.f32.mrf.mxu0 }
 0x2f6   :  { %v3674_v55 = vadd.f32 %v3669_v2, %v3619_v21 }
 0x2f7   :  { %v5424_v35 = vpop.f32.mrf.mxu0 }
 0x2f9   :  { %v3721_v47 = vpop.f32.mrf.mxu1 }
 0x2fa   :  { %v3728_v18 = vadd.f32 %v3721_v47, %v3673_v5 }
 0x2fb   :  { %v5429_v30 = vpop.f32.mrf.mxu1 }
 0x2fc   :  { %v5880_v30 = vld [vmem:[%s7460_s7 + $0x8] sm:$0xff]  }
 0x2fd   :  { %v3724_v17 = vpop.f32.mrf.mxu1  ;;  %5514 = vmatpush3.bf16.msra.mxu0 %v5880_v30 }
 0x2fe   :  { %v3729_v10 = vadd.f32 %v3724_v17, %v3674_v55  ;;  %5515 = vmatprep.subr.bf16.mxu0 %v7478_v53  ;;  %v5881_v17 = vld [vmem:[%s7460_s7] sm:$0xff]  }
 0x2ff   :  { %v5430_v1 = vpop.f32.mrf.mxu1 }
 0x300   :  { %v5243_v1 = vld [vmem:[%s7461_s6] ss:$0 sm:$0xff] }
 0x301   :  { %v3776_v20 = vpop.f32.mrf.mxu0  ;;  %5516 = vmatpush3.bf16.msra.mxu0 %v5881_v17 }
 0x302   :  { %v3783_v7 = vadd.f32 %v3776_v20, %v3728_v18  ;;  %5521 = vmatprep.subr.mxu0 %v7478_v53 }
 0x303   :  { %v5435_v44 = vpop.f32.mrf.mxu0 }
 0x305   :  { %v3779_v51 = vpop.f32.mrf.mxu0 }
 0x306   :  { %v3784_v24 = vadd.f32 %v3779_v51, %v3729_v10 }
 0x307   :  { %v5436_v22 = vpop.f32.mrf.mxu0 }
 0x309   :  { %v3831_v40 = vpop.f32.mrf.mxu1 }
 0x30a   :  { %v3838_v11 = vadd.f32 %v3831_v40, %v3783_v7 }
 0x30b   :  { %v5441_v16 = vpop.f32.mrf.mxu1 }
 0x30d   :  { %v3834_v13 = vpop.f32.mrf.mxu1 }
 0x30e   :  { %v3839_v32 = vadd.f32 %v3834_v13, %v3784_v24 }
 0x30f   :  { %v5442_v42 = vpop.f32.mrf.mxu1 }
 0x311   :  { %v3886_v62 = vpop.f32.mrf.mxu0 }
 0x312   :  { %v3893_v15 = vadd.f32 %v3886_v62, %v3838_v11  ;;  %v4451_v11 = vld [vmem:[%s7465_s9 + $0x8] sm:$0xff] }
 0x313   :  { %v5447_v61 = vpop.f32.mrf.mxu0 }
 0x314   :  { %v4548_v61 = vld [vmem:[%s7462_s11] sm:$0x3] }
 0x315   :  { %v3889_v6 = vpop.f32.mrf.mxu0 }
 0x316   :  { %v3894_v41 = vadd.f32 %v3889_v6, %v3839_v32  ;;  %v5253_v6 = vld [vmem:[%s7463_s8] ss:$0 sm:$0xff] }
 0x317   :  { %v5448_v43 = vpop.f32.mrf.mxu0 }
 0x319   :  { %v3941_v4 = vpop.f32.mrf.mxu1 }
 0x31a   :  { %v3948_v9 = vadd.f32 %v3941_v4, %v3893_v15 }
 0x31b   :  { %v5453_v39 = vpop.f32.mrf.mxu1 }
 0x31d   :  { %v3944_v50 = vpop.f32.mrf.mxu1 }
 0x31e   :  { %v3949_v45 = vadd.f32 %v3944_v50, %v3894_v41 }
 0x31f   :  { %v5454_v8 = vpop.f32.mrf.mxu1 }
 0x321   :  { %v3996_v57 = vpop.f32.mrf.mxu0 }
 0x322   :  { %v4003_v56 = vadd.f32 %v3996_v57, %v3948_v9  ;;  %v4476_v9 = vlaneseq }
 0x323   :  { %v5459_v60 = vpop.f32.mrf.mxu0 }
 0x325   :  { %v3999_v38 = vpop.f32.mrf.mxu0 }
 0x326   :  { %v4004_v49 = vadd.f32 %v3999_v38, %v3949_v45 }
 0x327   :  { %v5460_v59 = vpop.f32.mrf.mxu0 }
 0x328   :  { %v4450_v59 = vld [vmem:[%s7465_s9] sm:$0xff] }
 0x329   :  { %v4051_v48 = vpop.f32.mrf.mxu1 }
 0x32a   :  { %v4058_v29 = vadd.f32 %v4051_v48, %v4003_v56 }
 0x32b   :  { %v5465_v19 = vpop.f32.mrf.mxu1 }
 0x32d   :  { %v4054_v33 = vpop.f32.mrf.mxu1 }
 0x32e   :  { %v4059_v26 = vadd.f32 %v4054_v33, %v4004_v49 }
 0x32f   :  { %v5466_v46 = vpop.f32.mrf.mxu1 }
 0x331   :  { %v4106_v52 = vpop.f32.mrf.mxu0 }
 0x332   :  { %v4113_v37 = vadd.f32 %v4106_v52, %v4058_v29 }
 0x333   :  { %v5471_v23 = vpop.f32.mrf.mxu0 }
 0x335   :  { %v4109_v28 = vpop.f32.mrf.mxu0 }
 0x336   :  { %v4114_v25 = vadd.f32 %v4109_v28, %v4059_v26 }
 0x337   :  { %v5472_v14 = vpop.f32.mrf.mxu0 }
 0x339   :  { %v4161_v36 = vpop.f32.mrf.mxu1 }
 0x33a   :  { %v4168_v3 = vadd.f32 %v4161_v36, %v4113_v37 }
 0x33b   :  { %v5477_v0 = vpop.f32.mrf.mxu1 }
 0x33c   :  { %v7434_v0 = vand.u32 127, %v4476_v9 }
 0x33d   :  { %v4164_v58 = vpop.f32.mrf.mxu1 }
 0x33e   :  { %v4169_v21 = vadd.f32 %v4164_v58, %v4114_v25  ;;  %vm4662_vm3 = vcmp.eq.s32.totalorder %v7434_v0, 1  ;;  %vm4664_vm4 = vcmp.eq.s32.totalorder %v7434_v0, 2 }
 0x33f   :  { %v5478_v31 = vpop.f32.mrf.mxu1 }
 0x341   :  { %v4216_v63 = vpop.f32.mrf.mxu0 }
 0x342   :  { %v4223_v54 = vadd.f32 %v4216_v63, %v4168_v3 }
 0x343   :  { %v5483_v34 = vpop.f32.mrf.mxu0 }
 0x344   :  { %v4225_v2 = vmax.f32 %v4223_v54, 0.0 }
 0x345   :  { %v4219_v12 = vpop.f32.mrf.mxu0 }
 0x346   :  { %v4224_v5 = vadd.f32 %v4219_v12, %v4169_v21 }
 0x347   :  { %v5484_v27 = vpop.f32.mrf.mxu0 }
 0x348   :  { %v4226_v35 = vmax.f32 %v4224_v5, 0.0 }
 0x34a   :  { %v4227_v47 = vpack.c.bf16 %v4226_v35, %v4225_v2 }
 0x34c   :  { %5502 = vmatmul.mubr.msk.bf16.vlgmr.msra.gmra.mxu1 %vm4295_vm5, %v4227_v47  ;;  %vm4666_vm5 = vcmp.eq.s32.totalorder %v7434_v0, 3 }
 0x40c   :  { %v4337_v20 = vpop.f32.mrf.mxu1 }
 0x40d   :  { %v4338_v51 = vadd.f32 %v5243_v1, %v4337_v20 }
 0x40e   :  { %v5503_v44 = vpop.f32.mrf.mxu1 }
 0x40f   :  { %v4344_v13 = vmax.f32 %v4338_v51, 0.0 }
 0x410   :  { %v4340_v22 = vpop.f32.mrf.mxu1 }
 0x411   :  { %v4341_v40 = vadd.f32 %v5243_v1, %v4340_v22  ;;  %v4637_v1 = vld [vmem:[%s7466_s10] sm:$0x3] }
 0x412   :  { %v5504_v16 = vpop.f32.mrf.mxu1  ;;  %v4639_v20 = vsub.f32 1.0, %v4637_v1 }
 0x413   :  { %v4345_v42 = vmax.f32 %v4341_v40, 0.0  ;;  %v4499_v40 = vshrl.u32 %v4476_v9, 7 }
 0x415   :  { %v4346_v62 = vpack.c.bf16 %v4345_v42, %v4344_v13  ;;  %vm4525_vm14 = vcmp.ge.s32.totalorder %v4499_v40, 2  ;;  %vm4527_vm15 = vcmp.lt.s32.totalorder %v4499_v40, 4 }
 0x416   :  { %vm4529_vm0 = vmand %vm4525_vm14, %vm4527_vm15 }
 0x417   :  { %5518 = vmatmul.mubr.msk.bf16.vlgmr.msra.gmra.mxu0 %vm4398_vm6, %v4346_v62  ;;  %v5264_v62 = vsel %vm4529_vm0, 1.0, %v7478_v53  ;;  %vm4673_vm6 = vcmask 57344  }
 0x418   :  { %5522 = vmatpush3.msra.mxu0 %v4345_v42  ;;  %5525 = vmatprep.mubr.msk.f32.mxu0 %vm5896_vm1, %v7478_v53  ;;  %vm4503_vm1 = vcmp.lt.s32.totalorder %v4499_v40, 2 }
 0x419   :  { %5523 = vmatprep.subr.mxu0 %v7478_v53 }
 0x41a   :  { %5524 = vmatpush3.msra.mxu0 %v4344_v13 }
 0x41f   :  { %5526 = vmatmul.mubr.msk.f32.vlgmr.msra.gmra.mxu0 %vm2858_vm2, %v4548_v61  ;;  %vm4655_vm2 = vcmp.eq.s32.totalorder %v7434_v0, 0 }
 0x4d7   :  { %v4440_v43 = vpop.f32.mrf.mxu0 }
 0x4d8   :  { %v4441_v4 = vadd.f32 %v5253_v6, %v4440_v43 }
 0x4d9   :  { %v5519_v39 = vpop.f32.mrf.mxu0 }
 0x4da   :  { %4448 = vst.msk [vmem:[%s7464_s12] sm:$0xff] %vm4447_vm7, %v4441_v4  ;;  %v4452_v50 = vsel %vm4447_vm7, %v4441_v4, -inf }
 0x4db   :  { %4453 = vmax.xlane.f32.xlu0 %v4452_v50  ;;  %v4443_v8 = vpop.f32.mrf.mxu0 }
 0x4dc   :  { %v4444_v57 = vadd.f32 %v5253_v6, %v4443_v8 }
 0x4dd   :  { %v5520_v60 = vpop.f32.mrf.mxu0 }
 0x4de   :  { %4449 = vst.msk [vmem:[%s7464_s12 + $0x8] sm:$0xff] %vm4447_vm7, %v4444_v57  ;;  %v4455_v38 = vsel %vm4447_vm7, %v4444_v57, -inf }
 0x4df   :  { %4456 = vmax.xlane.f32.xlu0 %v4455_v38  ;;  %v4618_v48 = vpop.f32.mrf.mxu0 }
 0x4e0   :  { %v4619_v14 = vadd.f32 1e-06, %v4618_v48 }
 0x4e1   :  { %v5527_v19 = vpop.f32.mrf.mxu0 }
 0x4e2   :  { %v4622_v32 = vmul.f32 %v4619_v14, %v4619_v14 }
 0x4e4   :  { %v4624_v15 = vsel %vm4623_vm8, %v4622_v32, 0.0 }
 0x4f5   :  { %4479 = vperm.xlu0 %5531, %v4450_v59  }
 0x564   :  { %v4454_v33 = vpop.xlane.xlu0 %4453 }
 0x565   :  { %v4458_v46 = vsub.f32 %v4441_v4, %v4454_v33  ;;  %v5263_v4 = vsel %vm4503_vm1, 1.0, %v7478_v53 }
 0x567   :  { %v4460_v52 = vmul.f32 1.442695, %v4458_v46 }
 0x568   :  { %v4457_v55 = vpop.xlane.xlu0 %4456 }
 0x569   :  { %5882 = vpow2.f32 %v4460_v52  ;;  %v4459_v18 = vsub.f32 %v4444_v57, %v4457_v55 }
 0x56b   :  { %v4462_v23 = vmul.f32 1.442695, %v4459_v18 }
 0x56d   :  { %5884 = vpow2.f32 %v4462_v23 }
 0x570   :  { %v4480_v45 = vpop.permute.xlu0 %4479 }
 0x571   :  { %vm4484_vm9 = vcmp.eq.s32.totalorder %v7434_v0, %v4480_v45 }
 0x572   :  { %v5261_v29 = vsel %vm4484_vm9, 1.0, %v7478_v53 }
 0x576   :  { %v5883_v10 = vpop.eup %5882 }
 0x577   :  { %v4464_v7 = vsel %vm4447_vm7, %v5883_v10, 0.0 }
 0x578   :  { %4465 = vadd.xlane.f32.xlu1 %v4464_v7 }
 0x57a   :  { %v5885_v28 = vpop.eup %5884 }
 0x57b   :  { %v4467_v24 = vsel %vm4447_vm7, %v5885_v28, 0.0 }
 0x57c   :  { %4468 = vadd.xlane.f32.xlu1 %v4467_v24 }
 0x58d   :  { %4482 = vperm.xlu1 %5532, %v4451_v11  }
 0x5b1   :  { %4625 = vadd.xlane.f32.xlu1 %v4624_v15 }
 0x601   :  { %v4466_v36 = vpop.xlane.xlu1 %4465 }
 0x602   :  { %5886 = vlog2.f32 %v4466_v36 }
 0x605   :  { %v4469_v41 = vpop.xlane.xlu1 %4468 }
 0x606   :  { %5888 = vlog2.f32 %v4469_v41 }
 0x609   :  { %v4483_v58 = vpop.permute.xlu1 %4482 }
 0x60a   :  { %vm4485_vm10 = vcmp.eq.s32.totalorder %v7434_v0, %v4483_v58 }
 0x60b   :  { %v5262_v25 = vsel %vm4485_vm10, 1.0, %v7478_v53 }
 0x60f   :  { %v5887_v56 = vpop.eup %5886 }
 0x610   :  { %v4471_v49 = vmul.f32 0.6931472, %v5887_v56 }
 0x612   :  { %v4474_v31 = vsub.f32 %v4458_v46, %v4471_v49 }
 0x613   :  { %v5889_v26 = vpop.eup %5888 }
 0x614   :  { %v4473_v37 = vmul.f32 0.6931472, %v5889_v26  ;;  %v4490_v63 = vmul.f32 %v5261_v29, %v4474_v31 }
 0x616   :  { %v4492_v3 = vsel %vm4447_vm7, %v4490_v63, 0.0  ;;  %v4475_v34 = vsub.f32 %v4459_v18, %v4473_v37 }
 0x617   :  { %4493 = vadd.xlane.f32.xlu0 %v4492_v3 }
 0x618   :  { %v4491_v21 = vmul.f32 %v5262_v25, %v4475_v34 }
 0x61a   :  { %v4495_v54 = vsel %vm4447_vm7, %v4491_v21, 0.0 }
 0x61b   :  { %4496 = vadd.xlane.f32.xlu1 %v4495_v54 }
 0x63a   :  { %v4626_v12 = vpop.xlane.xlu1 %4625 }
 0x63b   :  { %5890 = vrsqrt.f32 %v4626_v12  ;;  %vm4629_vm11 = vcmp.eq.f32.partialorder %v4626_v12, inf  ;;  %v4632_v2 = vand.u32 2147483648, %v4626_v12  ;;  %vm4631_vm12 = vcmp.eq.f32.partialorder %v4626_v12, 0.0 }
 0x63c   :  { %v4638_v51 = vmul.f32 %v4637_v1, %v4626_v12 }
 0x648   :  { %v5891_v5 = vpop.eup %5890 }
 0x649   :  { %v4628_v27 = vmul.f32 %v5891_v5, %v4626_v12 }
 0x64b   :  { %v4630_v35 = vsel %vm4629_vm11, %v4626_v12, %v4628_v27 }
 0x64c   :  { %v4633_v47 = vsel %vm4631_vm12, %v4632_v2, %v4630_v35 }
 0x64d   :  { %v4634_v30 = vsub.f32 1.0, %v4633_v47 }
 0x64f   :  { %v4635_v17 = vmax.f32 %v4634_v30, 0.0 }
 0x651   :  { %v4636_v44 = vmul.f32 %v4635_v17, %v4635_v17 }
 0x653   :  { %v4640_v22 = vmul.f32 %v4639_v20, %v4636_v44 }
 0x655   :  { %v4641_v16 = vadd.f32 %v4640_v22, %v4638_v51 }
 0x657   :  { %v4644_v13 = vsel %vm4643_vm13, %v4641_v16, 0.0 }
 0x658   :  { %v4645_v42 = vrot.slane %v4644_v13, 4 }
 0x65a   :  { %v4646_v43 = vadd.f32 %v4645_v42, %v4644_v13 }
 0x65c   :  { %v4647_v57 = vrot.slane %v4646_v43, 2 }
 0x65e   :  { %v4648_v48 = vadd.f32 %v4647_v57, %v4646_v43 }
 0x660   :  { %v4649_v46 = vrot.slane %v4648_v48, 1 }
 0x662   :  { %v4650_v18 = vadd.f32 %v4649_v46, %v4648_v48 }
 0x664   :  { %v4651_v7 = vmul.f32 0.5, %v4650_v18 }
 0x666   :  { %v4653_v53 = vmul.f32 0.25, %v4651_v7 }
 0x6a0   :  { %v4494_v61 = vpop.xlane.xlu0 %4493 }
 0x6a1   :  { %v4535_v6 = vmul.f32 %v5264_v62, %v4494_v61  ;;  %v4511_v50 = vmul.f32 %v5263_v4, %v4494_v61 }
 0x6a4   :  { %v4497_v39 = vpop.xlane.xlu1 %4496 }
 0x6a5   :  { %v4512_v8 = vmul.f32 0.0, %v4497_v39 }
 0x6a7   :  { %v4515_v60 = vadd.f32 %v4512_v8, %v4511_v50  ;;  %v4539_v38 = vadd.f32 %v4535_v6, %v4512_v8 }
 0x6a9   :  { %v4516_v59 = vrot.slane %v4515_v60, 4  ;;  %v4540_v14 = vrot.slane %v4539_v38, 4 }
 0x6ab   :  { %v4517_v19 = vadd.f32 %v4516_v59, %v4515_v60  ;;  %v4541_v32 = vadd.f32 %v4540_v14, %v4539_v38 }
 0x6ad   :  { %v4518_v33 = vrot.slane %v4517_v19, 2  ;;  %v4542_v15 = vrot.slane %v4541_v32, 2 }
 0x6af   :  { %v4519_v52 = vadd.f32 %v4518_v33, %v4517_v19  ;;  %v4543_v36 = vadd.f32 %v4542_v15, %v4541_v32 }
 0x6b1   :  { %v4520_v55 = vrot.slane %v4519_v52, 1  ;;  %v4544_v41 = vrot.slane %v4543_v36, 1 }
 0x6b3   :  { %v4521_v23 = vadd.f32 %v4520_v55, %v4519_v52  ;;  %v4545_v9 = vadd.f32 %v4544_v41, %v4543_v36 }
 0x6b5   :  { %v4522_v10 = vsub.f32 0.0, %v4521_v23  ;;  %v4546_v45 = vsub.f32 0.0, %v4545_v9 }
 0x6b7   :  { %v4524_v28 = vmul.f32 0.5, %v4522_v10  ;;  %v4547_v49 = vmul.f32 0.5, %v4546_v45 }
 0x6b9   :  { %v4652_v24 = vmul.f32 0.75, %v4524_v28 }
 0x6bb   :  { %v4654_v11 = vadd.f32 %v4653_v53, %v4652_v24 }
 0x6bd   :  { %4658 = vperm.xlu1 %5532, %v4654_v11  }
 0x6c1   :  { %4669 = vperm.xlu1 %5532, %v4651_v7  }
 0x738   :  { %v4659_v56 = vpop.permute.xlu1 %4658 }
 0x739   :  { %v4661_v58 = vsel %vm4655_vm2, %v4659_v56, 0.0 }
 0x73a   :  { %v4663_v29 = vsel %vm4662_vm3, %v4524_v28, %v4661_v58 }
 0x73b   :  { %v4665_v31 = vsel %vm4664_vm4, %v4547_v49, %v4663_v29 }
 0x73c   :  { %v4670_v26 = vpop.permute.xlu1 %4669 }
 0x73d   :  { %v4672_v37 = vsel %vm4666_vm5, %v4670_v26, %v4665_v31 }
 0x73e   :  { %4674 = vst.msk [vmem:[%s7467_s13] sm:$0x1] %vm4673_vm6, %v4672_v37 }

</bundles_post_ra>
